<compile_context>
chip_gen: v7x
topology: tpu7x:2x2x1
jax: 0.10.0
libtpu: 0.0.40
codegen_flags: <defaults>
</compile_context>

<pallas_src>
import functools

import numpy as np
import jax
import jax.numpy as jnp
from jax.experimental import pallas as pl
from jax.experimental.pallas import tpu as pltpu


# --------------------------- trace-time helpers -----------------------------

def _interp_weights(n_in, n_out):
    """Per-output (i0, i1, frac) for torch bilinear upsample with align_corners=True."""
    i0 = np.zeros(n_out, np.int32)
    i1 = np.zeros(n_out, np.int32)
    fr = np.zeros(n_out, np.float32)
    if n_in == 1 or n_out == 1:
        return i0, i1, fr
    scale = (n_in - 1) / (n_out - 1)
    for i in range(n_out):
        src = i * scale
        a = min(int(np.floor(src)), n_in - 1)
        b = min(a + 1, n_in - 1)
        i0[i], i1[i], fr[i] = a, b, np.float32(src - a)
    return i0, i1, fr


# ----------------------------- in-kernel pieces ------------------------------

def _pad_hw1(t):
    """Zero-pad an (R, S, C) tile by 1 on both spatial dims -> (R+2, S+2, C)."""
    r, s, c = t.shape
    zc = jnp.zeros((r, 1, c), t.dtype)
    t = jnp.concatenate([zc, t, zc], axis=1)          # pad along W (sublane dim)
    zr = jnp.zeros((1, s + 2, c), t.dtype)
    return jnp.concatenate([zr, t, zr], axis=0)       # pad along H (outer dim)


def _conv3x3_acc(t, w_ref, acc, mm_dtype):
    """Accumulate a 3x3 'same' conv into acc.

    t: (R, S, Cin) f32 tile (VMEM/register resident), w_ref: (9, Cin, Cout) in
    mm_dtype, acc: (R*S, Cout) f32.  In-kernel im2col: 9 shifted-slab matmuls on
    the MXU, mm_dtype operands / f32 accumulation.
    """
    r, s, cin = t.shape
    tp = _pad_hw1(t)                                  # f32 padded tile
    wv = w_ref[...]                                   # (9, Cin, Cout), already mm_dtype
    for ky in range(3):
        for kx in range(3):
            slab = tp[ky:ky + r, kx:kx + s, :].reshape(r * s, cin).astype(mm_dtype)
            acc = acc + jnp.dot(slab, wv[3 * ky + kx],
                                preferred_element_type=jnp.float32)
    return acc


def _upsample2x_align_corners(t, h_interp, w_interp):
    """Bilinear 2x upsample, align_corners=True.  t: (h, w, C) f32 -> (2h, 2w, C).

    Separable weighted adds with static trace-time weights (VPU/XLU only, no
    Kronecker matrix, no MXU).
    """
    # interpolate along rows (outer dim -- pure vreg-row selects + VPU adds)
    i0, i1, fr = h_interp
    rows = []
    for y in range(len(fr)):
        a, b, f = int(i0[y]), int(i1[y]), float(fr[y])
        rows.append(t[a] if f == 0.0 else (1.0 - f) * t[a] + f * t[b])
    t = jnp.stack(rows, axis=0)                       # (H, w, C)
    # interpolate along columns (static sublane slices + VPU adds + one concat)
    j0, j1, fc = w_interp
    cols = []
    for x in range(len(fc)):
        a, b, f = int(j0[x]), int(j1[x]), float(fc[x])
        if f == 0.0:
            cols.append(t[:, a:a + 1, :])
        else:
            cols.append((1.0 - f) * t[:, a:a + 1, :] + f * t[:, b:b + 1, :])
    return jnp.concatenate(cols, axis=1)              # (H, W, C)


# ------------------------------ fused kernel ---------------------------------

def _unet_block_kernel(xf_ref, x_ref, wa_ref, ba_ref, wbu_ref, wbs_ref, bb_ref,
                       o_ref, *, h_interp, w_interp, mm_dtype):
    # xf_ref : (1, H, w, 2C)   -- input with W pixel-pairs folded into lanes (pool view)
    # x_ref  : (1, H, W, C)    -- input, NHWC (skip path)
    # wa_ref : (9, C, Cmid)    ba_ref : (1, Cmid)
    # wbu_ref: (9, Cmid, C)    wbs_ref: (9, C, C)      bb_ref: (1, C)
    # o_ref  : (1, H*W, C)     -- output in matmul-row layout (wrapper reshapes to NHWC)
    _, H, W, C = x_ref.shape
    h, w = H // 2, W // 2
    Cmid = ba_ref.shape[1]

    # ---- Down('max'): MaxPool2d(2), all in VMEM (no strided access needed) ----
    xf = xf_ref[0]                                    # (H, w, 2C) f32
    xw = jnp.maximum(xf[:, :, :C], xf[:, :, C:])      # pool along W (lane halves)
    xw = xw.reshape(h, 2, w, C)                       # split outer dim (free)
    pooled = jnp.maximum(xw[:, 0], xw[:, 1])          # pool along H -> (h, w, C)

    # ---- horizontal_block_a: Conv3x3 (C -> Cmid) + ReLU (in-kernel im2col) ----
    acc_a = jnp.broadcast_to(ba_ref[...], (h * w, Cmid)).astype(jnp.float32)
    acc_a = _conv3x3_acc(pooled, wa_ref, acc_a, mm_dtype)
    ya = jnp.maximum(acc_a, 0.0)                      # bias already in acc; ReLU in f32
    ya = ya.reshape(h, w, Cmid)                       # spatial split for the upsample

    # ---- nested: nn.Identity() (n_block=1, deepest_inner='identity') ----

    # ---- Up: bilinear x2, align_corners=True (separable weighted adds) ----
    up = _upsample2x_align_corners(ya, h_interp, w_interp)   # (H, W, Cmid)

    # ---- FlexibleConcat2d + horizontal_block_b, without materializing the concat:
    #      conv(cat([up, skip])) == conv(up, wb[:,:,:Cmid]) + conv(skip, wb[:,:,Cmid:])
    acc_b = jnp.broadcast_to(bb_ref[...], (H * W, C)).astype(jnp.float32)
    acc_b = _conv3x3_acc(up, wbu_ref, acc_b, mm_dtype)        # upsampled branch
    acc_b = _conv3x3_acc(x_ref[0], wbs_ref, acc_b, mm_dtype)  # skip branch
    o_ref[0] = jnp.maximum(acc_b, 0.0).astype(o_ref.dtype)    # ReLU + store (no relayout)


# --------------------------------- wrapper -----------------------------------

def unet_block_forward(x, params, matmul_dtype=jnp.bfloat16):
    """UNetBlock.forward with default constructor args.

    x: (N, H, W, C) NHWC float32 (H, W even).  params: HWIO conv weights.
    matmul_dtype: MXU operand dtype (f32 accumulation); jnp.float32 gives exact
    f32 conv semantics, jnp.bfloat16 (default) for v6e/v7x MXU throughput.
    """
    N, H, W, C = x.shape
    assert H % 2 == 0 and W % 2 == 0, "even spatial dims expected (MaxPool2d(2))"
    h, w = H // 2, W // 2
    wa, ba = params["wa"], params["ba"]               # (3,3,C,Cmid), (Cmid,)
    wb, bb = params["wb"], params["bb"]               # (3,3,Cmid+C,C), (C,)
    Cmid = wa.shape[-1]

    # trace-time weight plumbing (tiny arrays, one-time cast to the MXU dtype)
    wa9 = wa.reshape(9, C, Cmid).astype(matmul_dtype)
    wbu9 = wb[:, :, :Cmid, :].reshape(9, Cmid, C).astype(matmul_dtype)   # upsampled branch
    wbs9 = wb[:, :, Cmid:, :].reshape(9, C, C).astype(matmul_dtype)      # skip branch
    ba2 = ba.reshape(1, Cmid).astype(jnp.float32)
    bb2 = bb.reshape(1, C).astype(jnp.float32)

    # traffic-free view: fold each W pixel pair into the lane dim for the pool
    x_fold = x.reshape(N, H, w, 2 * C)

    h_interp = _interp_weights(h, H)
    w_interp = _interp_weights(w, W)

    kernel = functools.partial(_unet_block_kernel, h_interp=h_interp,
                               w_interp=w_interp, mm_dtype=matmul_dtype)

    flops = N * 2 * (h * w * 9 * C * Cmid + H * W * 9 * (Cmid + C) * C)
    w_itemsize = jnp.dtype(matmul_dtype).itemsize
    bytes_accessed = (4 * (2 * x.size + ba2.size + bb2.size + N * H * W * C)
                      + w_itemsize * (wa9.size + wbu9.size + wbs9.size))

    out = pl.pallas_call(
        kernel,
        out_shape=jax.ShapeDtypeStruct((N, H * W, C), jnp.float32),
        grid=(N,),
        in_specs=[
            pl.BlockSpec((1, H, w, 2 * C), lambda n: (n, 0, 0, 0)),
            pl.BlockSpec((1, H, W, C), lambda n: (n, 0, 0, 0)),
            pl.BlockSpec((9, C, Cmid), lambda n: (0, 0, 0)),
            pl.BlockSpec((1, Cmid), lambda n: (0, 0)),
            pl.BlockSpec((9, Cmid, C), lambda n: (0, 0, 0)),
            pl.BlockSpec((9, C, C), lambda n: (0, 0, 0)),
            pl.BlockSpec((1, C), lambda n: (0, 0)),
        ],
        out_specs=pl.BlockSpec((1, H * W, C), lambda n: (n, 0, 0)),
        compiler_params=pltpu.CompilerParams(dimension_semantics=("parallel",)),
        cost_estimate=pl.CostEstimate(flops=int(flops), transcendentals=0,
                                      bytes_accessed=int(bytes_accessed)),
    )(x_fold, x, wa9, ba2, wbu9, wbs9, bb2)
    # free HBM-level view back to NHWC
    return out.reshape(N, H, W, C)


# ------------------------- pure NumPy reference check ------------------------

def _reference_forward(x, params):
    """NumPy NHWC reference of the realized UNetBlock forward (for validation)."""
    x = np.asarray(x, np.float64)
    wa = np.asarray(params["wa"], np.float64)
    ba = np.asarray(params["ba"], np.float64)
    wb = np.asarray(params["wb"], np.float64)
    bb = np.asarray(params["bb"], np.float64)

    def conv3x3_relu(t, wgt, b):
        n, hh, ww, ci = t.shape
        co = wgt.shape[-1]
        tp = np.pad(t, ((0, 0), (1, 1), (1, 1), (0, 0)))
        out = np.zeros((n, hh, ww, co))
        for ky in range(3):
            for kx in range(3):
                out += np.tensordot(tp[:, ky:ky + hh, kx:kx + ww, :],
                                    wgt[ky, kx], axes=([3], [0]))
        return np.maximum(out + b, 0.0)

    def maxpool(t):
        n, hh, ww, ci = t.shape
        return t.reshape(n, hh // 2, 2, ww // 2, 2, ci).max(axis=(2, 4))

    def upsample(t):
        n, hh, ww, ci = t.shape
        i0, i1, fr = _interp_weights(hh, 2 * hh)
        t = (1 - fr)[None, :, None, None] * t[:, i0] + fr[None, :, None, None] * t[:, i1]
        j0, j1, fc = _interp_weights(ww, 2 * ww)
        t = (1 - fc)[None, None, :, None] * t[:, :, j0] + fc[None, None, :, None] * t[:, :, j1]
        return t

    skip = x
    t = maxpool(x)
    t = conv3x3_relu(t, wa, ba)
    t = upsample(t)
    t = np.concatenate([t, skip], axis=-1)
    return conv3x3_relu(t, wb, bb)


if __name__ == "__main__":
    N, C, H, W = 2, 4, 16, 16
    key = jax.random.PRNGKey(0)
    kx, kwa, kba, kwb, kbb = jax.random.split(key, 5)

    x_nchw = jax.random.normal(kx, (N, C, H, W), jnp.float32)   # PyTorch-style input
    x = jnp.transpose(x_nchw, (0, 2, 3, 1))                     # NCHW -> NHWC boundary

    Cmid = 2 * C  # block_expansion_factor=2
    params = {
        "wa": 0.1 * jax.random.normal(kwa, (3, 3, C, Cmid), jnp.float32),
        "ba": 0.1 * jax.random.normal(kba, (Cmid,), jnp.float32),
        "wb": 0.1 * jax.random.normal(kwb, (3, 3, Cmid + C, C), jnp.float32),
        "bb": 0.1 * jax.random.normal(kbb, (C,), jnp.float32),
    }

    out = jax.jit(unet_block_forward)(x, params)
    out = jax.block_until_ready(out)
    assert out.shape == (N, H, W, C)
    assert bool(jnp.all(jnp.isfinite(out)))

    ref = _reference_forward(np.asarray(x), {k: np.asarray(v) for k, v in params.items()})
    np.testing.assert_allclose(np.asarray(out), ref, rtol=5e-2, atol=5e-2)
    print("KERNEL_OK")
</pallas_src>

<mosaic_0001>
module attributes {stable_mosaic.version = 11 : i64} {
  func.func @_unet_block_kernel(%arg0: i32, %arg1: memref<1x16x8x8xf32, #tpu.memory_space<vmem>>, %arg2: memref<1x16x16x4xf32, #tpu.memory_space<vmem>>, %arg3: memref<9x4x8xbf16, #tpu.memory_space<vmem>>, %arg4: memref<1x8xf32, #tpu.memory_space<vmem>>, %arg5: memref<9x8x4xbf16, #tpu.memory_space<vmem>>, %arg6: memref<9x4x4xbf16, #tpu.memory_space<vmem>>, %arg7: memref<1x4xf32, #tpu.memory_space<vmem>>, %arg8: memref<1x256x4xf32, #tpu.memory_space<vmem>>) attributes {dimension_semantics = [#tpu.dimension_semantics<parallel>], iteration_bounds = array<i64: 2>, scalar_prefetch = 0 : i64, scratch_operands = 0 : i64, tpu.core_type = #tpu.core_type<tc>, window_params = [{transform_indices = @transform_0, window_bounds = array<i64: 1, 16, 8, 8>}, {transform_indices = @transform_1, window_bounds = array<i64: 1, 16, 16, 4>}, {pipeline_mode = #tpu.pipeline_mode<synchronous>, transform_indices = @transform_2, window_bounds = array<i64: 9, 4, 8>}, {pipeline_mode = #tpu.pipeline_mode<synchronous>, transform_indices = @transform_3, window_bounds = array<i64: 1, 8>}, {pipeline_mode = #tpu.pipeline_mode<synchronous>, transform_indices = @transform_4, window_bounds = array<i64: 9, 8, 4>}, {pipeline_mode = #tpu.pipeline_mode<synchronous>, transform_indices = @transform_5, window_bounds = array<i64: 9, 4, 4>}, {pipeline_mode = #tpu.pipeline_mode<synchronous>, transform_indices = @transform_6, window_bounds = array<i64: 1, 4>}, {transform_indices = @transform_7, window_bounds = array<i64: 1, 256, 4>}]} {
    %c0 = arith.constant 0 : index
    %c0_0 = arith.constant 0 : index
    %c0_1 = arith.constant 0 : index
    %c0_2 = arith.constant 0 : index
    %0 = vector.load %arg1[%c0, %c0_0, %c0_1, %c0_2] : memref<1x16x8x8xf32, #tpu.memory_space<vmem>>, vector<1x16x8x8xf32>
    %1 = vector.shape_cast %0 : vector<1x16x8x8xf32> to vector<16x8x8xf32>
    %2 = vector.extract_strided_slice %1 {offsets = [0, 0, 0], sizes = [16, 8, 4], strides = [1, 1, 1]} : vector<16x8x8xf32> to vector<16x8x4xf32>
    %3 = vector.extract_strided_slice %1 {offsets = [0, 0, 4], sizes = [16, 8, 4], strides = [1, 1, 1]} : vector<16x8x8xf32> to vector<16x8x4xf32>
    %4 = arith.maximumf %2, %3 : vector<16x8x4xf32>
    %5 = vector.shape_cast %4 : vector<16x8x4xf32> to vector<8x2x8x4xf32>
    %6 = vector.extract_strided_slice %5 {offsets = [0, 0, 0, 0], sizes = [8, 1, 8, 4], strides = [1, 1, 1, 1]} : vector<8x2x8x4xf32> to vector<8x1x8x4xf32>
    %7 = vector.shape_cast %6 : vector<8x1x8x4xf32> to vector<8x8x4xf32>
    %8 = vector.extract_strided_slice %5 {offsets = [0, 1, 0, 0], sizes = [8, 1, 8, 4], strides = [1, 1, 1, 1]} : vector<8x2x8x4xf32> to vector<8x1x8x4xf32>
    %9 = vector.shape_cast %8 : vector<8x1x8x4xf32> to vector<8x8x4xf32>
    %10 = arith.maximumf %7, %9 : vector<8x8x4xf32>
    %c0_3 = arith.constant 0 : index
    %c0_4 = arith.constant 0 : index
    %11 = vector.load %arg4[%c0_3, %c0_4] : memref<1x8xf32, #tpu.memory_space<vmem>>, vector<1x8xf32>
    %12 = vector.shape_cast %11 : vector<1x8xf32> to vector<1x8xf32>
    %13 = vector.broadcast %12 : vector<1x8xf32> to vector<64x8xf32>
    %cst = arith.constant 0.000000e+00 : f32
    %14 = vector.broadcast %cst : f32 to vector<8x1x4xf32>
    %15 = tpu.concatenate %14, %10, %14 in 1 : vector<8x1x4xf32>, vector<8x8x4xf32>, vector<8x1x4xf32> -> vector<8x10x4xf32>
    %cst_5 = arith.constant 0.000000e+00 : f32
    %16 = vector.broadcast %cst_5 : f32 to vector<1x10x4xf32>
    %17 = tpu.concatenate %16, %15, %16 in 0 : vector<1x10x4xf32>, vector<8x10x4xf32>, vector<1x10x4xf32> -> vector<10x10x4xf32>
    %c0_6 = arith.constant 0 : index
    %c0_7 = arith.constant 0 : index
    %c0_8 = arith.constant 0 : index
    %18 = vector.load %arg3[%c0_6, %c0_7, %c0_8] : memref<9x4x8xbf16, #tpu.memory_space<vmem>>, vector<9x4x8xbf16>
    %19 = vector.extract_strided_slice %17 {offsets = [0, 0, 0], sizes = [8, 8, 4], strides = [1, 1, 1]} : vector<10x10x4xf32> to vector<8x8x4xf32>
    %20 = vector.shape_cast %19 : vector<8x8x4xf32> to vector<64x4xf32>
    %21 = arith.truncf %20 : vector<64x4xf32> to vector<64x4xbf16>
    %22 = vector.extract_strided_slice %18 {offsets = [0, 0, 0], sizes = [1, 4, 8], strides = [1, 1, 1]} : vector<9x4x8xbf16> to vector<1x4x8xbf16>
    %23 = vector.shape_cast %22 : vector<1x4x8xbf16> to vector<4x8xbf16>
    %cst_9 = arith.constant dense<0.000000e+00> : vector<64x8xf32>
    %24 = tpu.matmul %21, %23, %cst_9 {dimension_numbers = #tpu.dot_dimension_numbers<[1], [0], [0], [1], [0, 0, 1, 1], [], []>} : vector<64x4xbf16>, vector<4x8xbf16>, vector<64x8xf32> -> vector<64x8xf32>
    %25 = arith.addf %13, %24 : vector<64x8xf32>
    %26 = vector.extract_strided_slice %17 {offsets = [0, 1, 0], sizes = [8, 8, 4], strides = [1, 1, 1]} : vector<10x10x4xf32> to vector<8x8x4xf32>
    %27 = vector.shape_cast %26 : vector<8x8x4xf32> to vector<64x4xf32>
    %28 = arith.truncf %27 : vector<64x4xf32> to vector<64x4xbf16>
    %29 = vector.extract_strided_slice %18 {offsets = [1, 0, 0], sizes = [1, 4, 8], strides = [1, 1, 1]} : vector<9x4x8xbf16> to vector<1x4x8xbf16>
    %30 = vector.shape_cast %29 : vector<1x4x8xbf16> to vector<4x8xbf16>
    %cst_10 = arith.constant dense<0.000000e+00> : vector<64x8xf32>
    %31 = tpu.matmul %28, %30, %cst_10 {dimension_numbers = #tpu.dot_dimension_numbers<[1], [0], [0], [1], [0, 0, 1, 1], [], []>} : vector<64x4xbf16>, vector<4x8xbf16>, vector<64x8xf32> -> vector<64x8xf32>
    %32 = arith.addf %25, %31 : vector<64x8xf32>
    %33 = vector.extract_strided_slice %17 {offsets = [0, 2, 0], sizes = [8, 8, 4], strides = [1, 1, 1]} : vector<10x10x4xf32> to vector<8x8x4xf32>
    %34 = vector.shape_cast %33 : vector<8x8x4xf32> to vector<64x4xf32>
    %35 = arith.truncf %34 : vector<64x4xf32> to vector<64x4xbf16>
    %36 = vector.extract_strided_slice %18 {offsets = [2, 0, 0], sizes = [1, 4, 8], strides = [1, 1, 1]} : vector<9x4x8xbf16> to vector<1x4x8xbf16>
    %37 = vector.shape_cast %36 : vector<1x4x8xbf16> to vector<4x8xbf16>
    %cst_11 = arith.constant dense<0.000000e+00> : vector<64x8xf32>
    %38 = tpu.matmul %35, %37, %cst_11 {dimension_numbers = #tpu.dot_dimension_numbers<[1], [0], [0], [1], [0, 0, 1, 1], [], []>} : vector<64x4xbf16>, vector<4x8xbf16>, vector<64x8xf32> -> vector<64x8xf32>
    %39 = arith.addf %32, %38 : vector<64x8xf32>
    %40 = vector.extract_strided_slice %17 {offsets = [1, 0, 0], sizes = [8, 8, 4], strides = [1, 1, 1]} : vector<10x10x4xf32> to vector<8x8x4xf32>
    %41 = vector.shape_cast %40 : vector<8x8x4xf32> to vector<64x4xf32>
    %42 = arith.truncf %41 : vector<64x4xf32> to vector<64x4xbf16>
    %43 = vector.extract_strided_slice %18 {offsets = [3, 0, 0], sizes = [1, 4, 8], strides = [1, 1, 1]} : vector<9x4x8xbf16> to vector<1x4x8xbf16>
    %44 = vector.shape_cast %43 : vector<1x4x8xbf16> to vector<4x8xbf16>
    %cst_12 = arith.constant dense<0.000000e+00> : vector<64x8xf32>
    %45 = tpu.matmul %42, %44, %cst_12 {dimension_numbers = #tpu.dot_dimension_numbers<[1], [0], [0], [1], [0, 0, 1, 1], [], []>} : vector<64x4xbf16>, vector<4x8xbf16>, vector<64x8xf32> -> vector<64x8xf32>
    %46 = arith.addf %39, %45 : vector<64x8xf32>
    %47 = vector.extract_strided_slice %17 {offsets = [1, 1, 0], sizes = [8, 8, 4], strides = [1, 1, 1]} : vector<10x10x4xf32> to vector<8x8x4xf32>
    %48 = vector.shape_cast %47 : vector<8x8x4xf32> to vector<64x4xf32>
    %49 = arith.truncf %48 : vector<64x4xf32> to vector<64x4xbf16>
    %50 = vector.extract_strided_slice %18 {offsets = [4, 0, 0], sizes = [1, 4, 8], strides = [1, 1, 1]} : vector<9x4x8xbf16> to vector<1x4x8xbf16>
    %51 = vector.shape_cast %50 : vector<1x4x8xbf16> to vector<4x8xbf16>
    %cst_13 = arith.constant dense<0.000000e+00> : vector<64x8xf32>
    %52 = tpu.matmul %49, %51, %cst_13 {dimension_numbers = #tpu.dot_dimension_numbers<[1], [0], [0], [1], [0, 0, 1, 1], [], []>} : vector<64x4xbf16>, vector<4x8xbf16>, vector<64x8xf32> -> vector<64x8xf32>
    %53 = arith.addf %46, %52 : vector<64x8xf32>
    %54 = vector.extract_strided_slice %17 {offsets = [1, 2, 0], sizes = [8, 8, 4], strides = [1, 1, 1]} : vector<10x10x4xf32> to vector<8x8x4xf32>
    %55 = vector.shape_cast %54 : vector<8x8x4xf32> to vector<64x4xf32>
    %56 = arith.truncf %55 : vector<64x4xf32> to vector<64x4xbf16>
    %57 = vector.extract_strided_slice %18 {offsets = [5, 0, 0], sizes = [1, 4, 8], strides = [1, 1, 1]} : vector<9x4x8xbf16> to vector<1x4x8xbf16>
    %58 = vector.shape_cast %57 : vector<1x4x8xbf16> to vector<4x8xbf16>
    %cst_14 = arith.constant dense<0.000000e+00> : vector<64x8xf32>
    %59 = tpu.matmul %56, %58, %cst_14 {dimension_numbers = #tpu.dot_dimension_numbers<[1], [0], [0], [1], [0, 0, 1, 1], [], []>} : vector<64x4xbf16>, vector<4x8xbf16>, vector<64x8xf32> -> vector<64x8xf32>
    %60 = arith.addf %53, %59 : vector<64x8xf32>
    %61 = vector.extract_strided_slice %17 {offsets = [2, 0, 0], sizes = [8, 8, 4], strides = [1, 1, 1]} : vector<10x10x4xf32> to vector<8x8x4xf32>
    %62 = vector.shape_cast %61 : vector<8x8x4xf32> to vector<64x4xf32>
    %63 = arith.truncf %62 : vector<64x4xf32> to vector<64x4xbf16>
    %64 = vector.extract_strided_slice %18 {offsets = [6, 0, 0], sizes = [1, 4, 8], strides = [1, 1, 1]} : vector<9x4x8xbf16> to vector<1x4x8xbf16>
    %65 = vector.shape_cast %64 : vector<1x4x8xbf16> to vector<4x8xbf16>
    %cst_15 = arith.constant dense<0.000000e+00> : vector<64x8xf32>
    %66 = tpu.matmul %63, %65, %cst_15 {dimension_numbers = #tpu.dot_dimension_numbers<[1], [0], [0], [1], [0, 0, 1, 1], [], []>} : vector<64x4xbf16>, vector<4x8xbf16>, vector<64x8xf32> -> vector<64x8xf32>
    %67 = arith.addf %60, %66 : vector<64x8xf32>
    %68 = vector.extract_strided_slice %17 {offsets = [2, 1, 0], sizes = [8, 8, 4], strides = [1, 1, 1]} : vector<10x10x4xf32> to vector<8x8x4xf32>
    %69 = vector.shape_cast %68 : vector<8x8x4xf32> to vector<64x4xf32>
    %70 = arith.truncf %69 : vector<64x4xf32> to vector<64x4xbf16>
    %71 = vector.extract_strided_slice %18 {offsets = [7, 0, 0], sizes = [1, 4, 8], strides = [1, 1, 1]} : vector<9x4x8xbf16> to vector<1x4x8xbf16>
    %72 = vector.shape_cast %71 : vector<1x4x8xbf16> to vector<4x8xbf16>
    %cst_16 = arith.constant dense<0.000000e+00> : vector<64x8xf32>
    %73 = tpu.matmul %70, %72, %cst_16 {dimension_numbers = #tpu.dot_dimension_numbers<[1], [0], [0], [1], [0, 0, 1, 1], [], []>} : vector<64x4xbf16>, vector<4x8xbf16>, vector<64x8xf32> -> vector<64x8xf32>
    %74 = arith.addf %67, %73 : vector<64x8xf32>
    %75 = vector.extract_strided_slice %17 {offsets = [2, 2, 0], sizes = [8, 8, 4], strides = [1, 1, 1]} : vector<10x10x4xf32> to vector<8x8x4xf32>
    %76 = vector.shape_cast %75 : vector<8x8x4xf32> to vector<64x4xf32>
    %77 = arith.truncf %76 : vector<64x4xf32> to vector<64x4xbf16>
    %78 = vector.extract_strided_slice %18 {offsets = [8, 0, 0], sizes = [1, 4, 8], strides = [1, 1, 1]} : vector<9x4x8xbf16> to vector<1x4x8xbf16>
    %79 = vector.shape_cast %78 : vector<1x4x8xbf16> to vector<4x8xbf16>
    %cst_17 = arith.constant dense<0.000000e+00> : vector<64x8xf32>
    %80 = tpu.matmul %77, %79, %cst_17 {dimension_numbers = #tpu.dot_dimension_numbers<[1], [0], [0], [1], [0, 0, 1, 1], [], []>} : vector<64x4xbf16>, vector<4x8xbf16>, vector<64x8xf32> -> vector<64x8xf32>
    %81 = arith.addf %74, %80 : vector<64x8xf32>
    %cst_18 = arith.constant 0.000000e+00 : f32
    %82 = vector.broadcast %cst_18 : f32 to vector<64x8xf32>
    %83 = arith.maximumf %81, %82 : vector<64x8xf32>
    %84 = vector.shape_cast %83 : vector<64x8xf32> to vector<8x8x8xf32>
    %85 = vector.extract_strided_slice %84 {offsets = [0, 0, 0], sizes = [1, 8, 8], strides = [1, 1, 1]} : vector<8x8x8xf32> to vector<1x8x8xf32>
    %86 = vector.shape_cast %85 : vector<1x8x8xf32> to vector<8x8xf32>
    %87 = vector.extract_strided_slice %84 {offsets = [0, 0, 0], sizes = [1, 8, 8], strides = [1, 1, 1]} : vector<8x8x8xf32> to vector<1x8x8xf32>
    %88 = vector.shape_cast %87 : vector<1x8x8xf32> to vector<8x8xf32>
    %cst_19 = arith.constant 0.533333302 : f32
    %89 = vector.broadcast %cst_19 : f32 to vector<8x8xf32>
    %90 = arith.mulf %89, %88 : vector<8x8xf32>
    %91 = vector.extract_strided_slice %84 {offsets = [1, 0, 0], sizes = [1, 8, 8], strides = [1, 1, 1]} : vector<8x8x8xf32> to vector<1x8x8xf32>
    %92 = vector.shape_cast %91 : vector<1x8x8xf32> to vector<8x8xf32>
    %cst_20 = arith.constant 0.466666669 : f32
    %93 = vector.broadcast %cst_20 : f32 to vector<8x8xf32>
    %94 = arith.mulf %93, %92 : vector<8x8xf32>
    %95 = arith.addf %90, %94 : vector<8x8xf32>
    %96 = vector.extract_strided_slice %84 {offsets = [0, 0, 0], sizes = [1, 8, 8], strides = [1, 1, 1]} : vector<8x8x8xf32> to vector<1x8x8xf32>
    %97 = vector.shape_cast %96 : vector<1x8x8xf32> to vector<8x8xf32>
    %cst_21 = arith.constant 0.0666666627 : f32
    %98 = vector.broadcast %cst_21 : f32 to vector<8x8xf32>
    %99 = arith.mulf %98, %97 : vector<8x8xf32>
    %100 = vector.extract_strided_slice %84 {offsets = [1, 0, 0], sizes = [1, 8, 8], strides = [1, 1, 1]} : vector<8x8x8xf32> to vector<1x8x8xf32>
    %101 = vector.shape_cast %100 : vector<1x8x8xf32> to vector<8x8xf32>
    %cst_22 = arith.constant 0.933333337 : f32
    %102 = vector.broadcast %cst_22 : f32 to vector<8x8xf32>
    %103 = arith.mulf %102, %101 : vector<8x8xf32>
    %104 = arith.addf %99, %103 : vector<8x8xf32>
    %105 = vector.extract_strided_slice %84 {offsets = [1, 0, 0], sizes = [1, 8, 8], strides = [1, 1, 1]} : vector<8x8x8xf32> to vector<1x8x8xf32>
    %106 = vector.shape_cast %105 : vector<1x8x8xf32> to vector<8x8xf32>
    %cst_23 = arith.constant 6.000000e-01 : f32
    %107 = vector.broadcast %cst_23 : f32 to vector<8x8xf32>
    %108 = arith.mulf %107, %106 : vector<8x8xf32>
    %109 = vector.extract_strided_slice %84 {offsets = [2, 0, 0], sizes = [1, 8, 8], strides = [1, 1, 1]} : vector<8x8x8xf32> to vector<1x8x8xf32>
    %110 = vector.shape_cast %109 : vector<1x8x8xf32> to vector<8x8xf32>
    %cst_24 = arith.constant 4.000000e-01 : f32
    %111 = vector.broadcast %cst_24 : f32 to vector<8x8xf32>
    %112 = arith.mulf %111, %110 : vector<8x8xf32>
    %113 = arith.addf %108, %112 : vector<8x8xf32>
    %114 = vector.extract_strided_slice %84 {offsets = [1, 0, 0], sizes = [1, 8, 8], strides = [1, 1, 1]} : vector<8x8x8xf32> to vector<1x8x8xf32>
    %115 = vector.shape_cast %114 : vector<1x8x8xf32> to vector<8x8xf32>
    %cst_25 = arith.constant 0.133333325 : f32
    %116 = vector.broadcast %cst_25 : f32 to vector<8x8xf32>
    %117 = arith.mulf %116, %115 : vector<8x8xf32>
    %118 = vector.extract_strided_slice %84 {offsets = [2, 0, 0], sizes = [1, 8, 8], strides = [1, 1, 1]} : vector<8x8x8xf32> to vector<1x8x8xf32>
    %119 = vector.shape_cast %118 : vector<1x8x8xf32> to vector<8x8xf32>
    %cst_26 = arith.constant 0.866666674 : f32
    %120 = vector.broadcast %cst_26 : f32 to vector<8x8xf32>
    %121 = arith.mulf %120, %119 : vector<8x8xf32>
    %122 = arith.addf %117, %121 : vector<8x8xf32>
    %123 = vector.extract_strided_slice %84 {offsets = [2, 0, 0], sizes = [1, 8, 8], strides = [1, 1, 1]} : vector<8x8x8xf32> to vector<1x8x8xf32>
    %124 = vector.shape_cast %123 : vector<1x8x8xf32> to vector<8x8xf32>
    %cst_27 = arith.constant 0.666666627 : f32
    %125 = vector.broadcast %cst_27 : f32 to vector<8x8xf32>
    %126 = arith.mulf %125, %124 : vector<8x8xf32>
    %127 = vector.extract_strided_slice %84 {offsets = [3, 0, 0], sizes = [1, 8, 8], strides = [1, 1, 1]} : vector<8x8x8xf32> to vector<1x8x8xf32>
    %128 = vector.shape_cast %127 : vector<1x8x8xf32> to vector<8x8xf32>
    %cst_28 = arith.constant 0.333333343 : f32
    %129 = vector.broadcast %cst_28 : f32 to vector<8x8xf32>
    %130 = arith.mulf %129, %128 : vector<8x8xf32>
    %131 = arith.addf %126, %130 : vector<8x8xf32>
    %132 = vector.extract_strided_slice %84 {offsets = [2, 0, 0], sizes = [1, 8, 8], strides = [1, 1, 1]} : vector<8x8x8xf32> to vector<1x8x8xf32>
    %133 = vector.shape_cast %132 : vector<1x8x8xf32> to vector<8x8xf32>
    %cst_29 = arith.constant 0.199999988 : f32
    %134 = vector.broadcast %cst_29 : f32 to vector<8x8xf32>
    %135 = arith.mulf %134, %133 : vector<8x8xf32>
    %136 = vector.extract_strided_slice %84 {offsets = [3, 0, 0], sizes = [1, 8, 8], strides = [1, 1, 1]} : vector<8x8x8xf32> to vector<1x8x8xf32>
    %137 = vector.shape_cast %136 : vector<1x8x8xf32> to vector<8x8xf32>
    %cst_30 = arith.constant 8.000000e-01 : f32
    %138 = vector.broadcast %cst_30 : f32 to vector<8x8xf32>
    %139 = arith.mulf %138, %137 : vector<8x8xf32>
    %140 = arith.addf %135, %139 : vector<8x8xf32>
    %141 = vector.extract_strided_slice %84 {offsets = [3, 0, 0], sizes = [1, 8, 8], strides = [1, 1, 1]} : vector<8x8x8xf32> to vector<1x8x8xf32>
    %142 = vector.shape_cast %141 : vector<1x8x8xf32> to vector<8x8xf32>
    %cst_31 = arith.constant 0.733333349 : f32
    %143 = vector.broadcast %cst_31 : f32 to vector<8x8xf32>
    %144 = arith.mulf %143, %142 : vector<8x8xf32>
    %145 = vector.extract_strided_slice %84 {offsets = [4, 0, 0], sizes = [1, 8, 8], strides = [1, 1, 1]} : vector<8x8x8xf32> to vector<1x8x8xf32>
    %146 = vector.shape_cast %145 : vector<1x8x8xf32> to vector<8x8xf32>
    %cst_32 = arith.constant 0.266666681 : f32
    %147 = vector.broadcast %cst_32 : f32 to vector<8x8xf32>
    %148 = arith.mulf %147, %146 : vector<8x8xf32>
    %149 = arith.addf %144, %148 : vector<8x8xf32>
    %150 = vector.extract_strided_slice %84 {offsets = [3, 0, 0], sizes = [1, 8, 8], strides = [1, 1, 1]} : vector<8x8x8xf32> to vector<1x8x8xf32>
    %151 = vector.shape_cast %150 : vector<1x8x8xf32> to vector<8x8xf32>
    %cst_33 = arith.constant 0.266666651 : f32
    %152 = vector.broadcast %cst_33 : f32 to vector<8x8xf32>
    %153 = arith.mulf %152, %151 : vector<8x8xf32>
    %154 = vector.extract_strided_slice %84 {offsets = [4, 0, 0], sizes = [1, 8, 8], strides = [1, 1, 1]} : vector<8x8x8xf32> to vector<1x8x8xf32>
    %155 = vector.shape_cast %154 : vector<1x8x8xf32> to vector<8x8xf32>
    %cst_34 = arith.constant 0.733333349 : f32
    %156 = vector.broadcast %cst_34 : f32 to vector<8x8xf32>
    %157 = arith.mulf %156, %155 : vector<8x8xf32>
    %158 = arith.addf %153, %157 : vector<8x8xf32>
    %159 = vector.extract_strided_slice %84 {offsets = [4, 0, 0], sizes = [1, 8, 8], strides = [1, 1, 1]} : vector<8x8x8xf32> to vector<1x8x8xf32>
    %160 = vector.shape_cast %159 : vector<1x8x8xf32> to vector<8x8xf32>
    %cst_35 = arith.constant 8.000000e-01 : f32
    %161 = vector.broadcast %cst_35 : f32 to vector<8x8xf32>
    %162 = arith.mulf %161, %160 : vector<8x8xf32>
    %163 = vector.extract_strided_slice %84 {offsets = [5, 0, 0], sizes = [1, 8, 8], strides = [1, 1, 1]} : vector<8x8x8xf32> to vector<1x8x8xf32>
    %164 = vector.shape_cast %163 : vector<1x8x8xf32> to vector<8x8xf32>
    %cst_36 = arith.constant 2.000000e-01 : f32
    %165 = vector.broadcast %cst_36 : f32 to vector<8x8xf32>
    %166 = arith.mulf %165, %164 : vector<8x8xf32>
    %167 = arith.addf %162, %166 : vector<8x8xf32>
    %168 = vector.extract_strided_slice %84 {offsets = [4, 0, 0], sizes = [1, 8, 8], strides = [1, 1, 1]} : vector<8x8x8xf32> to vector<1x8x8xf32>
    %169 = vector.shape_cast %168 : vector<1x8x8xf32> to vector<8x8xf32>
    %cst_37 = arith.constant 0.333333313 : f32
    %170 = vector.broadcast %cst_37 : f32 to vector<8x8xf32>
    %171 = arith.mulf %170, %169 : vector<8x8xf32>
    %172 = vector.extract_strided_slice %84 {offsets = [5, 0, 0], sizes = [1, 8, 8], strides = [1, 1, 1]} : vector<8x8x8xf32> to vector<1x8x8xf32>
    %173 = vector.shape_cast %172 : vector<1x8x8xf32> to vector<8x8xf32>
    %cst_38 = arith.constant 0.666666686 : f32
    %174 = vector.broadcast %cst_38 : f32 to vector<8x8xf32>
    %175 = arith.mulf %174, %173 : vector<8x8xf32>
    %176 = arith.addf %171, %175 : vector<8x8xf32>
    %177 = vector.extract_strided_slice %84 {offsets = [5, 0, 0], sizes = [1, 8, 8], strides = [1, 1, 1]} : vector<8x8x8xf32> to vector<1x8x8xf32>
    %178 = vector.shape_cast %177 : vector<1x8x8xf32> to vector<8x8xf32>
    %cst_39 = arith.constant 0.866666674 : f32
    %179 = vector.broadcast %cst_39 : f32 to vector<8x8xf32>
    %180 = arith.mulf %179, %178 : vector<8x8xf32>
    %181 = vector.extract_strided_slice %84 {offsets = [6, 0, 0], sizes = [1, 8, 8], strides = [1, 1, 1]} : vector<8x8x8xf32> to vector<1x8x8xf32>
    %182 = vector.shape_cast %181 : vector<1x8x8xf32> to vector<8x8xf32>
    %cst_40 = arith.constant 0.13333334 : f32
    %183 = vector.broadcast %cst_40 : f32 to vector<8x8xf32>
    %184 = arith.mulf %183, %182 : vector<8x8xf32>
    %185 = arith.addf %180, %184 : vector<8x8xf32>
    %186 = vector.extract_strided_slice %84 {offsets = [5, 0, 0], sizes = [1, 8, 8], strides = [1, 1, 1]} : vector<8x8x8xf32> to vector<1x8x8xf32>
    %187 = vector.shape_cast %186 : vector<1x8x8xf32> to vector<8x8xf32>
    %cst_41 = arith.constant 0.399999976 : f32
    %188 = vector.broadcast %cst_41 : f32 to vector<8x8xf32>
    %189 = arith.mulf %188, %187 : vector<8x8xf32>
    %190 = vector.extract_strided_slice %84 {offsets = [6, 0, 0], sizes = [1, 8, 8], strides = [1, 1, 1]} : vector<8x8x8xf32> to vector<1x8x8xf32>
    %191 = vector.shape_cast %190 : vector<1x8x8xf32> to vector<8x8xf32>
    %cst_42 = arith.constant 6.000000e-01 : f32
    %192 = vector.broadcast %cst_42 : f32 to vector<8x8xf32>
    %193 = arith.mulf %192, %191 : vector<8x8xf32>
    %194 = arith.addf %189, %193 : vector<8x8xf32>
    %195 = vector.extract_strided_slice %84 {offsets = [6, 0, 0], sizes = [1, 8, 8], strides = [1, 1, 1]} : vector<8x8x8xf32> to vector<1x8x8xf32>
    %196 = vector.shape_cast %195 : vector<1x8x8xf32> to vector<8x8xf32>
    %cst_43 = arith.constant 0.933333337 : f32
    %197 = vector.broadcast %cst_43 : f32 to vector<8x8xf32>
    %198 = arith.mulf %197, %196 : vector<8x8xf32>
    %199 = vector.extract_strided_slice %84 {offsets = [7, 0, 0], sizes = [1, 8, 8], strides = [1, 1, 1]} : vector<8x8x8xf32> to vector<1x8x8xf32>
    %200 = vector.shape_cast %199 : vector<1x8x8xf32> to vector<8x8xf32>
    %cst_44 = arith.constant 0.0666666701 : f32
    %201 = vector.broadcast %cst_44 : f32 to vector<8x8xf32>
    %202 = arith.mulf %201, %200 : vector<8x8xf32>
    %203 = arith.addf %198, %202 : vector<8x8xf32>
    %204 = vector.extract_strided_slice %84 {offsets = [6, 0, 0], sizes = [1, 8, 8], strides = [1, 1, 1]} : vector<8x8x8xf32> to vector<1x8x8xf32>
    %205 = vector.shape_cast %204 : vector<1x8x8xf32> to vector<8x8xf32>
    %cst_45 = arith.constant 0.466666639 : f32
    %206 = vector.broadcast %cst_45 : f32 to vector<8x8xf32>
    %207 = arith.mulf %206, %205 : vector<8x8xf32>
    %208 = vector.extract_strided_slice %84 {offsets = [7, 0, 0], sizes = [1, 8, 8], strides = [1, 1, 1]} : vector<8x8x8xf32> to vector<1x8x8xf32>
    %209 = vector.shape_cast %208 : vector<1x8x8xf32> to vector<8x8xf32>
    %cst_46 = arith.constant 0.533333361 : f32
    %210 = vector.broadcast %cst_46 : f32 to vector<8x8xf32>
    %211 = arith.mulf %210, %209 : vector<8x8xf32>
    %212 = arith.addf %207, %211 : vector<8x8xf32>
    %213 = vector.extract_strided_slice %84 {offsets = [7, 0, 0], sizes = [1, 8, 8], strides = [1, 1, 1]} : vector<8x8x8xf32> to vector<1x8x8xf32>
    %214 = vector.shape_cast %213 : vector<1x8x8xf32> to vector<8x8xf32>
    %215 = vector.shape_cast %86 : vector<8x8xf32> to vector<1x8x8xf32>
    %216 = vector.shape_cast %95 : vector<8x8xf32> to vector<1x8x8xf32>
    %217 = vector.shape_cast %104 : vector<8x8xf32> to vector<1x8x8xf32>
    %218 = vector.shape_cast %113 : vector<8x8xf32> to vector<1x8x8xf32>
    %219 = vector.shape_cast %122 : vector<8x8xf32> to vector<1x8x8xf32>
    %220 = vector.shape_cast %131 : vector<8x8xf32> to vector<1x8x8xf32>
    %221 = vector.shape_cast %140 : vector<8x8xf32> to vector<1x8x8xf32>
    %222 = vector.shape_cast %149 : vector<8x8xf32> to vector<1x8x8xf32>
    %223 = vector.shape_cast %158 : vector<8x8xf32> to vector<1x8x8xf32>
    %224 = vector.shape_cast %167 : vector<8x8xf32> to vector<1x8x8xf32>
    %225 = vector.shape_cast %176 : vector<8x8xf32> to vector<1x8x8xf32>
    %226 = vector.shape_cast %185 : vector<8x8xf32> to vector<1x8x8xf32>
    %227 = vector.shape_cast %194 : vector<8x8xf32> to vector<1x8x8xf32>
    %228 = vector.shape_cast %203 : vector<8x8xf32> to vector<1x8x8xf32>
    %229 = vector.shape_cast %212 : vector<8x8xf32> to vector<1x8x8xf32>
    %230 = vector.shape_cast %214 : vector<8x8xf32> to vector<1x8x8xf32>
    %231 = tpu.concatenate %215, %216, %217, %218, %219, %220, %221, %222, %223, %224, %225, %226, %227, %228, %229, %230 in 0 : vector<1x8x8xf32>, vector<1x8x8xf32>, vector<1x8x8xf32>, vector<1x8x8xf32>, vector<1x8x8xf32>, vector<1x8x8xf32>, vector<1x8x8xf32>, vector<1x8x8xf32>, vector<1x8x8xf32>, vector<1x8x8xf32>, vector<1x8x8xf32>, vector<1x8x8xf32>, vector<1x8x8xf32>, vector<1x8x8xf32>, vector<1x8x8xf32>, vector<1x8x8xf32> -> vector<16x8x8xf32>
    %232 = vector.extract_strided_slice %231 {offsets = [0, 0, 0], sizes = [16, 1, 8], strides = [1, 1, 1]} : vector<16x8x8xf32> to vector<16x1x8xf32>
    %233 = vector.extract_strided_slice %231 {offsets = [0, 0, 0], sizes = [16, 1, 8], strides = [1, 1, 1]} : vector<16x8x8xf32> to vector<16x1x8xf32>
    %cst_47 = arith.constant 0.533333302 : f32
    %234 = vector.broadcast %cst_47 : f32 to vector<16x1x8xf32>
    %235 = arith.mulf %234, %233 : vector<16x1x8xf32>
    %236 = vector.extract_strided_slice %231 {offsets = [0, 1, 0], sizes = [16, 1, 8], strides = [1, 1, 1]} : vector<16x8x8xf32> to vector<16x1x8xf32>
    %cst_48 = arith.constant 0.466666669 : f32
    %237 = vector.broadcast %cst_48 : f32 to vector<16x1x8xf32>
    %238 = arith.mulf %237, %236 : vector<16x1x8xf32>
    %239 = arith.addf %235, %238 : vector<16x1x8xf32>
    %240 = vector.extract_strided_slice %231 {offsets = [0, 0, 0], sizes = [16, 1, 8], strides = [1, 1, 1]} : vector<16x8x8xf32> to vector<16x1x8xf32>
    %cst_49 = arith.constant 0.0666666627 : f32
    %241 = vector.broadcast %cst_49 : f32 to vector<16x1x8xf32>
    %242 = arith.mulf %241, %240 : vector<16x1x8xf32>
    %243 = vector.extract_strided_slice %231 {offsets = [0, 1, 0], sizes = [16, 1, 8], strides = [1, 1, 1]} : vector<16x8x8xf32> to vector<16x1x8xf32>
    %cst_50 = arith.constant 0.933333337 : f32
    %244 = vector.broadcast %cst_50 : f32 to vector<16x1x8xf32>
    %245 = arith.mulf %244, %243 : vector<16x1x8xf32>
    %246 = arith.addf %242, %245 : vector<16x1x8xf32>
    %247 = vector.extract_strided_slice %231 {offsets = [0, 1, 0], sizes = [16, 1, 8], strides = [1, 1, 1]} : vector<16x8x8xf32> to vector<16x1x8xf32>
    %cst_51 = arith.constant 6.000000e-01 : f32
    %248 = vector.broadcast %cst_51 : f32 to vector<16x1x8xf32>
    %249 = arith.mulf %248, %247 : vector<16x1x8xf32>
    %250 = vector.extract_strided_slice %231 {offsets = [0, 2, 0], sizes = [16, 1, 8], strides = [1, 1, 1]} : vector<16x8x8xf32> to vector<16x1x8xf32>
    %cst_52 = arith.constant 4.000000e-01 : f32
    %251 = vector.broadcast %cst_52 : f32 to vector<16x1x8xf32>
    %252 = arith.mulf %251, %250 : vector<16x1x8xf32>
    %253 = arith.addf %249, %252 : vector<16x1x8xf32>
    %254 = vector.extract_strided_slice %231 {offsets = [0, 1, 0], sizes = [16, 1, 8], strides = [1, 1, 1]} : vector<16x8x8xf32> to vector<16x1x8xf32>
    %cst_53 = arith.constant 0.133333325 : f32
    %255 = vector.broadcast %cst_53 : f32 to vector<16x1x8xf32>
    %256 = arith.mulf %255, %254 : vector<16x1x8xf32>
    %257 = vector.extract_strided_slice %231 {offsets = [0, 2, 0], sizes = [16, 1, 8], strides = [1, 1, 1]} : vector<16x8x8xf32> to vector<16x1x8xf32>
    %cst_54 = arith.constant 0.866666674 : f32
    %258 = vector.broadcast %cst_54 : f32 to vector<16x1x8xf32>
    %259 = arith.mulf %258, %257 : vector<16x1x8xf32>
    %260 = arith.addf %256, %259 : vector<16x1x8xf32>
    %261 = vector.extract_strided_slice %231 {offsets = [0, 2, 0], sizes = [16, 1, 8], strides = [1, 1, 1]} : vector<16x8x8xf32> to vector<16x1x8xf32>
    %cst_55 = arith.constant 0.666666627 : f32
    %262 = vector.broadcast %cst_55 : f32 to vector<16x1x8xf32>
    %263 = arith.mulf %262, %261 : vector<16x1x8xf32>
    %264 = vector.extract_strided_slice %231 {offsets = [0, 3, 0], sizes = [16, 1, 8], strides = [1, 1, 1]} : vector<16x8x8xf32> to vector<16x1x8xf32>
    %cst_56 = arith.constant 0.333333343 : f32
    %265 = vector.broadcast %cst_56 : f32 to vector<16x1x8xf32>
    %266 = arith.mulf %265, %264 : vector<16x1x8xf32>
    %267 = arith.addf %263, %266 : vector<16x1x8xf32>
    %268 = vector.extract_strided_slice %231 {offsets = [0, 2, 0], sizes = [16, 1, 8], strides = [1, 1, 1]} : vector<16x8x8xf32> to vector<16x1x8xf32>
    %cst_57 = arith.constant 0.199999988 : f32
    %269 = vector.broadcast %cst_57 : f32 to vector<16x1x8xf32>
    %270 = arith.mulf %269, %268 : vector<16x1x8xf32>
    %271 = vector.extract_strided_slice %231 {offsets = [0, 3, 0], sizes = [16, 1, 8], strides = [1, 1, 1]} : vector<16x8x8xf32> to vector<16x1x8xf32>
    %cst_58 = arith.constant 8.000000e-01 : f32
    %272 = vector.broadcast %cst_58 : f32 to vector<16x1x8xf32>
    %273 = arith.mulf %272, %271 : vector<16x1x8xf32>
    %274 = arith.addf %270, %273 : vector<16x1x8xf32>
    %275 = vector.extract_strided_slice %231 {offsets = [0, 3, 0], sizes = [16, 1, 8], strides = [1, 1, 1]} : vector<16x8x8xf32> to vector<16x1x8xf32>
    %cst_59 = arith.constant 0.733333349 : f32
    %276 = vector.broadcast %cst_59 : f32 to vector<16x1x8xf32>
    %277 = arith.mulf %276, %275 : vector<16x1x8xf32>
    %278 = vector.extract_strided_slice %231 {offsets = [0, 4, 0], sizes = [16, 1, 8], strides = [1, 1, 1]} : vector<16x8x8xf32> to vector<16x1x8xf32>
    %cst_60 = arith.constant 0.266666681 : f32
    %279 = vector.broadcast %cst_60 : f32 to vector<16x1x8xf32>
    %280 = arith.mulf %279, %278 : vector<16x1x8xf32>
    %281 = arith.addf %277, %280 : vector<16x1x8xf32>
    %282 = vector.extract_strided_slice %231 {offsets = [0, 3, 0], sizes = [16, 1, 8], strides = [1, 1, 1]} : vector<16x8x8xf32> to vector<16x1x8xf32>
    %cst_61 = arith.constant 0.266666651 : f32
    %283 = vector.broadcast %cst_61 : f32 to vector<16x1x8xf32>
    %284 = arith.mulf %283, %282 : vector<16x1x8xf32>
    %285 = vector.extract_strided_slice %231 {offsets = [0, 4, 0], sizes = [16, 1, 8], strides = [1, 1, 1]} : vector<16x8x8xf32> to vector<16x1x8xf32>
    %cst_62 = arith.constant 0.733333349 : f32
    %286 = vector.broadcast %cst_62 : f32 to vector<16x1x8xf32>
    %287 = arith.mulf %286, %285 : vector<16x1x8xf32>
    %288 = arith.addf %284, %287 : vector<16x1x8xf32>
    %289 = vector.extract_strided_slice %231 {offsets = [0, 4, 0], sizes = [16, 1, 8], strides = [1, 1, 1]} : vector<16x8x8xf32> to vector<16x1x8xf32>
    %cst_63 = arith.constant 8.000000e-01 : f32
    %290 = vector.broadcast %cst_63 : f32 to vector<16x1x8xf32>
    %291 = arith.mulf %290, %289 : vector<16x1x8xf32>
    %292 = vector.extract_strided_slice %231 {offsets = [0, 5, 0], sizes = [16, 1, 8], strides = [1, 1, 1]} : vector<16x8x8xf32> to vector<16x1x8xf32>
    %cst_64 = arith.constant 2.000000e-01 : f32
    %293 = vector.broadcast %cst_64 : f32 to vector<16x1x8xf32>
    %294 = arith.mulf %293, %292 : vector<16x1x8xf32>
    %295 = arith.addf %291, %294 : vector<16x1x8xf32>
    %296 = vector.extract_strided_slice %231 {offsets = [0, 4, 0], sizes = [16, 1, 8], strides = [1, 1, 1]} : vector<16x8x8xf32> to vector<16x1x8xf32>
    %cst_65 = arith.constant 0.333333313 : f32
    %297 = vector.broadcast %cst_65 : f32 to vector<16x1x8xf32>
    %298 = arith.mulf %297, %296 : vector<16x1x8xf32>
    %299 = vector.extract_strided_slice %231 {offsets = [0, 5, 0], sizes = [16, 1, 8], strides = [1, 1, 1]} : vector<16x8x8xf32> to vector<16x1x8xf32>
    %cst_66 = arith.constant 0.666666686 : f32
    %300 = vector.broadcast %cst_66 : f32 to vector<16x1x8xf32>
    %301 = arith.mulf %300, %299 : vector<16x1x8xf32>
    %302 = arith.addf %298, %301 : vector<16x1x8xf32>
    %303 = vector.extract_strided_slice %231 {offsets = [0, 5, 0], sizes = [16, 1, 8], strides = [1, 1, 1]} : vector<16x8x8xf32> to vector<16x1x8xf32>
    %cst_67 = arith.constant 0.866666674 : f32
    %304 = vector.broadcast %cst_67 : f32 to vector<16x1x8xf32>
    %305 = arith.mulf %304, %303 : vector<16x1x8xf32>
    %306 = vector.extract_strided_slice %231 {offsets = [0, 6, 0], sizes = [16, 1, 8], strides = [1, 1, 1]} : vector<16x8x8xf32> to vector<16x1x8xf32>
    %cst_68 = arith.constant 0.13333334 : f32
    %307 = vector.broadcast %cst_68 : f32 to vector<16x1x8xf32>
    %308 = arith.mulf %307, %306 : vector<16x1x8xf32>
    %309 = arith.addf %305, %308 : vector<16x1x8xf32>
    %310 = vector.extract_strided_slice %231 {offsets = [0, 5, 0], sizes = [16, 1, 8], strides = [1, 1, 1]} : vector<16x8x8xf32> to vector<16x1x8xf32>
    %cst_69 = arith.constant 0.399999976 : f32
    %311 = vector.broadcast %cst_69 : f32 to vector<16x1x8xf32>
    %312 = arith.mulf %311, %310 : vector<16x1x8xf32>
    %313 = vector.extract_strided_slice %231 {offsets = [0, 6, 0], sizes = [16, 1, 8], strides = [1, 1, 1]} : vector<16x8x8xf32> to vector<16x1x8xf32>
    %cst_70 = arith.constant 6.000000e-01 : f32
    %314 = vector.broadcast %cst_70 : f32 to vector<16x1x8xf32>
    %315 = arith.mulf %314, %313 : vector<16x1x8xf32>
    %316 = arith.addf %312, %315 : vector<16x1x8xf32>
    %317 = vector.extract_strided_slice %231 {offsets = [0, 6, 0], sizes = [16, 1, 8], strides = [1, 1, 1]} : vector<16x8x8xf32> to vector<16x1x8xf32>
    %cst_71 = arith.constant 0.933333337 : f32
    %318 = vector.broadcast %cst_71 : f32 to vector<16x1x8xf32>
    %319 = arith.mulf %318, %317 : vector<16x1x8xf32>
    %320 = vector.extract_strided_slice %231 {offsets = [0, 7, 0], sizes = [16, 1, 8], strides = [1, 1, 1]} : vector<16x8x8xf32> to vector<16x1x8xf32>
    %cst_72 = arith.constant 0.0666666701 : f32
    %321 = vector.broadcast %cst_72 : f32 to vector<16x1x8xf32>
    %322 = arith.mulf %321, %320 : vector<16x1x8xf32>
    %323 = arith.addf %319, %322 : vector<16x1x8xf32>
    %324 = vector.extract_strided_slice %231 {offsets = [0, 6, 0], sizes = [16, 1, 8], strides = [1, 1, 1]} : vector<16x8x8xf32> to vector<16x1x8xf32>
    %cst_73 = arith.constant 0.466666639 : f32
    %325 = vector.broadcast %cst_73 : f32 to vector<16x1x8xf32>
    %326 = arith.mulf %325, %324 : vector<16x1x8xf32>
    %327 = vector.extract_strided_slice %231 {offsets = [0, 7, 0], sizes = [16, 1, 8], strides = [1, 1, 1]} : vector<16x8x8xf32> to vector<16x1x8xf32>
    %cst_74 = arith.constant 0.533333361 : f32
    %328 = vector.broadcast %cst_74 : f32 to vector<16x1x8xf32>
    %329 = arith.mulf %328, %327 : vector<16x1x8xf32>
    %330 = arith.addf %326, %329 : vector<16x1x8xf32>
    %331 = vector.extract_strided_slice %231 {offsets = [0, 7, 0], sizes = [16, 1, 8], strides = [1, 1, 1]} : vector<16x8x8xf32> to vector<16x1x8xf32>
    %332 = tpu.concatenate %232, %239, %246, %253, %260, %267, %274, %281, %288, %295, %302, %309, %316, %323, %330, %331 in 1 : vector<16x1x8xf32>, vector<16x1x8xf32>, vector<16x1x8xf32>, vector<16x1x8xf32>, vector<16x1x8xf32>, vector<16x1x8xf32>, vector<16x1x8xf32>, vector<16x1x8xf32>, vector<16x1x8xf32>, vector<16x1x8xf32>, vector<16x1x8xf32>, vector<16x1x8xf32>, vector<16x1x8xf32>, vector<16x1x8xf32>, vector<16x1x8xf32>, vector<16x1x8xf32> -> vector<16x16x8xf32>
    %c0_75 = arith.constant 0 : index
    %c0_76 = arith.constant 0 : index
    %333 = vector.load %arg7[%c0_75, %c0_76] : memref<1x4xf32, #tpu.memory_space<vmem>>, vector<1x4xf32>
    %334 = vector.shape_cast %333 : vector<1x4xf32> to vector<1x4xf32>
    %335 = vector.broadcast %334 : vector<1x4xf32> to vector<256x4xf32>
    %cst_77 = arith.constant 0.000000e+00 : f32
    %336 = vector.broadcast %cst_77 : f32 to vector<16x1x8xf32>
    %337 = tpu.concatenate %336, %332, %336 in 1 : vector<16x1x8xf32>, vector<16x16x8xf32>, vector<16x1x8xf32> -> vector<16x18x8xf32>
    %cst_78 = arith.constant 0.000000e+00 : f32
    %338 = vector.broadcast %cst_78 : f32 to vector<1x18x8xf32>
    %339 = tpu.concatenate %338, %337, %338 in 0 : vector<1x18x8xf32>, vector<16x18x8xf32>, vector<1x18x8xf32> -> vector<18x18x8xf32>
    %c0_79 = arith.constant 0 : index
    %c0_80 = arith.constant 0 : index
    %c0_81 = arith.constant 0 : index
    %340 = vector.load %arg5[%c0_79, %c0_80, %c0_81] : memref<9x8x4xbf16, #tpu.memory_space<vmem>>, vector<9x8x4xbf16>
    %341 = vector.extract_strided_slice %339 {offsets = [0, 0, 0], sizes = [16, 16, 8], strides = [1, 1, 1]} : vector<18x18x8xf32> to vector<16x16x8xf32>
    %342 = vector.shape_cast %341 : vector<16x16x8xf32> to vector<256x8xf32>
    %343 = arith.truncf %342 : vector<256x8xf32> to vector<256x8xbf16>
    %344 = vector.extract_strided_slice %340 {offsets = [0, 0, 0], sizes = [1, 8, 4], strides = [1, 1, 1]} : vector<9x8x4xbf16> to vector<1x8x4xbf16>
    %345 = vector.shape_cast %344 : vector<1x8x4xbf16> to vector<8x4xbf16>
    %cst_82 = arith.constant dense<0.000000e+00> : vector<256x4xf32>
    %346 = tpu.matmul %343, %345, %cst_82 {dimension_numbers = #tpu.dot_dimension_numbers<[1], [0], [0], [1], [0, 0, 1, 1], [], []>} : vector<256x8xbf16>, vector<8x4xbf16>, vector<256x4xf32> -> vector<256x4xf32>
    %347 = arith.addf %335, %346 : vector<256x4xf32>
    %348 = vector.extract_strided_slice %339 {offsets = [0, 1, 0], sizes = [16, 16, 8], strides = [1, 1, 1]} : vector<18x18x8xf32> to vector<16x16x8xf32>
    %349 = vector.shape_cast %348 : vector<16x16x8xf32> to vector<256x8xf32>
    %350 = arith.truncf %349 : vector<256x8xf32> to vector<256x8xbf16>
    %351 = vector.extract_strided_slice %340 {offsets = [1, 0, 0], sizes = [1, 8, 4], strides = [1, 1, 1]} : vector<9x8x4xbf16> to vector<1x8x4xbf16>
    %352 = vector.shape_cast %351 : vector<1x8x4xbf16> to vector<8x4xbf16>
    %cst_83 = arith.constant dense<0.000000e+00> : vector<256x4xf32>
    %353 = tpu.matmul %350, %352, %cst_83 {dimension_numbers = #tpu.dot_dimension_numbers<[1], [0], [0], [1], [0, 0, 1, 1], [], []>} : vector<256x8xbf16>, vector<8x4xbf16>, vector<256x4xf32> -> vector<256x4xf32>
    %354 = arith.addf %347, %353 : vector<256x4xf32>
    %355 = vector.extract_strided_slice %339 {offsets = [0, 2, 0], sizes = [16, 16, 8], strides = [1, 1, 1]} : vector<18x18x8xf32> to vector<16x16x8xf32>
    %356 = vector.shape_cast %355 : vector<16x16x8xf32> to vector<256x8xf32>
    %357 = arith.truncf %356 : vector<256x8xf32> to vector<256x8xbf16>
    %358 = vector.extract_strided_slice %340 {offsets = [2, 0, 0], sizes = [1, 8, 4], strides = [1, 1, 1]} : vector<9x8x4xbf16> to vector<1x8x4xbf16>
    %359 = vector.shape_cast %358 : vector<1x8x4xbf16> to vector<8x4xbf16>
    %cst_84 = arith.constant dense<0.000000e+00> : vector<256x4xf32>
    %360 = tpu.matmul %357, %359, %cst_84 {dimension_numbers = #tpu.dot_dimension_numbers<[1], [0], [0], [1], [0, 0, 1, 1], [], []>} : vector<256x8xbf16>, vector<8x4xbf16>, vector<256x4xf32> -> vector<256x4xf32>
    %361 = arith.addf %354, %360 : vector<256x4xf32>
    %362 = vector.extract_strided_slice %339 {offsets = [1, 0, 0], sizes = [16, 16, 8], strides = [1, 1, 1]} : vector<18x18x8xf32> to vector<16x16x8xf32>
    %363 = vector.shape_cast %362 : vector<16x16x8xf32> to vector<256x8xf32>
    %364 = arith.truncf %363 : vector<256x8xf32> to vector<256x8xbf16>
    %365 = vector.extract_strided_slice %340 {offsets = [3, 0, 0], sizes = [1, 8, 4], strides = [1, 1, 1]} : vector<9x8x4xbf16> to vector<1x8x4xbf16>
    %366 = vector.shape_cast %365 : vector<1x8x4xbf16> to vector<8x4xbf16>
    %cst_85 = arith.constant dense<0.000000e+00> : vector<256x4xf32>
    %367 = tpu.matmul %364, %366, %cst_85 {dimension_numbers = #tpu.dot_dimension_numbers<[1], [0], [0], [1], [0, 0, 1, 1], [], []>} : vector<256x8xbf16>, vector<8x4xbf16>, vector<256x4xf32> -> vector<256x4xf32>
    %368 = arith.addf %361, %367 : vector<256x4xf32>
    %369 = vector.extract_strided_slice %339 {offsets = [1, 1, 0], sizes = [16, 16, 8], strides = [1, 1, 1]} : vector<18x18x8xf32> to vector<16x16x8xf32>
    %370 = vector.shape_cast %369 : vector<16x16x8xf32> to vector<256x8xf32>
    %371 = arith.truncf %370 : vector<256x8xf32> to vector<256x8xbf16>
    %372 = vector.extract_strided_slice %340 {offsets = [4, 0, 0], sizes = [1, 8, 4], strides = [1, 1, 1]} : vector<9x8x4xbf16> to vector<1x8x4xbf16>
    %373 = vector.shape_cast %372 : vector<1x8x4xbf16> to vector<8x4xbf16>
    %cst_86 = arith.constant dense<0.000000e+00> : vector<256x4xf32>
    %374 = tpu.matmul %371, %373, %cst_86 {dimension_numbers = #tpu.dot_dimension_numbers<[1], [0], [0], [1], [0, 0, 1, 1], [], []>} : vector<256x8xbf16>, vector<8x4xbf16>, vector<256x4xf32> -> vector<256x4xf32>
    %375 = arith.addf %368, %374 : vector<256x4xf32>
    %376 = vector.extract_strided_slice %339 {offsets = [1, 2, 0], sizes = [16, 16, 8], strides = [1, 1, 1]} : vector<18x18x8xf32> to vector<16x16x8xf32>
    %377 = vector.shape_cast %376 : vector<16x16x8xf32> to vector<256x8xf32>
    %378 = arith.truncf %377 : vector<256x8xf32> to vector<256x8xbf16>
    %379 = vector.extract_strided_slice %340 {offsets = [5, 0, 0], sizes = [1, 8, 4], strides = [1, 1, 1]} : vector<9x8x4xbf16> to vector<1x8x4xbf16>
    %380 = vector.shape_cast %379 : vector<1x8x4xbf16> to vector<8x4xbf16>
    %cst_87 = arith.constant dense<0.000000e+00> : vector<256x4xf32>
    %381 = tpu.matmul %378, %380, %cst_87 {dimension_numbers = #tpu.dot_dimension_numbers<[1], [0], [0], [1], [0, 0, 1, 1], [], []>} : vector<256x8xbf16>, vector<8x4xbf16>, vector<256x4xf32> -> vector<256x4xf32>
    %382 = arith.addf %375, %381 : vector<256x4xf32>
    %383 = vector.extract_strided_slice %339 {offsets = [2, 0, 0], sizes = [16, 16, 8], strides = [1, 1, 1]} : vector<18x18x8xf32> to vector<16x16x8xf32>
    %384 = vector.shape_cast %383 : vector<16x16x8xf32> to vector<256x8xf32>
    %385 = arith.truncf %384 : vector<256x8xf32> to vector<256x8xbf16>
    %386 = vector.extract_strided_slice %340 {offsets = [6, 0, 0], sizes = [1, 8, 4], strides = [1, 1, 1]} : vector<9x8x4xbf16> to vector<1x8x4xbf16>
    %387 = vector.shape_cast %386 : vector<1x8x4xbf16> to vector<8x4xbf16>
    %cst_88 = arith.constant dense<0.000000e+00> : vector<256x4xf32>
    %388 = tpu.matmul %385, %387, %cst_88 {dimension_numbers = #tpu.dot_dimension_numbers<[1], [0], [0], [1], [0, 0, 1, 1], [], []>} : vector<256x8xbf16>, vector<8x4xbf16>, vector<256x4xf32> -> vector<256x4xf32>
    %389 = arith.addf %382, %388 : vector<256x4xf32>
    %390 = vector.extract_strided_slice %339 {offsets = [2, 1, 0], sizes = [16, 16, 8], strides = [1, 1, 1]} : vector<18x18x8xf32> to vector<16x16x8xf32>
    %391 = vector.shape_cast %390 : vector<16x16x8xf32> to vector<256x8xf32>
    %392 = arith.truncf %391 : vector<256x8xf32> to vector<256x8xbf16>
    %393 = vector.extract_strided_slice %340 {offsets = [7, 0, 0], sizes = [1, 8, 4], strides = [1, 1, 1]} : vector<9x8x4xbf16> to vector<1x8x4xbf16>
    %394 = vector.shape_cast %393 : vector<1x8x4xbf16> to vector<8x4xbf16>
    %cst_89 = arith.constant dense<0.000000e+00> : vector<256x4xf32>
    %395 = tpu.matmul %392, %394, %cst_89 {dimension_numbers = #tpu.dot_dimension_numbers<[1], [0], [0], [1], [0, 0, 1, 1], [], []>} : vector<256x8xbf16>, vector<8x4xbf16>, vector<256x4xf32> -> vector<256x4xf32>
    %396 = arith.addf %389, %395 : vector<256x4xf32>
    %397 = vector.extract_strided_slice %339 {offsets = [2, 2, 0], sizes = [16, 16, 8], strides = [1, 1, 1]} : vector<18x18x8xf32> to vector<16x16x8xf32>
    %398 = vector.shape_cast %397 : vector<16x16x8xf32> to vector<256x8xf32>
    %399 = arith.truncf %398 : vector<256x8xf32> to vector<256x8xbf16>
    %400 = vector.extract_strided_slice %340 {offsets = [8, 0, 0], sizes = [1, 8, 4], strides = [1, 1, 1]} : vector<9x8x4xbf16> to vector<1x8x4xbf16>
    %401 = vector.shape_cast %400 : vector<1x8x4xbf16> to vector<8x4xbf16>
    %cst_90 = arith.constant dense<0.000000e+00> : vector<256x4xf32>
    %402 = tpu.matmul %399, %401, %cst_90 {dimension_numbers = #tpu.dot_dimension_numbers<[1], [0], [0], [1], [0, 0, 1, 1], [], []>} : vector<256x8xbf16>, vector<8x4xbf16>, vector<256x4xf32> -> vector<256x4xf32>
    %403 = arith.addf %396, %402 : vector<256x4xf32>
    %c0_91 = arith.constant 0 : index
    %c0_92 = arith.constant 0 : index
    %c0_93 = arith.constant 0 : index
    %c0_94 = arith.constant 0 : index
    %404 = vector.load %arg2[%c0_91, %c0_92, %c0_93, %c0_94] : memref<1x16x16x4xf32, #tpu.memory_space<vmem>>, vector<1x16x16x4xf32>
    %405 = vector.shape_cast %404 : vector<1x16x16x4xf32> to vector<16x16x4xf32>
    %cst_95 = arith.constant 0.000000e+00 : f32
    %406 = vector.broadcast %cst_95 : f32 to vector<16x1x4xf32>
    %407 = tpu.concatenate %406, %405, %406 in 1 : vector<16x1x4xf32>, vector<16x16x4xf32>, vector<16x1x4xf32> -> vector<16x18x4xf32>
    %cst_96 = arith.constant 0.000000e+00 : f32
    %408 = vector.broadcast %cst_96 : f32 to vector<1x18x4xf32>
    %409 = tpu.concatenate %408, %407, %408 in 0 : vector<1x18x4xf32>, vector<16x18x4xf32>, vector<1x18x4xf32> -> vector<18x18x4xf32>
    %c0_97 = arith.constant 0 : index
    %c0_98 = arith.constant 0 : index
    %c0_99 = arith.constant 0 : index
    %410 = vector.load %arg6[%c0_97, %c0_98, %c0_99] : memref<9x4x4xbf16, #tpu.memory_space<vmem>>, vector<9x4x4xbf16>
    %411 = vector.extract_strided_slice %409 {offsets = [0, 0, 0], sizes = [16, 16, 4], strides = [1, 1, 1]} : vector<18x18x4xf32> to vector<16x16x4xf32>
    %412 = vector.shape_cast %411 : vector<16x16x4xf32> to vector<256x4xf32>
    %413 = arith.truncf %412 : vector<256x4xf32> to vector<256x4xbf16>
    %414 = vector.extract_strided_slice %410 {offsets = [0, 0, 0], sizes = [1, 4, 4], strides = [1, 1, 1]} : vector<9x4x4xbf16> to vector<1x4x4xbf16>
    %415 = vector.shape_cast %414 : vector<1x4x4xbf16> to vector<4x4xbf16>
    %cst_100 = arith.constant dense<0.000000e+00> : vector<256x4xf32>
    %416 = tpu.matmul %413, %415, %cst_100 {dimension_numbers = #tpu.dot_dimension_numbers<[1], [0], [0], [1], [0, 0, 1, 1], [], []>} : vector<256x4xbf16>, vector<4x4xbf16>, vector<256x4xf32> -> vector<256x4xf32>
    %417 = arith.addf %403, %416 : vector<256x4xf32>
    %418 = vector.extract_strided_slice %409 {offsets = [0, 1, 0], sizes = [16, 16, 4], strides = [1, 1, 1]} : vector<18x18x4xf32> to vector<16x16x4xf32>
    %419 = vector.shape_cast %418 : vector<16x16x4xf32> to vector<256x4xf32>
    %420 = arith.truncf %419 : vector<256x4xf32> to vector<256x4xbf16>
    %421 = vector.extract_strided_slice %410 {offsets = [1, 0, 0], sizes = [1, 4, 4], strides = [1, 1, 1]} : vector<9x4x4xbf16> to vector<1x4x4xbf16>
    %422 = vector.shape_cast %421 : vector<1x4x4xbf16> to vector<4x4xbf16>
    %cst_101 = arith.constant dense<0.000000e+00> : vector<256x4xf32>
    %423 = tpu.matmul %420, %422, %cst_101 {dimension_numbers = #tpu.dot_dimension_numbers<[1], [0], [0], [1], [0, 0, 1, 1], [], []>} : vector<256x4xbf16>, vector<4x4xbf16>, vector<256x4xf32> -> vector<256x4xf32>
    %424 = arith.addf %417, %423 : vector<256x4xf32>
    %425 = vector.extract_strided_slice %409 {offsets = [0, 2, 0], sizes = [16, 16, 4], strides = [1, 1, 1]} : vector<18x18x4xf32> to vector<16x16x4xf32>
    %426 = vector.shape_cast %425 : vector<16x16x4xf32> to vector<256x4xf32>
    %427 = arith.truncf %426 : vector<256x4xf32> to vector<256x4xbf16>
    %428 = vector.extract_strided_slice %410 {offsets = [2, 0, 0], sizes = [1, 4, 4], strides = [1, 1, 1]} : vector<9x4x4xbf16> to vector<1x4x4xbf16>
    %429 = vector.shape_cast %428 : vector<1x4x4xbf16> to vector<4x4xbf16>
    %cst_102 = arith.constant dense<0.000000e+00> : vector<256x4xf32>
    %430 = tpu.matmul %427, %429, %cst_102 {dimension_numbers = #tpu.dot_dimension_numbers<[1], [0], [0], [1], [0, 0, 1, 1], [], []>} : vector<256x4xbf16>, vector<4x4xbf16>, vector<256x4xf32> -> vector<256x4xf32>
    %431 = arith.addf %424, %430 : vector<256x4xf32>
    %432 = vector.extract_strided_slice %409 {offsets = [1, 0, 0], sizes = [16, 16, 4], strides = [1, 1, 1]} : vector<18x18x4xf32> to vector<16x16x4xf32>
    %433 = vector.shape_cast %432 : vector<16x16x4xf32> to vector<256x4xf32>
    %434 = arith.truncf %433 : vector<256x4xf32> to vector<256x4xbf16>
    %435 = vector.extract_strided_slice %410 {offsets = [3, 0, 0], sizes = [1, 4, 4], strides = [1, 1, 1]} : vector<9x4x4xbf16> to vector<1x4x4xbf16>
    %436 = vector.shape_cast %435 : vector<1x4x4xbf16> to vector<4x4xbf16>
    %cst_103 = arith.constant dense<0.000000e+00> : vector<256x4xf32>
    %437 = tpu.matmul %434, %436, %cst_103 {dimension_numbers = #tpu.dot_dimension_numbers<[1], [0], [0], [1], [0, 0, 1, 1], [], []>} : vector<256x4xbf16>, vector<4x4xbf16>, vector<256x4xf32> -> vector<256x4xf32>
    %438 = arith.addf %431, %437 : vector<256x4xf32>
    %439 = vector.extract_strided_slice %409 {offsets = [1, 1, 0], sizes = [16, 16, 4], strides = [1, 1, 1]} : vector<18x18x4xf32> to vector<16x16x4xf32>
    %440 = vector.shape_cast %439 : vector<16x16x4xf32> to vector<256x4xf32>
    %441 = arith.truncf %440 : vector<256x4xf32> to vector<256x4xbf16>
    %442 = vector.extract_strided_slice %410 {offsets = [4, 0, 0], sizes = [1, 4, 4], strides = [1, 1, 1]} : vector<9x4x4xbf16> to vector<1x4x4xbf16>
    %443 = vector.shape_cast %442 : vector<1x4x4xbf16> to vector<4x4xbf16>
    %cst_104 = arith.constant dense<0.000000e+00> : vector<256x4xf32>
    %444 = tpu.matmul %441, %443, %cst_104 {dimension_numbers = #tpu.dot_dimension_numbers<[1], [0], [0], [1], [0, 0, 1, 1], [], []>} : vector<256x4xbf16>, vector<4x4xbf16>, vector<256x4xf32> -> vector<256x4xf32>
    %445 = arith.addf %438, %444 : vector<256x4xf32>
    %446 = vector.extract_strided_slice %409 {offsets = [1, 2, 0], sizes = [16, 16, 4], strides = [1, 1, 1]} : vector<18x18x4xf32> to vector<16x16x4xf32>
    %447 = vector.shape_cast %446 : vector<16x16x4xf32> to vector<256x4xf32>
    %448 = arith.truncf %447 : vector<256x4xf32> to vector<256x4xbf16>
    %449 = vector.extract_strided_slice %410 {offsets = [5, 0, 0], sizes = [1, 4, 4], strides = [1, 1, 1]} : vector<9x4x4xbf16> to vector<1x4x4xbf16>
    %450 = vector.shape_cast %449 : vector<1x4x4xbf16> to vector<4x4xbf16>
    %cst_105 = arith.constant dense<0.000000e+00> : vector<256x4xf32>
    %451 = tpu.matmul %448, %450, %cst_105 {dimension_numbers = #tpu.dot_dimension_numbers<[1], [0], [0], [1], [0, 0, 1, 1], [], []>} : vector<256x4xbf16>, vector<4x4xbf16>, vector<256x4xf32> -> vector<256x4xf32>
    %452 = arith.addf %445, %451 : vector<256x4xf32>
    %453 = vector.extract_strided_slice %409 {offsets = [2, 0, 0], sizes = [16, 16, 4], strides = [1, 1, 1]} : vector<18x18x4xf32> to vector<16x16x4xf32>
    %454 = vector.shape_cast %453 : vector<16x16x4xf32> to vector<256x4xf32>
    %455 = arith.truncf %454 : vector<256x4xf32> to vector<256x4xbf16>
    %456 = vector.extract_strided_slice %410 {offsets = [6, 0, 0], sizes = [1, 4, 4], strides = [1, 1, 1]} : vector<9x4x4xbf16> to vector<1x4x4xbf16>
    %457 = vector.shape_cast %456 : vector<1x4x4xbf16> to vector<4x4xbf16>
    %cst_106 = arith.constant dense<0.000000e+00> : vector<256x4xf32>
    %458 = tpu.matmul %455, %457, %cst_106 {dimension_numbers = #tpu.dot_dimension_numbers<[1], [0], [0], [1], [0, 0, 1, 1], [], []>} : vector<256x4xbf16>, vector<4x4xbf16>, vector<256x4xf32> -> vector<256x4xf32>
    %459 = arith.addf %452, %458 : vector<256x4xf32>
    %460 = vector.extract_strided_slice %409 {offsets = [2, 1, 0], sizes = [16, 16, 4], strides = [1, 1, 1]} : vector<18x18x4xf32> to vector<16x16x4xf32>
    %461 = vector.shape_cast %460 : vector<16x16x4xf32> to vector<256x4xf32>
    %462 = arith.truncf %461 : vector<256x4xf32> to vector<256x4xbf16>
    %463 = vector.extract_strided_slice %410 {offsets = [7, 0, 0], sizes = [1, 4, 4], strides = [1, 1, 1]} : vector<9x4x4xbf16> to vector<1x4x4xbf16>
    %464 = vector.shape_cast %463 : vector<1x4x4xbf16> to vector<4x4xbf16>
    %cst_107 = arith.constant dense<0.000000e+00> : vector<256x4xf32>
    %465 = tpu.matmul %462, %464, %cst_107 {dimension_numbers = #tpu.dot_dimension_numbers<[1], [0], [0], [1], [0, 0, 1, 1], [], []>} : vector<256x4xbf16>, vector<4x4xbf16>, vector<256x4xf32> -> vector<256x4xf32>
    %466 = arith.addf %459, %465 : vector<256x4xf32>
    %467 = vector.extract_strided_slice %409 {offsets = [2, 2, 0], sizes = [16, 16, 4], strides = [1, 1, 1]} : vector<18x18x4xf32> to vector<16x16x4xf32>
    %468 = vector.shape_cast %467 : vector<16x16x4xf32> to vector<256x4xf32>
    %469 = arith.truncf %468 : vector<256x4xf32> to vector<256x4xbf16>
    %470 = vector.extract_strided_slice %410 {offsets = [8, 0, 0], sizes = [1, 4, 4], strides = [1, 1, 1]} : vector<9x4x4xbf16> to vector<1x4x4xbf16>
    %471 = vector.shape_cast %470 : vector<1x4x4xbf16> to vector<4x4xbf16>
    %cst_108 = arith.constant dense<0.000000e+00> : vector<256x4xf32>
    %472 = tpu.matmul %469, %471, %cst_108 {dimension_numbers = #tpu.dot_dimension_numbers<[1], [0], [0], [1], [0, 0, 1, 1], [], []>} : vector<256x4xbf16>, vector<4x4xbf16>, vector<256x4xf32> -> vector<256x4xf32>
    %473 = arith.addf %466, %472 : vector<256x4xf32>
    %cst_109 = arith.constant 0.000000e+00 : f32
    %474 = vector.broadcast %cst_109 : f32 to vector<256x4xf32>
    %475 = arith.maximumf %473, %474 : vector<256x4xf32>
    %c0_110 = arith.constant 0 : index
    %c0_111 = arith.constant 0 : index
    %c0_112 = arith.constant 0 : index
    %476 = vector.load %arg8[%c0_110, %c0_111, %c0_112] : memref<1x256x4xf32, #tpu.memory_space<vmem>>, vector<1x256x4xf32>
    %477 = vector.shape_cast %476 : vector<1x256x4xf32> to vector<256x4xf32>
    %478 = vector.shape_cast %475 : vector<256x4xf32> to vector<1x256x4xf32>
    tpu.vector_store %arg8[%c0_110, %c0_111, %c0_112], %478 {strides = array<i32>} : memref<1x256x4xf32, #tpu.memory_space<vmem>>, vector<1x256x4xf32>,
    return
  }
  func.func @transform_0(%arg0: i32) -> (i32, i32, i32, i32) {
    %c0_i32 = arith.constant 0 : i32
    %c0_i32_0 = arith.constant 0 : i32
    %c0_i32_1 = arith.constant 0 : i32
    %c0_i32_2 = arith.constant 0 : i32
    return %arg0, %c0_i32, %c0_i32_0, %c0_i32_1 : i32, i32, i32, i32
  }
  func.func @transform_1(%arg0: i32) -> (i32, i32, i32, i32) {
    %c0_i32 = arith.constant 0 : i32
    %c0_i32_0 = arith.constant 0 : i32
    %c0_i32_1 = arith.constant 0 : i32
    %c0_i32_2 = arith.constant 0 : i32
    return %arg0, %c0_i32, %c0_i32_0, %c0_i32_1 : i32, i32, i32, i32
  }
  func.func @transform_2(%arg0: i32) -> (i32, i32, i32) {
    %c0_i32 = arith.constant 0 : i32
    %c0_i32_0 = arith.constant 0 : i32
    %c0_i32_1 = arith.constant 0 : i32
    %c0_i32_2 = arith.constant 0 : i32
    return %c0_i32, %c0_i32_0, %c0_i32_1 : i32, i32, i32
  }
  func.func @transform_3(%arg0: i32) -> (i32, i32) {
    %c0_i32 = arith.constant 0 : i32
    %c0_i32_0 = arith.constant 0 : i32
    %c0_i32_1 = arith.constant 0 : i32
    return %c0_i32, %c0_i32_0 : i32, i32
  }
  func.func @transform_4(%arg0: i32) -> (i32, i32, i32) {
    %c0_i32 = arith.constant 0 : i32
    %c0_i32_0 = arith.constant 0 : i32
    %c0_i32_1 = arith.constant 0 : i32
    %c0_i32_2 = arith.constant 0 : i32
    return %c0_i32, %c0_i32_0, %c0_i32_1 : i32, i32, i32
  }
  func.func @transform_5(%arg0: i32) -> (i32, i32, i32) {
    %c0_i32 = arith.constant 0 : i32
    %c0_i32_0 = arith.constant 0 : i32
    %c0_i32_1 = arith.constant 0 : i32
    %c0_i32_2 = arith.constant 0 : i32
    return %c0_i32, %c0_i32_0, %c0_i32_1 : i32, i32, i32
  }
  func.func @transform_6(%arg0: i32) -> (i32, i32) {
    %c0_i32 = arith.constant 0 : i32
    %c0_i32_0 = arith.constant 0 : i32
    %c0_i32_1 = arith.constant 0 : i32
    return %c0_i32, %c0_i32_0 : i32, i32
  }
  func.func @transform_7(%arg0: i32) -> (i32, i32, i32) {
    %c0_i32 = arith.constant 0 : i32
    %c0_i32_0 = arith.constant 0 : i32
    %c0_i32_1 = arith.constant 0 : i32
    return %arg0, %c0_i32, %c0_i32_0 : i32, i32, i32
  }
}

</mosaic_0001>

<bundles_post_ra>
// kernel: unet_block_forward.1
= control target key start
LH: loop header
LB: loop body
LE: loop exit
PB: predicated region body
PF: predicated region fallthrough
CT: control target
= control target key end

     0   :  { %s10628_s24 = smov 0   ;;  %s13916_s0 = inlined_call_operand.vmem [shape: f32[2,16,8,8], index: 0, kind: input, shape index: {}]   ;;  %s13917_s1 = inlined_call_operand.vmem [shape: f32[2,16,16,4], index: 1, kind: input, shape index: {}]   ;;  %s13918_s2 = inlined_call_operand.vmem [shape: bf16[9,4,8], index: 2, kind: input, shape index: {}]   ;;  %s13919_s3 = inlined_call_operand.vmem [shape: f32[1,8], index: 3, kind: input, shape index: {}]   ;;  %s13920_s4 = inlined_call_operand.vmem [shape: bf16[9,8,4], index: 4, kind: input, shape index: {}]   ;;  %s13921_s5 = inlined_call_operand.vmem [shape: bf16[9,4,4], index: 5, kind: input, shape index: {}]   ;;  %s13922_s6 = inlined_call_operand.vmem [shape: f32[1,4], index: 6, kind: input, shape index: {}]   ;;  %s13923_s7 = inlined_call_operand.vmem [shape: f32[2,256,4], index: 7, kind: output, shape index: {}]  }
   0x1 LB: > { %s8456_s25 = sadd.s32 4294967295, %s10583_s24   ;;  %p8460_p0 = scmp.ge.s32.totalorder %s10583_s24, 1  ;;  %s10583_s24 = sphi %s10628_s24, %s17_s24  }
   0x2   : > { %p247_p1 = scmp.lt.s32.totalorder %s10583_s24, 3 }
   0x4   : > { %p248_p2 = pnand %p8460_p0, %p247_p1 }
   0x6   : > { %251 = sbr.rel (%p248_p2) target bundleno = 1700 (0x6a4), region = 48 }
   0xd   : > { %p284_p3 = scmp.lt.s32.totalorder %s8456_s25, 1  ;;  %s10585_s30 = smov 124   ;;  %v452_v22 = vld [vmem:[%s13918_s2] sm:$0x3]  ;;  %vm478_vm0 = vcmask 1041408   ;;  %vm435_vm1 = vcmask 1040384  }
   0xe   : > { %10497 = vmatprep.subr.msk.bf16.mxu0 %vm478_vm0, %v452_v22  ;;  %v480_v24 = vsel %vm478_vm0, %v452_v22, 0  ;;  %v453_v26 = vld [vmem:[%s13918_s2 + $0x2] sm:$0x3]  ;;  %vm465_vm2 = vcmask 31744   ;;  %vm570_vm3 = vcmask 1046528   ;;  %vm694_vm4 = vcmask 1045504  }
   0xf   : > { %s14507_s25 = smov (!%p284_p3, %s8456_s25), 1  ;;  %9146 = vmatpush3.bf16.msra.mxu0 %v480_v24  ;;  %vm3327_vm5 = vcmask 1043456   ;;  %vm3310_vm6 = vcmask 1042432   ;;  %vm3344_vm7 = vcmask 1044480   ;;  %vm3697_vm8 = vcmask 64512  }
  0x10   : > { %s8791_s26 = sshll.u32 %s14507_s25, 7  ;;  %10498 = vmatprep.subr.msk.bf16.mxu0 %vm478_vm0, %v453_v26  ;;  %s8792_s21 = sshll.u32 %s14507_s25, 8 }
  0x11   : > { %s288_s29 = scalar_lea.vmem %s13916_s0, %s8791_s26  ;;  %s12390_s26 = scalar_lea.vmem %s13917_s1, %s8792_s21 }
  0x12   : > { %v304_v0 = vld [vmem:[%s288_s29 + $0x20] sm:$0xff]  ;;  %v305_v1 = vld [vmem:[%s288_s29 + $0x28] sm:$0xff]  ;;  %v306_v5 = vld [vmem:[%s288_s29 + $0x30] sm:$0xff]  ;;  %s13796_s12 = scalar_lea.vmem %s13923_s7, %s8792_s21 }
  0x13   : > { %v300_v2 = vld [vmem:[%s288_s29] sm:$0xff]  ;;  %v10546_v3 = vpack.i.bf16 %v305_v1, %v304_v0  ;;  %v301_v4 = vld [vmem:[%s288_s29 + $0x8] sm:$0xff]  ;;  %v307_v6 = vld [vmem:[%s288_s29 + $0x38] sm:$0xff] }
  0x14   : > { %v10536_v7 = vpack.i.bf16 %v301_v4, %v300_v2  ;;  %v302_v8 = vld [vmem:[%s288_s29 + $0x10] sm:$0xff]  ;;  %v303_v9 = vld [vmem:[%s288_s29 + $0x18] sm:$0xff]  ;;  %v10551_v10 = vpack.i.bf16 %v307_v6, %v306_v5  ;;  %v308_v14 = vld [vmem:[%s288_s29 + $0x40] sm:$0xff] }
  0x15   : > { %10547 = vrot.lane.b32.xlu1 %v10546_v3, %s10585_s30  ;;  %v10541_v11 = vpack.i.bf16 %v303_v9, %v302_v8  ;;  %v10642_v12 = vld [vmem:[%s288_s29 + $0x50] sm:$0xff]  ;;  %v311_v13 = vld [vmem:[%s288_s29 + $0x58] sm:$0xff]  ;;  %v309_v15 = vld [vmem:[%s288_s29 + $0x48] sm:$0xff] }
  0x16   : > { %10537 = vrot.lane.b32.xlu0 %v10536_v7, %s10585_s30  ;;  %v10561_v16 = vpack.i.bf16 %v311_v13, %v10642_v12  ;;  %v10556_v17 = vpack.i.bf16 %v309_v15, %v308_v14  ;;  %v10645_v18 = vld [vmem:[%s288_s29 + $0x70] sm:$0xff]  ;;  %v10647_v19 = vld [vmem:[%s288_s29 + $0x78] sm:$0xff]  ;;  %v312_v20 = vld [vmem:[%s288_s29 + $0x60] sm:$0xff] }
  0x17   : > { %v313_v21 = vld [vmem:[%s288_s29 + $0x68] sm:$0xff]  ;;  %v10571_v23 = vpack.i.bf16 %v10647_v19, %v10645_v18 }
  0x18   : > { %v10566_v25 = vpack.i.bf16 %v313_v21, %v312_v20 }
  0x19   : > { %10552 = vrot.lane.b32.xlu1 %v10551_v10, %s10585_s30 }
  0x1a   : > { %10542 = vrot.lane.b32.xlu0 %v10541_v11, %s10585_s30 }
  0x1d   : > { %10562 = vrot.lane.b32.xlu1 %v10561_v16, %s10585_s30 }
  0x1e   : > { %10557 = vrot.lane.b32.xlu0 %v10556_v17, %s10585_s30  ;;  %v454_v17 = vld [vmem:[%s13918_s2 + $0x4] sm:$0x3] }
  0x21   : > { %10572 = vrot.lane.b32.xlu1 %v10571_v23, %s10585_s30 }
  0x22   : > { %10567 = vrot.lane.b32.xlu0 %v10566_v25, %s10585_s30 }
  0x87   : > { %v10548_v27 = vpop.permute.xlu1 %10547 }
  0x88   : > { %v10538_v28 = vpop.permute.xlu0 %10537  ;;  %v10550_v29 = vunpack.i.h.bf16 %v10548_v27  ;;  %v10549_v30 = vunpack.i.l.bf16 %v10548_v27 }
  0x89   : > { %v10540_v31 = vunpack.i.h.bf16 %v10538_v28  ;;  %v10539_v32 = vunpack.i.l.bf16 %v10538_v28 }
  0x8a   : > { %v385_v36 = vmax.f32 %v305_v1, %v10550_v29  ;;  %v384_v37 = vmax.f32 %v304_v0, %v10549_v30 }
  0x8b   : > { %v10553_v38 = vpop.permute.xlu1 %10552  ;;  %v381_v39 = vmax.f32 %v301_v4, %v10540_v31  ;;  %v380_v40 = vmax.f32 %v300_v2, %v10539_v32 }
  0x8c   : > { %v10543_v33 = vpop.permute.xlu0 %10542  ;;  %v398_v44 = vmax.f32 %v384_v37, %v385_v36  ;;  %v10555_v46 = vunpack.i.h.bf16 %v10553_v38  ;;  %v10554_v47 = vunpack.i.l.bf16 %v10553_v38 }
  0x8d   : > { %v10545_v34 = vunpack.i.h.bf16 %v10543_v33  ;;  %v10544_v35 = vunpack.i.l.bf16 %v10543_v33  ;;  %v396_v45 = vmax.f32 %v380_v40, %v381_v39 }
  0x8e   : > { %v421_v50 = vrot.slane %v398_v44, 7  ;;  %v387_v53 = vmax.f32 %v307_v6, %v10555_v46  ;;  %v386_v54 = vmax.f32 %v306_v5, %v10554_v47 }
  0x8f   : > { %v383_v41 = vmax.f32 %v303_v9, %v10545_v34  ;;  %v382_v42 = vmax.f32 %v302_v8, %v10544_v35  ;;  %v10563_v49 = vpop.permute.xlu1 %10562  ;;  %v419_v52 = vrot.slane %v396_v45, 7  ;;  %v10586_v9 = vmov 0.0  }
  0x90   : > { %v10558_v43 = vpop.permute.xlu0 %10557  ;;  %v10565_v55 = vunpack.i.h.bf16 %v10563_v49  ;;  %v10564_v57 = vunpack.i.l.bf16 %v10563_v49  ;;  %v10661_v62 = vsel %vm435_vm1, 0.0, %v421_v50  ;;  %v399_v63 = vmax.f32 %v386_v54, %v387_v53 }
  0x91   : > { %v397_v48 = vmax.f32 %v382_v42, %v383_v41  ;;  %v10560_v58 = vunpack.i.h.bf16 %v10558_v43  ;;  %v10559_v59 = vunpack.i.l.bf16 %v10558_v43  ;;  %v10668_v5 = vsel %vm435_vm1, 0.0, %v419_v52 }
  0x92   : > { %v391_v0 = vmax.f32 %v311_v13, %v10565_v55  ;;  %v390_v3 = vmax.f32 %v10642_v12, %v10564_v57  ;;  %v461_v10 = vpack.c.bf16 %v10668_v5, %v10586_v9  ;;  %v619_v13 = vsel %vm478_vm0, %v453_v26, 0  ;;  %v455_v57 = vld [vmem:[%s13918_s2 + $0x6] sm:$0x3] }
  0x93   : > { %v420_v56 = vrot.slane %v397_v48, 7  ;;  %v389_v61 = vmax.f32 %v309_v15, %v10560_v58  ;;  %v388_v1 = vmax.f32 %v308_v14, %v10559_v59  ;;  %v10678_v12 = vsel %vm435_vm1, %v419_v52, 0.0 }
  0x94   : > { %v10568_v51 = vpop.permute.xlu0 %10567  ;;  %v422_v14 = vrot.slane %v399_v63, 7  ;;  %v401_v15 = vmax.f32 %v390_v3, %v391_v0  ;;  %9147 = vmatprep.mubr.msk.bf16.mxu0 %vm465_vm2, %v461_v10  ;;  %v574_v22 = vrot.slane %v10678_v12, 1  ;;  %v573_v23 = vrot.slane %v10668_v5, 1 }
  0x95   : > { %v10570_v60 = vunpack.i.h.bf16 %v10568_v51  ;;  %v10664_v2 = vsel %vm435_vm1, 0.0, %v420_v56  ;;  %v10569_v4 = vunpack.i.l.bf16 %v10568_v51  ;;  %v400_v7 = vmax.f32 %v388_v1, %v389_v61 }
  0x96   : > { %v10674_v11 = vpack.c.bf16 %v10661_v62, %v10664_v2  ;;  %v10693_v24 = vsel %vm435_vm1, 0.0, %v422_v14  ;;  %v424_v25 = vrot.slane %v401_v15, 7  ;;  %v446_v28 = vsel %vm435_vm1, %v421_v50, 0.0 }
  0x97   : > { %v393_v6 = vmax.f32 %v313_v21, %v10570_v60  ;;  %v392_v8 = vmax.f32 %v312_v20, %v10569_v4  ;;  %v423_v16 = vrot.slane %v400_v7, 7  ;;  %v10701_v29 = vrot.slane %v10586_v9, 1 }
  0x98   : > { %9148 = vmatmul.mubr.msk.bf16.vlgmr.msra.gmra.mrb[0].mxu0 %vm465_vm2, %v10674_v11  ;;  %v445_v30 = vsel %vm435_vm1, %v420_v56, 0.0  ;;  %v10710_v32 = vsel %vm570_vm3, %v573_v23, %v574_v22  ;;  %v10713_v33 = vsel %vm435_vm1, 0.0, %v424_v25  ;;  %v579_v35 = vrot.slane %v10661_v62, 1 }
  0x99   : > { %v402_v20 = vmax.f32 %v392_v8, %v393_v6  ;;  %v10687_v21 = vsel %vm435_vm1, 0.0, %v423_v16  ;;  %9156 = vmatpush3.bf16.msra.mxu0 %v619_v13  ;;  %v448_v34 = vsel %vm435_vm1, %v423_v16, 0.0  ;;  %v580_v36 = vrot.slane %v446_v28, 1 }
  0x9a   : > { %10499 = vmatprep.subr.msk.bf16.mxu0 %vm478_vm0, %v454_v17  ;;  %v10697_v27 = vpack.c.bf16 %v10687_v21, %v10693_v24  ;;  %v447_v38 = vsel %vm435_vm1, %v422_v14, 0.0  ;;  %v576_v39 = vrot.slane %v10664_v2, 1  ;;  %v577_v40 = vrot.slane %v445_v30, 1 }
  0x9b   : > { %v425_v26 = vrot.slane %v402_v20, 7  ;;  %v602_v41 = vpack.c.bf16 %v10710_v32, %v10701_v29  ;;  %v585_v42 = vrot.slane %v10687_v21, 1  ;;  %v586_v43 = vrot.slane %v448_v34, 1 }
  0x9c   : > { %9151 = vmatprep.mubr.msk.bf16.mxu0 %vm465_vm2, %v10697_v27  ;;  %v582_v44 = vrot.slane %v10693_v24, 1  ;;  %v583_v45 = vrot.slane %v447_v38, 1  ;;  %v10731_v46 = vsel %vm570_vm3, %v579_v35, %v580_v36  ;;  %v10734_v47 = vsel %vm570_vm3, %v576_v39, %v577_v40  ;;  %v456_v35 = vld [vmem:[%s13918_s2 + $0x8] sm:$0x3]  ;;  %v10573_v36 = vpop.permute.xlu1 %10572 }
  0x9d   : > { %v10705_v31 = vsel %vm435_vm1, 0.0, %v425_v26  ;;  %v450_v48 = vsel %vm435_vm1, %v425_v26, 0.0  ;;  %v10738_v49 = vsel %vm570_vm3, %v585_v42, %v586_v43  ;;  %v10742_v50 = vpack.c.bf16 %v10731_v46, %v10734_v47 }
  0x9e   : > { %v10719_v37 = vpack.c.bf16 %v10705_v31, %v10713_v33  ;;  %v449_v51 = vsel %vm435_vm1, %v424_v25, 0.0  ;;  %v743_v52 = vsel %vm478_vm0, %v454_v17, 0  ;;  %v10747_v53 = vsel %vm570_vm3, %v582_v44, %v583_v45 }
  0x9f   : > { %v591_v54 = vrot.slane %v10705_v31, 1  ;;  %v592_v55 = vrot.slane %v450_v48, 1  ;;  %v10752_v56 = vpack.c.bf16 %v10738_v49, %v10747_v53  ;;  %v698_v58 = vrot.slane %v10678_v12, 2 }
  0xa0   : > { %9152 = vmatmul.mubr.msk.bf16.gmra.mrb[4].mxu0 %vm465_vm2, %v10719_v37  ;;  %v697_v59 = vrot.slane %v10668_v5, 2  ;;  %v588_v60 = vrot.slane %v10713_v33, 1  ;;  %v589_v61 = vrot.slane %v449_v51, 1  ;;  %v10766_v63 = vrot.slane %v10586_v9, 2 }
  0xa1   : > { %9157 = vmatprep.mubr.msk.bf16.mxu0 %vm465_vm2, %v602_v41  ;;  %v10769_v0 = vsel %vm570_vm3, %v591_v54, %v592_v55  ;;  %v703_v4 = vrot.slane %v10661_v62, 2  ;;  %v704_v7 = vrot.slane %v446_v28, 2  ;;  %v700_v8 = vrot.slane %v10664_v2, 2 }
  0xa2   : > { %14118 = vst [vmem:[#allocation2_spill] sm:$0xff] %v10766_v63  ;;  %v10772_v1 = vsel %vm694_vm4, %v697_v59, %v698_v58  ;;  %v10775_v3 = vsel %vm570_vm3, %v588_v60, %v589_v61  ;;  %v701_v10 = vrot.slane %v445_v30, 2  ;;  %v709_v12 = vrot.slane %v10687_v21, 2 }
  0xa3   : > { %v10780_v6 = vpack.c.bf16 %v10769_v0, %v10775_v3  ;;  %v726_v13 = vpack.c.bf16 %v10772_v1, %v10766_v63  ;;  %v710_v14 = vrot.slane %v448_v34, 2  ;;  %v706_v15 = vrot.slane %v10693_v24, 2 }
  0xa4   : > { %v707_v16 = vrot.slane %v447_v38, 2  ;;  %v10791_v17 = vsel %vm694_vm4, %v703_v4, %v704_v7  ;;  %v702_v20 = vsel %vm694_vm4, %v700_v8, %v701_v10  ;;  %v835_v25 = vsel %vm478_vm0, %v455_v57, 0  ;;  %v459_v7 = vld [vmem:[%s13918_s2 + $0xe] sm:$0x3]  ;;  %v460_v10 = vld [vmem:[%s13918_s2 + $0x10] sm:$0x3] }
  0xa5   : > { %v10795_v22 = vsel %vm694_vm4, %v709_v12, %v710_v14  ;;  %v10798_v23 = vpack.c.bf16 %v10791_v17, %v702_v20  ;;  %v715_v28 = vrot.slane %v10705_v31, 2  ;;  %v716_v30 = vrot.slane %v450_v48, 2  ;;  %v10918_v14 = vld [vmem:[%s13919_s3] ss:$0 sm:$0xff] }
  0xa6   : > { %v708_v26 = vsel %vm694_vm4, %v706_v15, %v707_v16  ;;  %v712_v38 = vrot.slane %v10713_v33, 2  ;;  %v713_v39 = vrot.slane %v449_v51, 2  ;;  %v10575_v40 = vunpack.i.h.bf16 %v10573_v36 }
  0xa7   : > { %v10804_v34 = vpack.c.bf16 %v10795_v22, %v708_v26  ;;  %v10574_v41 = vunpack.i.l.bf16 %v10573_v36  ;;  %v717_v42 = vsel %vm694_vm4, %v715_v28, %v716_v30  ;;  %v818_v51 = vpack.c.bf16 %v10664_v2, %v10668_v5 }
  0xa8   : > { %9158 = vmatmul.mubr.msk.bf16.vlgmr.msra.gmra.mrb[0].mxu0 %vm465_vm2, %v10742_v50  ;;  %v714_v43 = vsel %vm694_vm4, %v712_v38, %v713_v39  ;;  %v395_v45 = vmax.f32 %v10647_v19, %v10575_v40  ;;  %v819_v54 = vpack.c.bf16 %v10693_v24, %v10661_v62  ;;  %v933_v55 = vsel %vm478_vm0, %v456_v35, 0 }
  0xa9   : > { %9166 = vmatpush3.bf16.msra.mxu0 %v743_v52  ;;  %9161 = vmatprep.mubr.msk.bf16.mxu0 %vm465_vm2, %v10752_v56  ;;  %v10817_v44 = vpack.c.bf16 %v717_v42, %v714_v43  ;;  %v394_v48 = vmax.f32 %v10645_v18, %v10574_v41  ;;  %v820_v19 = vpack.c.bf16 %v10713_v33, %v10687_v21  ;;  %v457_v18 = vld [vmem:[%s13918_s2 + $0xa] sm:$0x3]  ;;  %v1189_v8 = vsel %vm478_vm0, %v459_v7, 0 }
  0xaa   : > { %10500 = vmatprep.subr.msk.bf16.mxu0 %vm478_vm0, %v455_v57  ;;  %v916_v5 = vpack.c.bf16 %v10734_v47, %v10710_v32  ;;  %v917_v24 = vpack.c.bf16 %v10747_v53, %v10731_v46  ;;  %v1029_v33 = vsel %vm478_vm0, %v457_v18, 0  ;;  %v918_v60 = vpack.c.bf16 %v10775_v3, %v10738_v49 }
  0xab   : > { %v403_v52 = vmax.f32 %v394_v48, %v395_v45  ;;  %v1012_v47 = vpack.c.bf16 %v702_v20, %v10772_v1  ;;  %v1013_v49 = vpack.c.bf16 %v708_v26, %v10791_v17  ;;  %v1014_v4 = vpack.c.bf16 %v714_v43, %v10795_v22 }
  0xad   : > { %v426_v57 = vrot.slane %v403_v52, 7 }
  0xaf   : > { %v443_v2 = vsel %vm435_vm1, 0.0, %v426_v57  ;;  %v451_v21 = vsel %vm435_vm1, %v426_v57, 0.0 }
  0xb0   : > { %9162 = vmatmul.mubr.msk.bf16.gmra.mrb[4].mxu0 %vm465_vm2, %v10780_v6  ;;  %v821_v62 = vpack.c.bf16 %v443_v2, %v10705_v31  ;;  %v912_v58 = vrot.slane %v443_v2, 1  ;;  %v913_v59 = vrot.slane %v451_v21, 1  ;;  %v458_v31 = vld [vmem:[%s13918_s2 + $0xc] sm:$0x3]  ;;  %v1008_v61 = vrot.slane %v443_v2, 2 }
  0xb1   : > { %9167 = vmatprep.mubr.msk.bf16.mxu0 %vm465_vm2, %v726_v13  ;;  %v1109_v53 = vsel %vm478_vm0, %v458_v31, 0  ;;  %v1009_v3 = vrot.slane %v451_v21, 2  ;;  %v1104_v13 = vpack.c.bf16 %v10586_v9, %v443_v2 }
  0xb2   : > { %v914_v32 = vsel %vm570_vm3, %v912_v58, %v913_v59 }
  0xb3   : > { %v919_v46 = vpack.c.bf16 %v914_v32, %v10769_v0  ;;  %v1010_v0 = vsel %vm694_vm4, %v1008_v61, %v1009_v3 }
  0xb4   : > { %v1015_v1 = vpack.c.bf16 %v1010_v0, %v717_v42  ;;  %v1264_v9 = vpack.c.bf16 %v10766_v63, %v1010_v0 }
  0xb8   : > { %9168 = vmatmul.mubr.msk.bf16.vlgmr.msra.gmra.mrb[0].mxu0 %vm465_vm2, %v10798_v23 }
  0xb9   : > { %9176 = vmatpush3.bf16.msra.mxu0 %v835_v25  ;;  %9171 = vmatprep.mubr.msk.bf16.mxu0 %vm465_vm2, %v10804_v34 }
  0xba   : > { %10501 = vmatprep.subr.msk.bf16.mxu0 %vm478_vm0, %v456_v35 }
  0xc0   : > { %9172 = vmatmul.mubr.msk.bf16.gmra.mrb[4].mxu0 %vm465_vm2, %v10817_v44 }
  0xc1   : > { %9177 = vmatprep.mubr.msk.bf16.mxu0 %vm465_vm2, %v818_v51 }
  0xc8   : > { %9178 = vmatmul.mubr.msk.bf16.vlgmr.msra.gmra.mrb[0].mxu0 %vm465_vm2, %v819_v54 }
  0xc9   : > { %9186 = vmatpush3.bf16.msra.mxu0 %v933_v55  ;;  %9181 = vmatprep.mubr.msk.bf16.mxu0 %vm465_vm2, %v820_v19 }
  0xca   : > { %10502 = vmatprep.subr.msk.bf16.mxu0 %vm478_vm0, %v457_v18 }
  0xd0   : > { %9182 = vmatmul.mubr.msk.bf16.gmra.mrb[4].mxu0 %vm465_vm2, %v821_v62 }
  0xd1   : > { %9187 = vmatprep.mubr.msk.bf16.mxu0 %vm465_vm2, %v916_v5 }
  0xd8   : > { %9188 = vmatmul.mubr.msk.bf16.vlgmr.msra.gmra.mrb[0].mxu0 %vm465_vm2, %v917_v24 }
  0xd9   : > { %9196 = vmatpush3.bf16.msra.mxu0 %v1029_v33  ;;  %9191 = vmatprep.mubr.msk.bf16.mxu0 %vm465_vm2, %v918_v60  ;;  %v10948_v33 = vld [vmem:[%s13920_s4 + $0x20] sm:$0xf] }
  0xda   : > { %10503 = vmatprep.subr.msk.bf16.mxu0 %vm478_vm0, %v458_v31 }
  0xe0   : > { %9192 = vmatmul.mubr.msk.bf16.gmra.mrb[4].mxu0 %vm465_vm2, %v919_v46 }
  0xe1   : > { %9197 = vmatprep.mubr.msk.bf16.mxu0 %vm465_vm2, %v1012_v47 }
  0xe8   : > { %9198 = vmatmul.mubr.msk.bf16.vlgmr.msra.gmra.mrb[0].mxu0 %vm465_vm2, %v1013_v49 }
  0xe9   : > { %9206 = vmatpush3.bf16.msra.mxu0 %v1109_v53  ;;  %9201 = vmatprep.mubr.msk.bf16.mxu0 %vm465_vm2, %v1014_v4 }
  0xea   : > { %10504 = vmatprep.subr.msk.bf16.mxu0 %vm478_vm0, %v459_v7 }
  0xf0   : > { %9202 = vmatmul.mubr.msk.bf16.gmra.mrb[4].mxu0 %vm465_vm2, %v1015_v1 }
  0xf1   : > { %9207 = vmatprep.mubr.msk.bf16.mxu0 %vm465_vm2, %v10674_v11  ;;  %v1269_v11 = vsel %vm478_vm0, %v460_v10, 0 }
  0xf8   : > { %9208 = vmatmul.mubr.msk.bf16.vlgmr.msra.gmra.mrb[0].mxu0 %vm465_vm2, %v10697_v27  ;;  %v1184_v27 = vpack.c.bf16 %v10701_v29, %v914_v32 }
  0xf9   : > { %9216 = vmatpush3.bf16.msra.mxu0 %v1189_v8  ;;  %9211 = vmatprep.mubr.msk.bf16.mxu0 %vm465_vm2, %v10719_v37  ;;  %v3672_v37 = vld [vmem:[%s13920_s4] sm:$0xf] }
  0xfa   : > { %10505 = vmatprep.subr.msk.bf16.mxu0 %vm478_vm0, %v460_v10 }
 0x100   : > { %9212 = vmatmul.mubr.msk.bf16.gmra.mrb[4].mxu0 %vm465_vm2, %v1104_v13 }
 0x101   : > { %9217 = vmatprep.mubr.msk.bf16.mxu0 %vm465_vm2, %v10742_v50  ;;  %v3747_v50 = vsel %vm3327_vm5, %v3672_v37, 0 }
 0x108   : > { %9218 = vmatmul.mubr.msk.bf16.vlgmr.msra.gmra.mrb[0].mxu0 %vm465_vm2, %v10752_v56  ;;  %v13924_v56 = vmov 0.0|0.0  }
 0x109   : > { %9226 = vmatpush3.bf16.msra.mxu0 %v1269_v11  ;;  %9221 = vmatprep.mubr.msk.bf16.mxu0 %vm465_vm2, %v10780_v6  ;;  %v3679_v6 = vld [vmem:[%s13920_s4 + $0x1c] sm:$0xf] }
 0x10a   : > { %10506 = vmatprep.subr.msk.bf16.mxu0 %vm3327_vm5, %v3672_v37  ;;  %10514 = vmatprep.subr.msk.bf16.mxu1 %vm3327_vm5, %v3679_v6  ;;  %v10912_v12 = vsel %vm3327_vm5, %v3679_v6, 0 }
 0x10b   : > { %14119 = vst [vmem:[#allocation3_spill] sm:$0xff] %v10912_v12  ;;  %9848 = vmatpush3.bf16.msra.mxu1 %v10912_v12 }
 0x10c   : > { %10515 = vmatprep.subr.msk.bf16.mxu1 %vm3327_vm5, %v10948_v33 }
 0x110   : > { %9222 = vmatmul.mubr.msk.bf16.gmra.mrb[4].mxu0 %vm465_vm2, %v1184_v27 }
 0x111   : > { %9227 = vmatprep.mubr.msk.bf16.mxu0 %vm465_vm2, %v10798_v23 }
 0x118   : > { %9228 = vmatmul.mubr.msk.bf16.vlgmr.msra.gmra.mrb[0].mxu0 %vm465_vm2, %v10804_v34 }
 0x119   : > { %9231 = vmatprep.mubr.msk.bf16.mxu0 %vm465_vm2, %v10817_v44  ;;  %9236 = vmatpush3.bf16.msra.mxu0 %v3747_v50 }
 0x120   : > { %9232 = vmatmul.mubr.msk.bf16.gmra.mrb[4].mxu0 %vm465_vm2, %v1264_v9 }
 0x121   : > { %9237 = vmatprep.mubr.bf16.mxu0 %v13924_v56 }
 0x1eb   : > { %v9229_v15 = vpop.f32.mrb[0].mxu0 }
 0x1ec   : > { %v9849_v16 = vadd.f32 %v9229_v15, %v10918_v14  ;;  %v1305_v17 = vpop.f32.mrb[1].mxu0 }
 0x1ed   : > { %v9850_v20 = vadd.f32 %v10918_v14, %v1305_v17  ;;  %v9230_v22 = vpop.f32.mrb[2].mxu0 }
 0x1ee   : > { %v1346_v23 = vmax.f32 %v9849_v16, 0.0  ;;  %v9851_v25 = vadd.f32 %v9230_v22, %v10918_v14  ;;  %v1308_v26 = vpop.f32.mrb[3].mxu0 }
 0x1ef   : > { %v10923_v28 = vmax.f32 %v9850_v20, 0.0  ;;  %v9852_v30 = vadd.f32 %v10918_v14, %v1308_v26 }
 0x1f0   : > { %v1359_v34 = vmul.f32 0.4, %v1346_v23  ;;  %v1362_v35 = vmul.f32 0.8666667, %v1346_v23  ;;  %v1364_v36 = vmul.f32 0.6666666, %v1346_v23 }
 0x1f1   : > { %v10926_v38 = vmax.f32 %v9851_v25, 0.0  ;;  %v1345_v39 = vmax.f32 %v9852_v30, 0.0  ;;  %v1367_v40 = vmul.f32 0.19999999, %v1346_v23  ;;  %v1409_v41 = vmul.f32 0.46666667, %v10923_v28 }
 0x1f2   : > { %v10930_v42 = vmul.f32 0.93333334, %v10923_v28  ;;  %v1352_v45 = vmul.f32 0.5333333, %v10923_v28  ;;  %v1355_v51 = vmul.f32 0.06666666, %v10923_v28 }
 0x1f3   : > { %v1365_v43 = vmul.f32 0.33333334, %v10926_v38  ;;  %v1368_v44 = vmul.f32 0.8, %v10926_v38  ;;  %v1353_v48 = vmul.f32 0.46666667, %v1345_v39 }
 0x1f4   : > { %v1356_v52 = vmul.f32 0.93333334, %v1345_v39  ;;  %v1358_v57 = vmul.f32 0.6, %v1345_v39  ;;  %v1361_v19 = vmul.f32 0.13333333, %v1345_v39 }
 0x1f5   : > { %v10936_v54 = vadd.f32 %v1365_v43, %v1364_v36  ;;  %v10938_v55 = vadd.f32 %v1368_v44, %v1367_v40  ;;  %v9233_v18 = vpop.f32.mrb[4].mxu0  ;;  %v10940_v2 = vadd.f32 %v1353_v48, %v1352_v45  ;;  %v1441_v5 = vrot.slane %v1409_v41, 1 }
 0x1f6   : > { %v10942_v62 = vadd.f32 %v1356_v52, %v1355_v51  ;;  %v1536_v21 = vrot.slane %v10930_v42, 1  ;;  %v1321_v24 = vpop.f32.mrb[5].mxu0  ;;  %v10950_v58 = vadd.f32 %v1359_v34, %v1358_v57  ;;  %v10952_v59 = vadd.f32 %v1362_v35, %v1361_v19 }
 0x1f7   : > { %v1600_v60 = vmul.f32 0.4, %v10923_v28  ;;  %v9234_v31 = vpop.f32.mrb[6].mxu0  ;;  %v1473_v32 = vadd.f32 %v1441_v5, %v1352_v45  ;;  %v1584_v46 = vmul.f32 0.6, %v10923_v28  ;;  %v9853_v43 = vadd.f32 %v9233_v18, %v10918_v14 }
 0x1f8   : > { %v1696_v47 = vmul.f32 0.8666667, %v10923_v28  ;;  %v1324_v49 = vpop.f32.mrb[7].mxu0  ;;  %v1680_v53 = vmul.f32 0.13333333, %v10923_v28  ;;  %v1568_v3 = vadd.f32 %v1536_v21, %v1355_v51  ;;  %v9854_v51 = vadd.f32 %v10918_v14, %v1321_v24 }
 0x1f9   : > { %v10961_v61 = vmul.f32 0.73333335, %v10923_v28  ;;  %v1632_v4 = vrot.slane %v1600_v60, 1  ;;  %v10964_v7 = vmul.f32 0.8, %v10923_v28  ;;  %v2432_v9 = vrot.slane %v1584_v46, 1 }
 0x1fa   : > { %v2144_v0 = vmul.f32 0.2, %v10923_v28  ;;  %v1728_v1 = vrot.slane %v1696_v47, 1  ;;  %v2064_v8 = vmul.f32 0.26666665, %v10923_v28  ;;  %v2670_v37 = vrot.slane %v1473_v32, 7 }
 0x1fb   : > { %v2096_v10 = vrot.slane %v10961_v61, 1  ;;  %v2240_v13 = vmul.f32 0.6666667, %v10923_v28  ;;  %v2320_v27 = vmul.f32 0.13333334, %v10923_v28  ;;  %v1664_v23 = vadd.f32 %v1632_v4, %v1584_v46 }
 0x1fc   : > { %v2176_v11 = vrot.slane %v2144_v0, 1  ;;  %v2224_v6 = vmul.f32 0.3333333, %v10923_v28  ;;  %v2480_v16 = vmul.f32 0.06666667, %v10923_v28  ;;  %v1760_v25 = vadd.f32 %v1728_v1, %v1680_v53 }
 0x1fd   : > { %v2128_v50 = vadd.f32 %v2096_v10, %v2064_v8  ;;  %v2272_v15 = vrot.slane %v2240_v13, 1  ;;  %v2352_v20 = vrot.slane %v2320_v27, 1  ;;  %v2400_v22 = vmul.f32 0.39999998, %v10923_v28 }
 0x1fe   : > { %v2208_v17 = vadd.f32 %v2176_v11, %v10964_v7  ;;  %v2718_v35 = vrot.slane %v1568_v3, 6  ;;  %v2511_v40 = vrot.slane %v2480_v16, 1  ;;  %v3278_v41 = vsel %vm435_vm1, %v10923_v28, %v2670_v37 }
 0x1ff   : > { %v2304_v26 = vadd.f32 %v2272_v15, %v2224_v6  ;;  %v3006_v30 = vrot.slane %v2128_v50, 3  ;;  %v2464_v34 = vadd.f32 %v2432_v9, %v2400_v22  ;;  %v2384_v39 = vadd.f32 %v2352_v20, %v1696_v47 }
 0x200   : > { %v3054_v36 = vrot.slane %v2208_v17, 3  ;;  %v1370_v44 = vmul.f32 0.73333335, %v10926_v38  ;;  %v1373_v45 = vmul.f32 0.26666665, %v10926_v38  ;;  %v2766_v52 = vrot.slane %v1664_v23, 6 }
 0x201   : > { %v3102_v48 = vrot.slane %v2304_v26, 2  ;;  %v2814_v57 = vrot.slane %v1760_v25, 5  ;;  %v10982_v5 = vmax.f32 %v9853_v43, 0.0  ;;  %v3294_v21 = vsel %vm478_vm0, %v3278_v41, %v2718_v35 }
 0x202   : > { %v3393_v19 = vsel %vm435_vm1, %v3006_v30, %v3054_v36  ;;  %v1348_v60 = vmax.f32 %v9854_v51, 0.0  ;;  %v10986_v32 = vadd.f32 %v9234_v31, %v10918_v14  ;;  %v9856_v18 = vadd.f32 %v10918_v14, %v1324_v49 }
 0x203   : > { %v2543_v46 = vadd.f32 %v2511_v40, %v10930_v42  ;;  %v3150_v38 = vrot.slane %v2384_v39, 2  ;;  %v3198_v47 = vrot.slane %v2464_v34, 1  ;;  %v1383_v24 = vmul.f32 0.13333334, %v10982_v5 }
 0x204   : > { %v3409_v53 = vsel %vm478_vm0, %v3393_v19, %v3102_v48  ;;  %v1386_v3 = vmul.f32 0.6, %v10982_v5  ;;  %v1371_v4 = vmul.f32 0.26666668, %v1348_v60  ;;  %v1374_v0 = vmul.f32 0.73333335, %v1348_v60 }
 0x205   : > { %v3311_v1 = vsel %vm3310_vm6, %v3294_v21, %v2766_v52  ;;  %v1376_v8 = vmul.f32 0.8, %v1348_v60  ;;  %v1379_v10 = vmul.f32 0.3333333, %v1348_v60  ;;  %v1349_v31 = vmax.f32 %v9856_v18, 0.0 }
 0x206   : > { %v10994_v13 = vadd.f32 %v1371_v4, %v1370_v44  ;;  %v10996_v14 = vadd.f32 %v1374_v0, %v1373_v45  ;;  %v1776_v42 = vmul.f32 0.6666666, %v10923_v28  ;;  %v1792_v49 = vmul.f32 0.33333334, %v10923_v28 }
 0x207   : > { %v3425_v11 = vsel %vm3310_vm6, %v3409_v53, %v3150_v38  ;;  %v1377_v27 = vmul.f32 0.2, %v1349_v31  ;;  %v1380_v9 = vmul.f32 0.6666667, %v1349_v31  ;;  %v1382_v37 = vmul.f32 0.8666667, %v1349_v31 }
 0x208   : > { %v1385_v50 = vmul.f32 0.39999998, %v1349_v31  ;;  %v1824_v6 = vrot.slane %v1792_v49, 1  ;;  %v1872_v15 = vmul.f32 0.19999999, %v10923_v28  ;;  %v1920_v16 = vrot.slane %v10964_v7, 1 }
 0x209   : > { %v11003_v17 = vadd.f32 %v1377_v27, %v1376_v8  ;;  %v11005_v20 = vadd.f32 %v1380_v9, %v1379_v10  ;;  %v11007_v22 = vadd.f32 %v1383_v24, %v1382_v37  ;;  %v1984_v23 = vmul.f32 0.26666668, %v10923_v28 }
 0x20a   : > { %v11010_v25 = vadd.f32 %v1386_v3, %v1385_v50  ;;  %v1856_v26 = vadd.f32 %v1824_v6, %v1776_v42  ;;  %v1952_v30 = vadd.f32 %v1920_v16, %v1872_v15  ;;  %v3328_v34 = vsel %vm3327_vm5, %v3311_v1, %v2814_v57 }
 0x20b   : > { %v3441_v35 = vsel %vm3327_vm5, %v3425_v11, %v3198_v47  ;;  %v2016_v36 = vrot.slane %v1984_v23, 1  ;;  %v2575_v7 = vmul.f32 0.53333336, %v10923_v28  ;;  %v3246_v39 = vrot.slane %v2543_v46, 1 }
 0x20c   : > { %v2559_v40 = vmul.f32 0.46666664, %v10923_v28  ;;  %v2862_v41 = vrot.slane %v1856_v26, 5  ;;  %v2910_v45 = vrot.slane %v1952_v30, 4  ;;  %v1410_v48 = vmul.f32 0.46666667, %v10940_v2 }
 0x20d   : > { %v2048_v43 = vadd.f32 %v2016_v36, %v10961_v61  ;;  %v2606_v44 = vrot.slane %v2575_v7, 1  ;;  %v3457_v51 = vsel %vm3344_vm7, %v3441_v35, %v3246_v39  ;;  %v11021_v57 = vmul.f32 0.93333334, %v10940_v2 }
 0x20e   : > { %v3345_v52 = vsel %vm3344_vm7, %v3328_v34, %v2862_v41  ;;  %v1601_v19 = vmul.f32 0.4, %v10940_v2  ;;  %v1394_v46 = vmul.f32 0.5333333, %v10940_v2  ;;  %v1489_v61 = vmul.f32 0.06666666, %v10940_v2 }
 0x20f   : > { %v2638_v21 = vadd.f32 %v2606_v44, %v2559_v40  ;;  %v2958_v60 = vrot.slane %v2048_v43, 4  ;;  %v3361_v18 = vsel %vm694_vm4, %v3345_v52, %v2910_v45  ;;  %v1697_v38 = vmul.f32 0.8666667, %v10940_v2 }
 0x210   : > { %v1442_v53 = vrot.slane %v1410_v48, 1  ;;  %v1793_v3 = vmul.f32 0.33333334, %v10940_v2  ;;  %v1537_v1 = vrot.slane %v11021_v57, 1  ;;  %v1633_v8 = vrot.slane %v1601_v19, 1 }
 0x211   : > { %v3377_v47 = vsel %vm570_vm3, %v3361_v18, %v2958_v60  ;;  %v3473_v24 = vsel %vm694_vm4, %v3457_v51, %v2638_v21  ;;  %v1585_v31 = vmul.f32 0.6, %v10940_v2  ;;  %v1889_v42 = vmul.f32 0.8, %v10940_v2 }
 0x212   : > { %v11033_v4 = vsel %vm570_vm3, %v3473_v24, %v10923_v28  ;;  %v3544_v0 = vrot.slane %v3377_v47, 7  ;;  %v1729_v11 = vrot.slane %v1697_v38, 1  ;;  %v1825_v27 = vrot.slane %v1793_v3, 1 }
 0x213   : > { %v13926_v10 = vrot.slane %v11033_v4, 7  ;;  %v1969_v9 = vmul.f32 0.73333335, %v10940_v2  ;;  %v1474_v37 = vadd.f32 %v1442_v53, %v1394_v46  ;;  %v1681_v50 = vmul.f32 0.13333333, %v10940_v2 }
 0x214   : > { %v11040_v49 = vsel %vm435_vm1, 0.0, %v3544_v0  ;;  %v1985_v6 = vmul.f32 0.26666668, %v10940_v2  ;;  %v1569_v16 = vadd.f32 %v1537_v1, %v1489_v61  ;;  %v1665_v23 = vadd.f32 %v1633_v8, %v1585_v31 }
 0x215   : > { %14120 = vst [vmem:[#allocation4_spill] sm:$0xff] %v11040_v49  ;;  %v11046_v28 = vsel %vm435_vm1, %v3544_v0, %v13926_v10  ;;  %v1777_v26 = vmul.f32 0.6666666, %v10940_v2  ;;  %v1873_v30 = vmul.f32 0.19999999, %v10940_v2  ;;  %v1921_v34 = vrot.slane %v1889_v42, 1 }
 0x216   : > { %v11052_v15 = vpack.c.bf16 %v11046_v28, %v11040_v49  ;;  %v2097_v35 = vrot.slane %v1969_v9, 1  ;;  %v2145_v36 = vmul.f32 0.2, %v10940_v2  ;;  %v1761_v7 = vadd.f32 %v1729_v11, %v1681_v50 }
 0x217   : > { %v1857_v39 = vadd.f32 %v1825_v27, %v1777_v26  ;;  %v2241_v40 = vmul.f32 0.6666667, %v10940_v2  ;;  %v2321_v41 = vmul.f32 0.13333334, %v10940_v2  ;;  %v2017_v43 = vrot.slane %v1985_v6, 1 }
 0x218   : > { %14121 = vst [vmem:[#allocation5_spill] sm:$0xff] %v11052_v15  ;;  %9238 = vmatmul.mubr.msk.bf16.vlgmr.msra.gmra.mrb[8].mxu0 %vm3697_vm8, %v11052_v15  ;;  %v2065_v44 = vmul.f32 0.26666665, %v10940_v2  ;;  %v2177_v45 = vrot.slane %v2145_v36, 1  ;;  %v2225_v48 = vmul.f32 0.3333333, %v10940_v2  ;;  %v1953_v60 = vadd.f32 %v1921_v34, %v1873_v30 }
 0x219   : > { %v2273_v51 = vrot.slane %v2241_v40, 1  ;;  %v2353_v52 = vrot.slane %v2321_v41, 1  ;;  %v2433_v19 = vrot.slane %v1585_v31, 1  ;;  %v2481_v21 = vmul.f32 0.06666667, %v10940_v2 }
 0x21a   : > { %v2129_v18 = vadd.f32 %v2097_v35, %v2065_v44  ;;  %v2209_v46 = vadd.f32 %v2177_v45, %v1889_v42  ;;  %v2576_v61 = vmul.f32 0.53333336, %v10940_v2  ;;  %v2401_v24 = vmul.f32 0.39999998, %v10940_v2 }
 0x21b   : > { %v2305_v47 = vadd.f32 %v2273_v51, %v2225_v48  ;;  %v2512_v53 = vrot.slane %v2481_v21, 1  ;;  %v2671_v3 = vrot.slane %v1474_v37, 7  ;;  %v2049_v0 = vadd.f32 %v2017_v43, %v1969_v9 }
 0x21c   : > { %v2385_v1 = vadd.f32 %v2353_v52, %v1697_v38  ;;  %v2719_v8 = vrot.slane %v1569_v16, 6  ;;  %v2465_v11 = vadd.f32 %v2433_v19, %v2401_v24  ;;  %v2560_v27 = vmul.f32 0.46666664, %v10940_v2 }
 0x21d   : > { %v2607_v50 = vrot.slane %v2576_v61, 1  ;;  %v2767_v31 = vrot.slane %v1665_v23, 6  ;;  %v2544_v6 = vadd.f32 %v2512_v53, %v11021_v57  ;;  %v3007_v26 = vrot.slane %v2129_v18, 3 }
 0x21e   : > { %v3055_v30 = vrot.slane %v2209_v46, 3  ;;  %v3103_v42 = vrot.slane %v2305_v47, 2  ;;  %v2815_v34 = vrot.slane %v1761_v7, 5  ;;  %v2863_v35 = vrot.slane %v1857_v39, 5 }
 0x21f   : > { %v2911_v36 = vrot.slane %v1953_v60, 4  ;;  %v3279_v40 = vsel %vm435_vm1, %v10940_v2, %v2671_v3  ;;  %v2959_v37 = vrot.slane %v2049_v0, 4  ;;  %v3151_v9 = vrot.slane %v2385_v1, 2 }
 0x220   : > { %v3295_v38 = vsel %vm478_vm0, %v3279_v40, %v2719_v8  ;;  %v3394_v16 = vsel %vm435_vm1, %v3007_v26, %v3055_v30  ;;  %v3199_v41 = vrot.slane %v2465_v11, 1  ;;  %v1411_v43 = vmul.f32 0.46666667, %v10942_v62 }
 0x221   : > { %v3312_v23 = vsel %vm3310_vm6, %v3295_v38, %v2767_v31  ;;  %v3410_v57 = vsel %vm478_vm0, %v3394_v16, %v3103_v42  ;;  %v3247_v44 = vrot.slane %v2544_v6, 1  ;;  %v11078_v45 = vmul.f32 0.93333334, %v10942_v62 }
 0x222   : > { %v3329_v7 = vsel %vm3327_vm5, %v3312_v23, %v2815_v34  ;;  %v3426_v39 = vsel %vm3310_vm6, %v3410_v57, %v3151_v9  ;;  %v2639_v48 = vadd.f32 %v2607_v50, %v2560_v27  ;;  %v1602_v19 = vmul.f32 0.4, %v10942_v62 }
 0x223   : > { %v3346_v51 = vsel %vm3344_vm7, %v3329_v7, %v2863_v35  ;;  %v3442_v52 = vsel %vm3327_vm5, %v3426_v39, %v3199_v41  ;;  %v1395_v61 = vmul.f32 0.5333333, %v10942_v62  ;;  %v1443_v47 = vrot.slane %v1411_v43, 1 }
 0x224   : > { %v3362_v21 = vsel %vm694_vm4, %v3346_v51, %v2911_v36  ;;  %v3458_v60 = vsel %vm3344_vm7, %v3442_v52, %v3247_v44  ;;  %v1538_v3 = vrot.slane %v11078_v45, 1  ;;  %v1698_v0 = vmul.f32 0.8666667, %v10942_v62 }
 0x225   : > { %v3378_v18 = vsel %vm570_vm3, %v3362_v21, %v2959_v37  ;;  %v3474_v46 = vsel %vm694_vm4, %v3458_v60, %v2639_v48  ;;  %v1490_v8 = vmul.f32 0.06666666, %v10942_v62  ;;  %v1634_v11 = vrot.slane %v1602_v19, 1 }
 0x226   : > { %v11090_v24 = vsel %vm570_vm3, %v3474_v46, %v10940_v2  ;;  %v3547_v53 = vrot.slane %v3378_v18, 7  ;;  %v1794_v27 = vmul.f32 0.33333334, %v10942_v62  ;;  %v1890_v31 = vmul.f32 0.8, %v10942_v62 }
 0x227   : > { %v13927_v1 = vrot.slane %v11090_v24, 7  ;;  %v1970_v2 = vmul.f32 0.73333335, %v10942_v62  ;;  %v1586_v26 = vmul.f32 0.6, %v10942_v62  ;;  %v1730_v30 = vrot.slane %v1698_v0, 1 }
 0x228   : > { %v11098_v50 = vsel %vm435_vm1, 0.0, %v3547_v53  ;;  %v1475_v34 = vadd.f32 %v1443_v47, %v1395_v61  ;;  %v1570_v35 = vadd.f32 %v1538_v3, %v1490_v8  ;;  %v1682_v36 = vmul.f32 0.13333333, %v10942_v62 }
 0x229   : > { %14122 = vst [vmem:[#allocation6_spill] sm:$0xff] %v11098_v50  ;;  %v11105_v6 = vsel %vm435_vm1, %v3547_v53, %v13927_v1  ;;  %v1666_v40 = vadd.f32 %v1634_v11, %v1586_v26  ;;  %v1778_v37 = vmul.f32 0.6666666, %v10942_v62  ;;  %v1874_v9 = vmul.f32 0.19999999, %v10942_v62 }
 0x22a   : > { %v11110_v42 = vpack.c.bf16 %v11105_v6, %v11098_v50  ;;  %v1986_v38 = vmul.f32 0.26666668, %v10942_v62  ;;  %v1826_v16 = vrot.slane %v1794_v27, 1  ;;  %v1922_v41 = vrot.slane %v1890_v31, 1 }
 0x22b   : > { %v2098_v23 = vrot.slane %v1970_v2, 1  ;;  %v2146_v57 = vmul.f32 0.2, %v10942_v62  ;;  %v1762_v43 = vadd.f32 %v1730_v30, %v1682_v36  ;;  %v2066_v44 = vmul.f32 0.26666665, %v10942_v62 }
 0x22c   : > { %14123 = vst [vmem:[#allocation7_spill] sm:$0xff] %v11110_v42  ;;  %9241 = vmatprep.mubr.msk.bf16.mxu0 %vm3697_vm8, %v11110_v42  ;;  %v2242_v7 = vmul.f32 0.6666667, %v10942_v62  ;;  %v2322_v39 = vmul.f32 0.13333334, %v10942_v62  ;;  %v2018_v48 = vrot.slane %v1986_v38, 1  ;;  %v1858_v61 = vadd.f32 %v1826_v16, %v1778_v37 }
 0x22d   : > { %v2178_v51 = vrot.slane %v2146_v57, 1  ;;  %v2226_v52 = vmul.f32 0.3333333, %v10942_v62  ;;  %v2482_v19 = vmul.f32 0.06666667, %v10942_v62  ;;  %v2130_v21 = vadd.f32 %v2098_v23, %v2066_v44 }
 0x22e   : > { %v2274_v60 = vrot.slane %v2242_v7, 1  ;;  %v2354_v18 = vrot.slane %v2322_v39, 1  ;;  %v2434_v46 = vrot.slane %v1586_v26, 1  ;;  %v2577_v3 = vmul.f32 0.53333336, %v10942_v62 }
 0x22f   : > { %v2210_v47 = vadd.f32 %v2178_v51, %v1890_v31  ;;  %v2513_v53 = vrot.slane %v2482_v19, 1  ;;  %v1954_v8 = vadd.f32 %v1922_v41, %v1874_v9  ;;  %v2402_v27 = vmul.f32 0.39999998, %v10942_v62 }
 0x230   : > { %v2306_v11 = vadd.f32 %v2274_v60, %v2226_v52  ;;  %v2672_v30 = vrot.slane %v1475_v34, 7  ;;  %v11127_v36 = vmul.f32 0.93333334, %v10982_v5  ;;  %v2050_v38 = vadd.f32 %v2018_v48, %v1970_v2 }
 0x231   : > { %v2386_v57 = vadd.f32 %v2354_v18, %v1698_v0  ;;  %v2720_v56 = vrot.slane %v1570_v35, 6  ;;  %v2466_v23 = vadd.f32 %v2434_v46, %v2402_v27  ;;  %v2545_v44 = vadd.f32 %v2513_v53, %v11078_v45 }
 0x232   : > { %v2561_v26 = vmul.f32 0.46666664, %v10942_v62  ;;  %v3008_v31 = vrot.slane %v2130_v21, 3  ;;  %v2608_v37 = vrot.slane %v2577_v3, 1  ;;  %v2768_v16 = vrot.slane %v1666_v40, 6 }
 0x233   : > { %v3056_v7 = vrot.slane %v2210_v47, 3  ;;  %v3104_v9 = vrot.slane %v2306_v11, 2  ;;  %v2816_v41 = vrot.slane %v1762_v43, 5  ;;  %v2864_v39 = vrot.slane %v1858_v61, 5 }
 0x234   : > { %v2912_v51 = vrot.slane %v1954_v8, 4  ;;  %v3280_v34 = vsel %vm435_vm1, %v10942_v62, %v2672_v30  ;;  %v2960_v52 = vrot.slane %v2050_v38, 4  ;;  %v3152_v2 = vrot.slane %v2386_v57, 2 }
 0x235   : > { %v3296_v0 = vsel %vm478_vm0, %v3280_v34, %v2720_v56  ;;  %v3395_v35 = vsel %vm435_vm1, %v3008_v31, %v3056_v7  ;;  %v3200_v45 = vrot.slane %v2466_v23, 1  ;;  %v1412_v40 = vmul.f32 0.46666667, %v10950_v58 }
 0x236   : > { %v3313_v48 = vsel %vm3310_vm6, %v3296_v0, %v2768_v16  ;;  %v3411_v19 = vsel %vm478_vm0, %v3395_v35, %v3104_v9  ;;  %v3248_v21 = vrot.slane %v2545_v44, 1  ;;  %v11141_v18 = vmul.f32 0.93333334, %v10950_v58 }
 0x237   : > { %v3330_v43 = vsel %vm3327_vm5, %v3313_v48, %v2816_v41  ;;  %v3427_v60 = vsel %vm3310_vm6, %v3411_v19, %v3152_v2  ;;  %v2640_v46 = vadd.f32 %v2608_v37, %v2561_v26  ;;  %v1603_v47 = vmul.f32 0.4, %v10950_v58 }
 0x238   : > { %v3347_v56 = vsel %vm3344_vm7, %v3330_v43, %v2864_v39  ;;  %v3443_v61 = vsel %vm3327_vm5, %v3427_v60, %v3200_v45  ;;  %v11147_v53 = vmul.f32 0.46666664, %v10982_v5  ;;  %v11150_v3 = vmax.f32 %v10986_v32, 0.0 }
 0x239   : > { %v3363_v8 = vsel %vm694_vm4, %v3347_v56, %v2912_v51  ;;  %v3459_v11 = vsel %vm3344_vm7, %v3443_v61, %v3248_v21  ;;  %v1444_v38 = vrot.slane %v1412_v40, 1  ;;  %v1699_v57 = vmul.f32 0.8666667, %v10950_v58 }
 0x23a   : > { %v3379_v27 = vsel %vm570_vm3, %v3363_v8, %v2960_v52  ;;  %v3475_v30 = vsel %vm694_vm4, %v3459_v11, %v2640_v46  ;;  %v1396_v44 = vmul.f32 0.5333333, %v10950_v58  ;;  %v1539_v32 = vrot.slane %v11141_v18, 1 }
 0x23b   : > { %v11159_v23 = vsel %vm570_vm3, %v3475_v30, %v10942_v62  ;;  %v3550_v5 = vrot.slane %v3379_v27, 7  ;;  %v1491_v31 = vmul.f32 0.06666666, %v10950_v58  ;;  %v1635_v37 = vrot.slane %v1603_v47, 1 }
 0x23c   : > { %v13928_v26 = vrot.slane %v11159_v23, 7  ;;  %v1795_v16 = vmul.f32 0.33333334, %v10950_v58  ;;  %v1587_v9 = vmul.f32 0.6, %v10950_v58  ;;  %v1731_v41 = vrot.slane %v1699_v57, 1 }
 0x23d   : > { %v11167_v7 = vsel %vm435_vm1, 0.0, %v3550_v5  ;;  %v1971_v62 = vmul.f32 0.73333335, %v10950_v58  ;;  %v1476_v51 = vadd.f32 %v1444_v38, %v1396_v44  ;;  %v1891_v34 = vmul.f32 0.8, %v10950_v58 }
 0x23e   : > { %14124 = vst [vmem:[#allocation8_spill] sm:$0xff] %v11167_v7  ;;  %v11174_v39 = vsel %vm435_vm1, %v3550_v5, %v13928_v26  ;;  %v11179_v52 = vsel %vm3327_vm5, %v10948_v33, 0  ;;  %v1571_v0 = vadd.f32 %v1539_v32, %v1491_v31  ;;  %v1683_v35 = vmul.f32 0.13333333, %v10950_v58 }
 0x23f   : > { %v11183_v2 = vpack.c.bf16 %v11174_v39, %v11167_v7  ;;  %v1779_v45 = vmul.f32 0.6666666, %v10950_v58  ;;  %v1667_v48 = vadd.f32 %v1635_v37, %v1587_v9  ;;  %v1827_v19 = vrot.slane %v1795_v16, 1 }
 0x240   : > { %v1875_v40 = vmul.f32 0.19999999, %v10950_v58  ;;  %v1987_v21 = vmul.f32 0.26666668, %v10950_v58  ;;  %v1763_v33 = vadd.f32 %v1731_v41, %v1683_v35  ;;  %v2099_v43 = vrot.slane %v1971_v62, 1 }
 0x241   : > { %14125 = vst [vmem:[#allocation9_spill] sm:$0xff] %v11183_v2  ;;  %9242 = vmatmul.mubr.msk.bf16.gmra.mrb[12].mxu0 %vm3697_vm8, %v11183_v2  ;;  %v2147_v60 = vmul.f32 0.2, %v10950_v58  ;;  %v2435_v46 = vrot.slane %v1587_v9, 1  ;;  %v1923_v56 = vrot.slane %v1891_v34, 1  ;;  %v2673_v8 = vrot.slane %v1476_v51, 7 }
 0x242   : > { %v2019_v61 = vrot.slane %v1987_v21, 1  ;;  %v2067_v47 = vmul.f32 0.26666665, %v10950_v58  ;;  %v1859_v11 = vadd.f32 %v1827_v19, %v1779_v45  ;;  %v2243_v30 = vmul.f32 0.6666667, %v10950_v58 }
 0x243   : > { %v2179_v27 = vrot.slane %v2147_v60, 1  ;;  %v2323_v38 = vmul.f32 0.13333334, %v10950_v58  ;;  %v2227_v44 = vmul.f32 0.3333333, %v10950_v58  ;;  %v1955_v35 = vadd.f32 %v1923_v56, %v1875_v40 }
 0x244   : > { %v2131_v5 = vadd.f32 %v2099_v43, %v2067_v47  ;;  %v2403_v32 = vmul.f32 0.39999998, %v10950_v58  ;;  %v2483_v31 = vmul.f32 0.06666667, %v10950_v58  ;;  %v2275_v16 = vrot.slane %v2243_v30, 1 }
 0x245   : > { %v2211_v37 = vadd.f32 %v2179_v27, %v1891_v34  ;;  %v2355_v9 = vrot.slane %v2323_v38, 1  ;;  %v2578_v41 = vmul.f32 0.53333336, %v10950_v58  ;;  %v2051_v51 = vadd.f32 %v2019_v61, %v1971_v62 }
 0x246   : > { %v2467_v45 = vadd.f32 %v2435_v46, %v2403_v32  ;;  %v2514_v19 = vrot.slane %v2483_v31, 1  ;;  %v2307_v21 = vadd.f32 %v2275_v16, %v2227_v44  ;;  %v2562_v10 = vmul.f32 0.46666664, %v10950_v58 }
 0x247   : > { %v2387_v60 = vadd.f32 %v2355_v9, %v1699_v57  ;;  %v2721_v43 = vrot.slane %v1571_v0, 6  ;;  %v2609_v1 = vrot.slane %v2578_v41, 1  ;;  %v2769_v26 = vrot.slane %v1667_v48, 6 }
 0x248   : > { %v2546_v47 = vadd.f32 %v2514_v19, %v11141_v18  ;;  %v2817_v12 = vrot.slane %v1763_v33, 5  ;;  %v2865_v2 = vrot.slane %v1859_v11, 5  ;;  %v3009_v34 = vrot.slane %v2131_v5, 3 }
 0x249   : > { %v3057_v27 = vrot.slane %v2211_v37, 3  ;;  %v3105_v30 = vrot.slane %v2307_v21, 2  ;;  %v2913_v38 = vrot.slane %v1955_v35, 4  ;;  %v3153_v42 = vrot.slane %v2387_v60, 2 }
 0x24a   : > { %v3201_v40 = vrot.slane %v2467_v45, 1  ;;  %v3281_v62 = vsel %vm435_vm1, %v10950_v58, %v2673_v8  ;;  %v11206_v0 = vmul.f32 0.06666667, %v11150_v3  ;;  %v11209_v18 = vmul.f32 0.53333336, %v11150_v3 }
 0x24b   : > { %v3297_v57 = vsel %vm478_vm0, %v3281_v62, %v2721_v43  ;;  %v3396_v46 = vsel %vm435_vm1, %v3009_v34, %v3057_v27  ;;  %v3249_v48 = vrot.slane %v2546_v47, 1  ;;  %v1424_v61 = vmul.f32 0.46666667, %v11150_v3 }
 0x24c   : > { %v3314_v33 = vsel %vm3310_vm6, %v3297_v57, %v2769_v26  ;;  %v3412_v56 = vsel %vm478_vm0, %v3396_v46, %v3105_v30  ;;  %v11218_v5 = vadd.f32 %v11206_v0, %v11127_v36  ;;  %v11222_v44 = vadd.f32 %v11209_v18, %v11147_v53 }
 0x24d   : > { %v3331_v11 = vsel %vm3327_vm5, %v3314_v33, %v2817_v12  ;;  %v3428_v8 = vsel %vm3310_vm6, %v3412_v56, %v3153_v42  ;;  %v2641_v32 = vadd.f32 %v2609_v1, %v2562_v10  ;;  %v2961_v31 = vrot.slane %v2051_v51, 4 }
 0x24e   : > { %v3348_v26 = vsel %vm3344_vm7, %v3331_v11, %v2865_v2  ;;  %v3444_v37 = vsel %vm3327_vm5, %v3428_v8, %v3201_v40  ;;  %v1519_v9 = vmul.f32 0.93333334, %v11150_v3  ;;  %v1456_v53 = vrot.slane %v1424_v61, 1 }
 0x24f   : > { %v3364_v12 = vsel %vm694_vm4, %v3348_v26, %v2913_v38  ;;  %v3460_v42 = vsel %vm3344_vm7, %v3444_v37, %v3249_v48  ;;  %v1615_v10 = vmul.f32 0.4, %v11150_v3  ;;  %v1408_v21 = vmul.f32 0.5333333, %v11150_v3 }
 0x250   : > { %v3380_v36 = vsel %vm570_vm3, %v3364_v12, %v2961_v31  ;;  %v3476_v41 = vsel %vm694_vm4, %v3460_v42, %v2641_v32  ;;  %v1551_v51 = vrot.slane %v1519_v9, 1  ;;  %v1711_v60 = vmul.f32 0.8666667, %v11150_v3 }
 0x251   : > { %v11236_v2 = vsel %vm570_vm3, %v3476_v41, %v10950_v58  ;;  %v3553_v35 = vrot.slane %v3380_v36, 7  ;;  %v1503_v47 = vmul.f32 0.06666666, %v11150_v3  ;;  %v1647_v34 = vrot.slane %v1615_v10, 1 }
 0x252   : > { %v13934_v19 = vrot.slane %v11236_v2, 7  ;;  %v1807_v27 = vmul.f32 0.33333334, %v11150_v3  ;;  %v14127_v58 = vrot.slane %v11159_v23, 7  ;;  %v1488_v40 = vadd.f32 %v1456_v53, %v1408_v21 }
 0x253   : > { %v11243_v43 = vsel %vm435_vm1, 0.0, %v3553_v35  ;;  %v1599_v62 = vmul.f32 0.6, %v11150_v3  ;;  %v1583_v46 = vadd.f32 %v1551_v51, %v1503_v47  ;;  %v1695_v48 = vmul.f32 0.13333333, %v11150_v3 }
 0x254   : > { %14126 = vst [vmem:[#allocation10_spill] sm:$0xff] %v11243_v43  ;;  %v11250_v30 = vsel %vm435_vm1, %v14127_v58, 0.0  ;;  %v11255_v38 = vsel %vm435_vm1, %v3553_v35, %v13934_v19  ;;  %v1791_v23 = vmul.f32 0.6666666, %v11150_v3  ;;  %v1743_v33 = vrot.slane %v1711_v60, 1 }
 0x255   : > { %14128 = vst [vmem:[#allocation11_spill] sm:$0xff] %v11250_v30  ;;  %14129 = vst [vmem:[#allocation12_spill] sm:$0xff] %v11255_v38  ;;  %v11260_v57 = vpack.c.bf16 %v11255_v38, %v11243_v43  ;;  %v1839_v56 = vrot.slane %v1807_v27, 1  ;;  %v1903_v61 = vmul.f32 0.8, %v11150_v3  ;;  %v1679_v8 = vadd.f32 %v1647_v34, %v1599_v62 }
 0x256   : > { %v1983_v11 = vmul.f32 0.73333335, %v11150_v3  ;;  %v1887_v32 = vmul.f32 0.19999999, %v11150_v3  ;;  %v1999_v31 = vmul.f32 0.26666668, %v11150_v3  ;;  %v1775_v51 = vadd.f32 %v1743_v33, %v1695_v48 }
 0x257   : > { %14130 = vst [vmem:[#allocation13_spill] sm:$0xff] %v11260_v57  ;;  %9245 = vmatprep.mubr.msk.bf16.mxu0 %vm3697_vm8, %v11260_v57  ;;  %v2159_v26 = vmul.f32 0.2, %v11150_v3  ;;  %v1935_v37 = vrot.slane %v1903_v61, 1  ;;  %v2079_v12 = vmul.f32 0.26666665, %v11150_v3  ;;  %v1871_v21 = vadd.f32 %v1839_v56, %v1791_v23 }
 0x258   : > { %v2111_v42 = vrot.slane %v1983_v11, 1  ;;  %v2447_v36 = vrot.slane %v1599_v62, 1  ;;  %v2031_v41 = vrot.slane %v1999_v31, 1  ;;  %v2255_v10 = vmul.f32 0.6666667, %v11150_v3 }
 0x259   : > { %v2191_v53 = vrot.slane %v2159_v26, 1  ;;  %v2335_v35 = vmul.f32 0.13333334, %v11150_v3  ;;  %v2239_v47 = vmul.f32 0.3333333, %v11150_v3  ;;  %v2526_v34 = vrot.slane %v11206_v0, 1 }
 0x25a   : > { %v2143_v27 = vadd.f32 %v2111_v42, %v2079_v12  ;;  %v2287_v16 = vrot.slane %v2255_v10, 1  ;;  %v1967_v1 = vadd.f32 %v1935_v37, %v1887_v32  ;;  %v2415_v45 = vmul.f32 0.39999998, %v11150_v3 }
 0x25b   : > { %v2223_v58 = vadd.f32 %v2191_v53, %v1903_v61  ;;  %v2367_v19 = vrot.slane %v2335_v35, 1  ;;  %v2574_v62 = vmul.f32 0.46666664, %v11150_v3  ;;  %v2621_v31 = vrot.slane %v11209_v18, 1 }
 0x25c   : > { %v2063_v26 = vadd.f32 %v2031_v41, %v1983_v11  ;;  %v2319_v57 = vadd.f32 %v2287_v16, %v2239_v47  ;;  %v2685_v48 = vrot.slane %v1488_v40, 7  ;;  %v2479_v23 = vadd.f32 %v2447_v36, %v2415_v45 }
 0x25d   : > { %v2399_v15 = vadd.f32 %v2367_v19, %v1711_v60  ;;  %v2558_v33 = vadd.f32 %v2526_v34, %v1519_v9  ;;  %v2653_v56 = vadd.f32 %v2621_v31, %v2574_v62  ;;  %v2733_v63 = vrot.slane %v1583_v46, 6 }
 0x25e   : > { %v2781_v0 = vrot.slane %v1679_v8, 6  ;;  %v2829_v12 = vrot.slane %v1775_v51, 5  ;;  %v3021_v61 = vrot.slane %v2143_v27, 3  ;;  %v3069_v42 = vrot.slane %v2223_v58, 3 }
 0x25f   : > { %v2877_v53 = vrot.slane %v1871_v21, 5  ;;  %v2925_v32 = vrot.slane %v1967_v1, 4  ;;  %v3117_v37 = vrot.slane %v2319_v57, 2  ;;  %v3165_v10 = vrot.slane %v2399_v15, 2 }
 0x260   : > { %v3293_v35 = vsel %vm435_vm1, %v11150_v3, %v2685_v48  ;;  %v3408_v18 = vsel %vm435_vm1, %v3021_v61, %v3069_v42  ;;  %v14131_v16 = vrot.slane %v11090_v24, 7  ;;  %v14133_v9 = vrot.slane %v11105_v6, 2 }
 0x261   : > { %v14134_v19 = vrot.slane %v11098_v50, 2  ;;  %v3213_v40 = vrot.slane %v2479_v23, 1  ;;  %v3309_v1 = vsel %vm478_vm0, %v3293_v35, %v2733_v63  ;;  %v3424_v15 = vsel %vm478_vm0, %v3408_v18, %v3117_v37 }
 0x262   : > { %v11285_v45 = vsel %vm435_vm1, %v14131_v16, 0.0  ;;  %v3261_v46 = vrot.slane %v2558_v33, 1  ;;  %v3326_v11 = vsel %vm3310_vm6, %v3309_v1, %v2781_v0  ;;  %v3440_v24 = vsel %vm3310_vm6, %v3424_v15, %v3165_v10 }
 0x263   : > { %14132 = vst [vmem:[#allocation14_spill] sm:$0xff] %v11285_v45  ;;  %v4344_v60 = vsel %vm694_vm4, %v14134_v19, %v14133_v9  ;;  %v4345_v57 = vrot.slane %v11285_v45, 2  ;;  %v1413_v8 = vmul.f32 0.46666667, %v10952_v59  ;;  %v3343_v36 = vsel %vm3327_vm5, %v3326_v11, %v2829_v12 }
 0x264   : > { %v3456_v41 = vsel %vm3327_vm5, %v3440_v24, %v3213_v40  ;;  %v14135_v51 = vmov %v14133_v9  ;;  %v11304_v63 = vmul.f32 0.93333334, %v10952_v59  ;;  %v2973_v47 = vrot.slane %v2063_v26, 4 }
 0x265   : > { %v4346_v21 = vsel %vm694_vm4, %v14135_v51, %v4345_v57  ;;  %v3360_v34 = vsel %vm3344_vm7, %v3343_v36, %v2877_v53  ;;  %v3472_v27 = vsel %vm3344_vm7, %v3456_v41, %v3261_v46  ;;  %v1397_v26 = vmul.f32 0.5333333, %v10952_v59 }
 0x266   : > { %v11308_v58 = vpack.c.bf16 %v4346_v21, %v4344_v60  ;;  %v3376_v48 = vsel %vm694_vm4, %v3360_v34, %v2925_v32  ;;  %v3488_v23 = vsel %vm694_vm4, %v3472_v27, %v2653_v56  ;;  %v1604_v12 = vmul.f32 0.4, %v10952_v59  ;;  %v11354_v34 = vld [vmem:[%s13921_s5] sm:$0x3] }
 0x267   : > { %v3392_v33 = vsel %vm570_vm3, %v3376_v48, %v2973_v47  ;;  %v3504_v0 = vsel %vm570_vm3, %v3488_v23, %v11150_v3  ;;  %v1445_v53 = vrot.slane %v1413_v8, 1  ;;  %v1540_v37 = vrot.slane %v11304_v63, 1 }
 0x268   : > { %14136 = vst [vmem:[#allocation15_spill] sm:$0xff] %v11308_v58  ;;  %v3589_v61 = vrot.slane %v3392_v33, 7  ;;  %v3590_v42 = vrot.slane %v3504_v0, 7  ;;  %v11322_v10 = vpack.c.bf16 %v10701_v29, %v10701_v29  ;;  %v1492_v56 = vmul.f32 0.06666666, %v10952_v59 }
 0x269   : > { %v1588_v32 = vmul.f32 0.6, %v10952_v59  ;;  %v1700_v35 = vmul.f32 0.8666667, %v10952_v59  ;;  %v1636_v9 = vrot.slane %v1604_v12, 1  ;;  %v1477_v15 = vadd.f32 %v1445_v53, %v1397_v26 }
 0x26a   : > { %14137 = vst [vmem:[#allocation16_spill] sm:$0xff] %v11322_v10  ;;  %v11328_v3 = vsel %vm435_vm1, %v3589_v61, %v3590_v42  ;;  %v11331_v18 = vsel %vm435_vm1, 0.0, %v3589_v61  ;;  %v11334_v16 = vsel %vm435_vm1, %v3590_v42, 0.0  ;;  %v1796_v40 = vmul.f32 0.33333334, %v10952_v59 }
 0x26b   : > { %14138 = vst [vmem:[#allocation17_spill] sm:$0xff] %v11328_v3  ;;  %14139 = vst [vmem:[#allocation18_spill] sm:$0xff] %v11331_v18  ;;  %v4904_v19 = vrot.slane %v11331_v18, 1  ;;  %v4905_v29 = vrot.slane %v11328_v3, 1  ;;  %v4907_v60 = vrot.slane %v11334_v16, 1  ;;  %v11341_v57 = vadd.f32 %v1540_v37, %v1492_v56 }
 0x26c   : > { %v1732_v46 = vrot.slane %v1700_v35, 1  ;;  %v1684_v8 = vmul.f32 0.13333333, %v10952_v59  ;;  %v1780_v36 = vmul.f32 0.6666666, %v10952_v59  ;;  %v2436_v47 = vrot.slane %v1588_v32, 1 }
 0x26d   : > { %v4906_v11 = vsel %vm570_vm3, %v4904_v19, %v4905_v29  ;;  %v4908_v24 = vsel %vm570_vm3, %v4905_v29, %v4907_v60  ;;  %v1892_v51 = vmul.f32 0.8, %v10952_v59  ;;  %v1972_v21 = vmul.f32 0.73333335, %v10952_v59 }
 0x26e   : > { %v11347_v41 = vpack.c.bf16 %v4908_v24, %v4906_v11  ;;  %v1668_v27 = vadd.f32 %v1636_v9, %v1588_v32  ;;  %v1828_v48 = vrot.slane %v1796_v40, 1  ;;  %v1988_v23 = vmul.f32 0.26666668, %v10952_v59 }
 0x26f   : > { %v2148_v33 = vmul.f32 0.2, %v10952_v59  ;;  %v1764_v0 = vadd.f32 %v1732_v46, %v1684_v8  ;;  %v1876_v26 = vmul.f32 0.19999999, %v10952_v59  ;;  %v2100_v12 = vrot.slane %v1972_v21, 1 }
 0x270   : > { %14140 = vst [vmem:[#allocation19_spill] sm:$0xff] %v11347_v41  ;;  %9503 = vmatprep.mubr.msk.bf16.mxu1 %vm3697_vm8, %v11347_v41  ;;  %v2244_v61 = vmul.f32 0.6666667, %v10952_v59  ;;  %v1924_v42 = vrot.slane %v1892_v51, 1  ;;  %v2068_v53 = vmul.f32 0.26666665, %v10952_v59  ;;  %v1860_v60 = vadd.f32 %v1828_v48, %v1780_v36 }
 0x271   : > { %9504 = vmatmul.mubr.msk.bf16.vlgmr.msra.gmra.mrb[0].mxu1 %vm3697_vm8, %v11322_v10  ;;  %v2180_v37 = vrot.slane %v2148_v33, 1  ;;  %v2324_v56 = vmul.f32 0.13333334, %v10952_v59  ;;  %v2020_v32 = vrot.slane %v1988_v23, 1  ;;  %v2228_v9 = vmul.f32 0.3333333, %v10952_v59 }
 0x272   : > { %9508 = vmatpush3.bf16.msra.mxu1 %v11179_v52  ;;  %9509 = vmatprep.mubr.msk.bf16.mxu1 %vm3697_vm8, %v11308_v58  ;;  %v2276_v19 = vrot.slane %v2244_v61, 1  ;;  %v2484_v29 = vmul.f32 0.06666667, %v10952_v59  ;;  %v2132_v40 = vadd.f32 %v2100_v12, %v2068_v53  ;;  %v2404_v8 = vmul.f32 0.39999998, %v10952_v59 }
 0x273   : > { %v2212_v46 = vadd.f32 %v2180_v37, %v1892_v51  ;;  %v2356_v11 = vrot.slane %v2324_v56, 1  ;;  %10516 = vmatprep.subr.msk.bf16.mxu1 %vm478_vm0, %v11354_v34  ;;  %v2579_v33 = vmul.f32 0.53333336, %v10952_v59  ;;  %v1956_v1 = vadd.f32 %v1924_v42, %v1876_v26 }
 0x274   : > { %v2308_v24 = vadd.f32 %v2276_v19, %v2228_v9  ;;  %v2515_v52 = vrot.slane %v2484_v29, 1  ;;  %v2674_v61 = vrot.slane %v1477_v15, 7  ;;  %v2052_v31 = vadd.f32 %v2020_v32, %v1972_v21 }
 0x275   : > { %v2388_v62 = vadd.f32 %v2356_v11, %v1700_v35  ;;  %v2468_v41 = vadd.f32 %v2436_v47, %v2404_v8  ;;  %v2563_v36 = vmul.f32 0.46666664, %v10952_v59  ;;  %v2722_v51 = vrot.slane %v11341_v57, 6 }
 0x276   : > { %v2547_v48 = vadd.f32 %v2515_v52, %v11304_v63  ;;  %v2770_v12 = vrot.slane %v1668_v27, 6  ;;  %v3010_v53 = vrot.slane %v2132_v40, 3  ;;  %v3058_v37 = vrot.slane %v2212_v46, 3 }
 0x277   : > { %v2610_v56 = vrot.slane %v2579_v33, 1  ;;  %v2818_v9 = vrot.slane %v1764_v0, 5  ;;  %v2866_v19 = vrot.slane %v1860_v60, 5  ;;  %v3106_v29 = vrot.slane %v2308_v24, 2 }
 0x278   : > { %v2914_v58 = vrot.slane %v1956_v1, 4  ;;  %v3154_v23 = vrot.slane %v2388_v62, 2  ;;  %v3282_v35 = vsel %vm435_vm1, %v10952_v59, %v2674_v61  ;;  %v3397_v15 = vsel %vm435_vm1, %v3010_v53, %v3058_v37 }
 0x279   : > { %v3202_v21 = vrot.slane %v2468_v41, 1  ;;  %v3298_v47 = vsel %vm478_vm0, %v3282_v35, %v2722_v51  ;;  %v3413_v57 = vsel %vm478_vm0, %v3397_v15, %v3106_v29  ;;  %v1414_v63 = vmul.f32 0.46666667, %v10936_v54 }
 0x27a   : > { %v3250_v27 = vrot.slane %v2547_v48, 1  ;;  %v3315_v26 = vsel %vm3310_vm6, %v3298_v47, %v2770_v12  ;;  %v3429_v0 = vsel %vm3310_vm6, %v3413_v57, %v3154_v23  ;;  %v11388_v1 = vmul.f32 0.93333334, %v10936_v54 }
 0x27b   : > { %v2642_v62 = vadd.f32 %v2610_v56, %v2563_v36  ;;  %v3332_v42 = vsel %vm3327_vm5, %v3315_v26, %v2818_v9  ;;  %v3445_v32 = vsel %vm3327_vm5, %v3429_v0, %v3202_v21  ;;  %v1605_v41 = vmul.f32 0.4, %v10936_v54 }
 0x27c   : > { %v2962_v60 = vrot.slane %v2052_v31, 4  ;;  %v3349_v40 = vsel %vm3344_vm7, %v3332_v42, %v2866_v19  ;;  %v3461_v46 = vsel %vm3344_vm7, %v3445_v32, %v3250_v27  ;;  %v1446_v11 = vrot.slane %v1414_v63, 1 }
 0x27d   : > { %v3365_v24 = vsel %vm694_vm4, %v3349_v40, %v2914_v58  ;;  %v3477_v8 = vsel %vm694_vm4, %v3461_v46, %v2642_v62  ;;  %v1398_v52 = vmul.f32 0.5333333, %v10936_v54  ;;  %v1541_v33 = vrot.slane %v11388_v1, 1 }
 0x27e   : > { %v3381_v23 = vsel %vm570_vm3, %v3365_v24, %v2962_v60  ;;  %v11402_v61 = vsel %vm570_vm3, %v3477_v8, %v10952_v59  ;;  %v1637_v31 = vrot.slane %v1605_v41, 1  ;;  %v1701_v36 = vmul.f32 0.8666667, %v10936_v54 }
 0x27f   : > { %v3556_v48 = vrot.slane %v3381_v23, 7  ;;  %v13942_v58 = vrot.slane %v11402_v61, 7  ;;  %v1493_v12 = vmul.f32 0.06666666, %v10936_v54  ;;  %v1478_v53 = vadd.f32 %v1446_v11, %v1398_v52 }
 0x280   : > { %v1589_v37 = vmul.f32 0.6, %v10936_v54  ;;  %v1733_v56 = vrot.slane %v1701_v36, 1  ;;  %v1797_v9 = vmul.f32 0.33333334, %v10936_v54 }
 0x281   : > { %v11413_v59 = vsel %vm435_vm1, %v3556_v48, %v13942_v58  ;;  %v11416_v19 = vsel %vm435_vm1, 0.0, %v3556_v48  ;;  %v1893_v29 = vmul.f32 0.8, %v10936_v54  ;;  %v1973_v35 = vmul.f32 0.73333335, %v10936_v54 }
 0x282   : > { %14141 = vst [vmem:[#allocation20_spill] sm:$0xff] %v11416_v19  ;;  %v11422_v15 = vpack.c.bf16 %v11413_v59, %v11416_v19  ;;  %v1573_v21 = vadd.f32 %v1541_v33, %v1493_v12  ;;  %v1669_v47 = vadd.f32 %v1637_v31, %v1589_v37  ;;  %v1685_v57 = vmul.f32 0.13333333, %v10936_v54 }
 0x283   : > { %v1781_v63 = vmul.f32 0.6666666, %v10936_v54  ;;  %v1829_v27 = vrot.slane %v1797_v9, 1  ;;  %v1877_v26 = vmul.f32 0.19999999, %v10936_v54  ;;  %v1925_v0 = vrot.slane %v1893_v29, 1 }
 0x284   : > { %14142 = vst [vmem:[#allocation21_spill] sm:$0xff] %v11422_v15  ;;  %9246 = vmatmul.mubr.msk.bf16.gmra.mrb[16].mxu0 %vm3697_vm8, %v11422_v15  ;;  %v1989_v62 = vmul.f32 0.26666668, %v10936_v54  ;;  %v2069_v42 = vmul.f32 0.26666665, %v10936_v54  ;;  %v2101_v32 = vrot.slane %v1973_v35, 1  ;;  %v1765_v60 = vadd.f32 %v1733_v56, %v1685_v57 }
 0x285   : > { %v2437_v41 = vrot.slane %v1589_v37, 1  ;;  %v2149_v40 = vmul.f32 0.2, %v10936_v54  ;;  %v2229_v46 = vmul.f32 0.3333333, %v10936_v54  ;;  %v2675_v11 = vrot.slane %v1478_v53, 7 }
 0x286   : > { %v1861_v24 = vadd.f32 %v1829_v27, %v1781_v63  ;;  %v2021_v8 = vrot.slane %v1989_v62, 1  ;;  %v2245_v52 = vmul.f32 0.6666667, %v10936_v54  ;;  %v2325_v33 = vmul.f32 0.13333334, %v10936_v54 }
 0x287   : > { %v1957_v23 = vadd.f32 %v1925_v0, %v1877_v26  ;;  %v2181_v31 = vrot.slane %v2149_v40, 1  ;;  %v2405_v48 = vmul.f32 0.39999998, %v10936_v54  ;;  %v2485_v12 = vmul.f32 0.06666667, %v10936_v54 }
 0x288   : > { %v2133_v9 = vadd.f32 %v2101_v32, %v2069_v42  ;;  %v2277_v37 = vrot.slane %v2245_v52, 1  ;;  %v2357_v56 = vrot.slane %v2325_v33, 1  ;;  %v2723_v57 = vrot.slane %v1573_v21, 6 }
 0x289   : > { %v2213_v58 = vadd.f32 %v2181_v31, %v1893_v29  ;;  %v2469_v51 = vadd.f32 %v2437_v41, %v2405_v48  ;;  %v2516_v15 = vrot.slane %v2485_v12, 1  ;;  %v2580_v53 = vmul.f32 0.53333336, %v10936_v54 }
 0x28a   : > { %v2053_v63 = vadd.f32 %v2021_v8, %v1973_v35  ;;  %v2309_v27 = vadd.f32 %v2277_v37, %v2229_v46  ;;  %v2389_v62 = vadd.f32 %v2357_v56, %v1701_v36  ;;  %v2564_v10 = vmul.f32 0.46666664, %v10936_v54 }
 0x28b   : > { %v2548_v26 = vadd.f32 %v2516_v15, %v11388_v1  ;;  %v2611_v0 = vrot.slane %v2580_v53, 1  ;;  %v2771_v40 = vrot.slane %v1669_v47, 6  ;;  %v2819_v45 = vrot.slane %v1765_v60, 5 }
 0x28c   : > { %v2867_v49 = vrot.slane %v1861_v24, 5  ;;  %v3011_v42 = vrot.slane %v2133_v9, 3  ;;  %v3059_v32 = vrot.slane %v2213_v58, 3  ;;  %v3107_v52 = vrot.slane %v2309_v27, 2 }
 0x28d   : > { %v2643_v21 = vadd.f32 %v2611_v0, %v2564_v10  ;;  %v2915_v29 = vrot.slane %v1957_v23, 4  ;;  %v3155_v41 = vrot.slane %v2389_v62, 2  ;;  %v3203_v33 = vrot.slane %v2469_v51, 1 }
 0x28e   : > { %v3283_v35 = vsel %vm435_vm1, %v10936_v54, %v2675_v11  ;;  %v3398_v36 = vsel %vm435_vm1, %v3011_v42, %v3059_v32  ;;  %v14143_v46 = vrot.slane %v11174_v39, 2  ;;  %v14144_v1 = vrot.slane %v11167_v7, 2 }
 0x28f   : > { %v14145_v47 = vrot.slane %v11250_v30, 2  ;;  %v3299_v60 = vsel %vm478_vm0, %v3283_v35, %v2723_v57  ;;  %v3414_v51 = vsel %vm478_vm0, %v3398_v36, %v3107_v52  ;;  %v6170_v11 = vsel %vm478_vm0, %v11354_v34, 0 }
 0x290   : > { %v4349_v15 = vsel %vm694_vm4, %v14144_v1, %v14143_v46  ;;  %v14146_v58 = vmov %v14143_v46  ;;  %v3251_v8 = vrot.slane %v2548_v26, 1  ;;  %v3316_v23 = vsel %vm3310_vm6, %v3299_v60, %v2771_v40 }
 0x291   : > { %v4351_v10 = vsel %vm694_vm4, %v14146_v58, %v14145_v47  ;;  %v3430_v31 = vsel %vm3310_vm6, %v3414_v51, %v3155_v41  ;;  %v14148_v48 = vrot.slane %v11236_v2, 7  ;;  %v3333_v9 = vsel %vm3327_vm5, %v3316_v23, %v2819_v45 }
 0x292   : > { %v11455_v24 = vpack.c.bf16 %v4351_v10, %v4349_v15  ;;  %v3446_v37 = vsel %vm3327_vm5, %v3430_v31, %v3203_v33  ;;  %v14150_v56 = vrot.slane %v11255_v38, 2  ;;  %v14151_v34 = vrot.slane %v11243_v43, 2 }
 0x293   : > { %v11464_v12 = vsel %vm435_vm1, %v14148_v48, 0.0  ;;  %v2963_v27 = vrot.slane %v2053_v63, 4  ;;  %v3350_v2 = vsel %vm3344_vm7, %v3333_v9, %v2867_v49  ;;  %v3462_v62 = vsel %vm3344_vm7, %v3446_v37, %v3251_v8 }
 0x294   : > { %14147 = vst [vmem:[#allocation22_spill] sm:$0xff] %v11455_v24  ;;  %14149 = vst [vmem:[#allocation23_spill] sm:$0xff] %v11464_v12  ;;  %9510 = vmatmul.mubr.msk.bf16.vlgmr.msra.gmra.mrb[4].mxu1 %vm3697_vm8, %v11455_v24  ;;  %v4354_v57 = vsel %vm694_vm4, %v14151_v34, %v14150_v56  ;;  %v4355_v53 = vrot.slane %v11464_v12, 2  ;;  %v1415_v45 = vmul.f32 0.46666667, %v10938_v55  ;;  %v3366_v26 = vsel %vm694_vm4, %v3350_v2, %v2915_v29 }
 0x295   : > { %9542 = vmatpush3.bf16.msra.mxu1 %v6170_v11  ;;  %v3478_v0 = vsel %vm694_vm4, %v3462_v62, %v2643_v21  ;;  %v14152_v40 = vmov %v14150_v56  ;;  %v11485_v32 = vmul.f32 0.93333334, %v10938_v55  ;;  %v3382_v49 = vsel %vm570_vm3, %v3366_v26, %v2963_v27 }
 0x296   : > { %v4356_v42 = vsel %vm694_vm4, %v14152_v40, %v4355_v53  ;;  %v11491_v52 = vsel %vm570_vm3, %v3478_v0, %v10936_v54  ;;  %v3559_v21 = vrot.slane %v3382_v49, 7  ;;  %v1447_v35 = vrot.slane %v1415_v45, 1 }
 0x297   : > { %v11493_v41 = vpack.c.bf16 %v4356_v42, %v4354_v57  ;;  %v13950_v33 = vrot.slane %v11491_v52, 7  ;;  %v1542_v46 = vrot.slane %v11485_v32, 1  ;;  %v1606_v1 = vmul.f32 0.4, %v10938_v55 }
 0x298   : > { %v1702_v54 = vmul.f32 0.8666667, %v10938_v55  ;;  %v4357_v15 = vrot.slane %v11416_v19, 2  ;;  %v11510_v58 = vsel %vm435_vm1, 0.0, %v3559_v21  ;;  %v1399_v10 = vmul.f32 0.5333333, %v10938_v55 }
 0x299   : > { %14153 = vst [vmem:[#allocation24_spill] sm:$0xff] %v11493_v41  ;;  %9513 = vmatprep.mubr.msk.bf16.mxu1 %vm3697_vm8, %v11493_v41  ;;  %v11507_v47 = vsel %vm435_vm1, %v3559_v21, %v13950_v33  ;;  %v13951_v60 = vrot.slane %v11413_v59, 2  ;;  %v1494_v11 = vmul.f32 0.06666666, %v10938_v55  ;;  %v1590_v8 = vmul.f32 0.6, %v10938_v55 }
 0x29a   : > { %v11516_v51 = vpack.c.bf16 %v11507_v47, %v11510_v58  ;;  %v1479_v23 = vadd.f32 %v1447_v35, %v1399_v10  ;;  %v1638_v31 = vrot.slane %v1606_v1, 1  ;;  %v1734_v48 = vrot.slane %v1702_v54, 1 }
 0x29b   : > { %v1798_v9 = vmul.f32 0.33333334, %v10938_v55  ;;  %v1574_v37 = vadd.f32 %v1542_v46, %v1494_v11  ;;  %v1686_v56 = vmul.f32 0.13333333, %v10938_v55  ;;  %v1894_v34 = vmul.f32 0.8, %v10938_v55 }
 0x29c   : > { %14154 = vst [vmem:[#allocation25_spill] sm:$0xff] %v11516_v51  ;;  %9249 = vmatprep.mubr.msk.bf16.mxu0 %vm3697_vm8, %v11516_v51  ;;  %v1974_v57 = vmul.f32 0.73333335, %v10938_v55  ;;  %v1782_v2 = vmul.f32 0.6666666, %v10938_v55  ;;  %v11535_v40 = vsel %vm694_vm4, %v4357_v15, %v13951_v60  ;;  %v1670_v42 = vadd.f32 %v1638_v31, %v1590_v8 }
 0x29d   : > { %v1990_v62 = vmul.f32 0.26666668, %v10938_v55  ;;  %v1878_v45 = vmul.f32 0.19999999, %v10938_v55  ;;  %v2150_v0 = vmul.f32 0.2, %v10938_v55  ;;  %v1766_v49 = vadd.f32 %v1734_v48, %v1686_v56 }
 0x29e   : > { %v2102_v26 = vrot.slane %v1974_v57, 1  ;;  %v1830_v21 = vrot.slane %v1798_v9, 1  ;;  %v2246_v35 = vmul.f32 0.6666667, %v10938_v55  ;;  %v1926_v46 = vrot.slane %v1894_v34, 1 }
 0x29f   : > { %v2070_v1 = vmul.f32 0.26666665, %v10938_v55  ;;  %v2182_v10 = vrot.slane %v2150_v0, 1  ;;  %v2326_v11 = vmul.f32 0.13333334, %v10938_v55  ;;  %v2022_v29 = vrot.slane %v1990_v62, 1 }
 0x2a0   : > { %v2230_v36 = vmul.f32 0.3333333, %v10938_v55  ;;  %v2278_v63 = vrot.slane %v2246_v35, 1  ;;  %v2438_v53 = vrot.slane %v1590_v8, 1  ;;  %v2486_v31 = vmul.f32 0.06666667, %v10938_v55 }
 0x2a1   : > { %v2134_v27 = vadd.f32 %v2102_v26, %v2070_v1  ;;  %v2214_v33 = vadd.f32 %v2182_v10, %v1894_v34  ;;  %v2358_v15 = vrot.slane %v2326_v11, 1  ;;  %v1862_v48 = vadd.f32 %v1830_v21, %v1782_v2 }
 0x2a2   : > { %v2310_v9 = vadd.f32 %v2278_v63, %v2230_v36  ;;  %v2406_v56 = vmul.f32 0.39999998, %v10938_v55  ;;  %v2581_v60 = vmul.f32 0.53333336, %v10938_v55  ;;  %v1958_v51 = vadd.f32 %v1926_v46, %v1878_v45 }
 0x2a3   : > { %v2390_v0 = vadd.f32 %v2358_v15, %v1702_v54  ;;  %v2517_v41 = vrot.slane %v2486_v31, 1  ;;  %v2676_v24 = vrot.slane %v1479_v23, 7  ;;  %v2054_v62 = vadd.f32 %v2022_v29, %v1974_v57 }
 0x2a4   : > { %v2470_v12 = vadd.f32 %v2438_v53, %v2406_v56  ;;  %v2565_v35 = vmul.f32 0.46666664, %v10938_v55  ;;  %v2724_v8 = vrot.slane %v1574_v37, 6  ;;  %v2772_v26 = vrot.slane %v1670_v42, 6 }
 0x2a5   : > { %v2549_v34 = vadd.f32 %v2517_v41, %v11485_v32  ;;  %v3012_v1 = vrot.slane %v2134_v27, 3  ;;  %v3060_v10 = vrot.slane %v2214_v33, 3  ;;  %v2612_v2 = vrot.slane %v2581_v60, 1 }
 0x2a6   : > { %v2820_v63 = vrot.slane %v1766_v49, 5  ;;  %v2868_v36 = vrot.slane %v1862_v48, 5  ;;  %v3108_v21 = vrot.slane %v2310_v9, 2  ;;  %v2916_v11 = vrot.slane %v1958_v51, 4 }
 0x2a7   : > { %v3156_v30 = vrot.slane %v2390_v0, 2  ;;  %v3284_v54 = vsel %vm435_vm1, %v10938_v55, %v2676_v24  ;;  %v3399_v29 = vsel %vm435_vm1, %v3012_v1, %v3060_v10  ;;  %v3204_v23 = vrot.slane %v2470_v12, 1 }
 0x2a8   : > { %v3300_v57 = vsel %vm478_vm0, %v3284_v54, %v2724_v8  ;;  %v3415_v37 = vsel %vm478_vm0, %v3399_v29, %v3108_v21  ;;  %v1416_v32 = vmul.f32 0.46666667, %v10994_v13  ;;  %v3252_v41 = vrot.slane %v2549_v34, 1 }
 0x2a9   : > { %v3317_v33 = vsel %vm3310_vm6, %v3300_v57, %v2772_v26  ;;  %v3431_v60 = vsel %vm3310_vm6, %v3415_v37, %v3156_v30  ;;  %v11555_v51 = vmul.f32 0.93333334, %v10994_v13  ;;  %v2644_v53 = vadd.f32 %v2612_v2, %v2565_v35 }
 0x2aa   : > { %v3334_v24 = vsel %vm3327_vm5, %v3317_v33, %v2820_v63  ;;  %v3447_v27 = vsel %vm3327_vm5, %v3431_v60, %v3204_v23  ;;  %v1607_v12 = vmul.f32 0.4, %v10994_v13  ;;  %v2964_v45 = vrot.slane %v2054_v62, 4 }
 0x2ab   : > { %v3351_v42 = vsel %vm3344_vm7, %v3334_v24, %v2868_v36  ;;  %v3463_v49 = vsel %vm3344_vm7, %v3447_v27, %v3252_v41  ;;  %v1448_v46 = vrot.slane %v1416_v32, 1  ;;  %v1400_v31 = vmul.f32 0.5333333, %v10994_v13 }
 0x2ac   : > { %v3367_v15 = vsel %vm694_vm4, %v3351_v42, %v2916_v11  ;;  %v3479_v30 = vsel %vm694_vm4, %v3463_v49, %v2644_v53  ;;  %v1543_v48 = vrot.slane %v11555_v51, 1  ;;  %v1639_v0 = vrot.slane %v1607_v12, 1 }
 0x2ad   : > { %v3383_v9 = vsel %vm570_vm3, %v3367_v15, %v2964_v45  ;;  %v11569_v56 = vsel %vm570_vm3, %v3479_v30, %v10938_v55  ;;  %v1703_v62 = vmul.f32 0.8666667, %v10994_v13  ;;  %v1495_v34 = vmul.f32 0.06666666, %v10994_v13 }
 0x2ae   : > { %v3562_v35 = vrot.slane %v3383_v9, 7  ;;  %v13960_v8 = vrot.slane %v11569_v56, 7  ;;  %v1591_v26 = vmul.f32 0.6, %v10994_v13  ;;  %v1480_v1 = vadd.f32 %v1448_v46, %v1400_v31 }
 0x2af   : > { %v1687_v10 = vmul.f32 0.13333333, %v10994_v13  ;;  %v1735_v2 = vrot.slane %v1703_v62, 1  ;;  %v1799_v63 = vmul.f32 0.33333334, %v10994_v13  ;;  %v1575_v29 = vadd.f32 %v1543_v48, %v1495_v34 }
 0x2b0   : > { %v11580_v55 = vsel %vm435_vm1, %v3562_v35, %v13960_v8  ;;  %v11583_v36 = vsel %vm435_vm1, 0.0, %v3562_v35  ;;  %v1895_v21 = vmul.f32 0.8, %v10994_v13  ;;  %v1975_v11 = vmul.f32 0.73333335, %v10994_v13 }
 0x2b1   : > { %v11589_v54 = vpack.c.bf16 %v11580_v55, %v11583_v36  ;;  %v1671_v23 = vadd.f32 %v1639_v0, %v1591_v26  ;;  %v1783_v57 = vmul.f32 0.6666666, %v10994_v13  ;;  %v1831_v37 = vrot.slane %v1799_v63, 1 }
 0x2b2   : > { %v1879_v32 = vmul.f32 0.19999999, %v10994_v13  ;;  %v1927_v41 = vrot.slane %v1895_v21, 1  ;;  %v2439_v33 = vrot.slane %v1591_v26, 1  ;;  %v1767_v60 = vadd.f32 %v1735_v2, %v1687_v10 }
 0x2b3   : > { %14155 = vst [vmem:[#allocation26_spill] sm:$0xff] %v11589_v54  ;;  %9250 = vmatmul.mubr.msk.bf16.gmra.mrb[20].mxu0 %vm3697_vm8, %v11589_v54  ;;  %v1991_v53 = vmul.f32 0.26666668, %v10994_v13  ;;  %v2071_v24 = vmul.f32 0.26666665, %v10994_v13  ;;  %v2103_v27 = vrot.slane %v1975_v11, 1  ;;  %v1863_v12 = vadd.f32 %v1831_v37, %v1783_v57 }
 0x2b4   : > { %v2151_v45 = vmul.f32 0.2, %v10994_v13  ;;  %v2231_v42 = vmul.f32 0.3333333, %v10994_v13  ;;  %v2677_v49 = vrot.slane %v1480_v1, 7  ;;  %v1959_v46 = vadd.f32 %v1927_v41, %v1879_v32 }
 0x2b5   : > { %v2023_v15 = vrot.slane %v1991_v53, 1  ;;  %v2247_v30 = vmul.f32 0.6666667, %v10994_v13  ;;  %v2327_v31 = vmul.f32 0.13333334, %v10994_v13  ;;  %v2135_v48 = vadd.f32 %v2103_v27, %v2071_v24 }
 0x2b6   : > { %v2183_v9 = vrot.slane %v2151_v45, 1  ;;  %v2407_v0 = vmul.f32 0.39999998, %v10994_v13  ;;  %v2487_v35 = vmul.f32 0.06666667, %v10994_v13  ;;  %v2725_v2 = vrot.slane %v1575_v29, 6 }
 0x2b7   : > { %v2055_v34 = vadd.f32 %v2023_v15, %v1975_v11  ;;  %v2279_v26 = vrot.slane %v2247_v30, 1  ;;  %v2359_v10 = vrot.slane %v2327_v31, 1  ;;  %v2582_v1 = vmul.f32 0.53333336, %v10994_v13 }
 0x2b8   : > { %v2215_v63 = vadd.f32 %v2183_v9, %v1895_v21  ;;  %v2471_v57 = vadd.f32 %v2439_v33, %v2407_v0  ;;  %v2518_v37 = vrot.slane %v2487_v35, 1  ;;  %v2566_v53 = vmul.f32 0.46666664, %v10994_v13 }
 0x2b9   : > { %v2311_v32 = vadd.f32 %v2279_v26, %v2231_v42  ;;  %v2391_v41 = vadd.f32 %v2359_v10, %v1703_v62  ;;  %v2773_v8 = vrot.slane %v1671_v23, 6  ;;  %v2613_v27 = vrot.slane %v2582_v1, 1 }
 0x2ba   : > { %v2550_v24 = vadd.f32 %v2518_v37, %v11555_v51  ;;  %v2821_v45 = vrot.slane %v1767_v60, 5  ;;  %v2869_v54 = vrot.slane %v1863_v12, 5  ;;  %v2917_v50 = vrot.slane %v1959_v46, 4 }
 0x2bb   : > { %v3013_v11 = vrot.slane %v2135_v48, 3  ;;  %v3061_v15 = vrot.slane %v2215_v63, 3  ;;  %v3109_v30 = vrot.slane %v2311_v32, 2  ;;  %v2645_v29 = vadd.f32 %v2613_v27, %v2566_v53 }
 0x2bc   : > { %v2965_v21 = vrot.slane %v2055_v34, 4  ;;  %v3157_v33 = vrot.slane %v2391_v41, 2  ;;  %v3205_v31 = vrot.slane %v2471_v57, 1  ;;  %v3285_v42 = vsel %vm435_vm1, %v10994_v13, %v2677_v49 }
 0x2bd   : > { %v3400_v62 = vsel %vm435_vm1, %v3013_v11, %v3061_v15  ;;  %v14156_v23 = vrot.slane %v11402_v61, 7  ;;  %v14158_v60 = vrot.slane %v11491_v52, 7  ;;  %v3253_v46 = vrot.slane %v2550_v24, 1 }
 0x2be   : > { %v3301_v48 = vsel %vm478_vm0, %v3285_v42, %v2725_v2  ;;  %v3416_v9 = vsel %vm478_vm0, %v3400_v62, %v3109_v30  ;;  %v14160_v61 = vrot.slane %v11507_v47, 2  ;;  %v14161_v34 = vrot.slane %v11510_v58, 2 }
 0x2bf   : > { %v11612_v51 = vsel %vm435_vm1, %v14156_v23, 0.0  ;;  %v11617_v12 = vsel %vm435_vm1, %v14158_v60, 0.0  ;;  %v3318_v49 = vsel %vm3310_vm6, %v3301_v48, %v2773_v8  ;;  %v3432_v35 = vsel %vm3310_vm6, %v3416_v9, %v3157_v33 }
 0x2c0   : > { %14157 = vst [vmem:[#allocation27_spill] sm:$0xff] %v11612_v51  ;;  %14159 = vst [vmem:[#allocation28_spill] sm:$0xff] %v11617_v12  ;;  %v4360_v0 = vrot.slane %v11612_v51, 2  ;;  %v4364_v52 = vsel %vm694_vm4, %v14161_v34, %v14160_v61  ;;  %v4365_v26 = vrot.slane %v11617_v12, 2  ;;  %v3335_v10 = vsel %vm3327_vm5, %v3318_v49, %v2821_v45 }
 0x2c1   : > { %v3448_v2 = vsel %vm3327_vm5, %v3432_v35, %v3205_v31  ;;  %v14162_v63 = vrot.slane %v11413_v59, 2  ;;  %v1417_v8 = vmul.f32 0.46666667, %v10996_v14  ;;  %v3352_v37 = vsel %vm3344_vm7, %v3335_v10, %v2869_v54 }
 0x2c2   : > { %v3464_v1 = vsel %vm3344_vm7, %v3448_v2, %v3253_v46  ;;  %v14164_v41 = vmov %v14160_v61  ;;  %v3368_v27 = vsel %vm694_vm4, %v3352_v37, %v2917_v50  ;;  %v11658_v30 = vmul.f32 0.93333334, %v10996_v14 }
 0x2c3   : > { %v4361_v57 = vsel %vm694_vm4, %v14162_v63, %v4360_v0  ;;  %v4366_v53 = vsel %vm694_vm4, %v14164_v41, %v4365_v26  ;;  %v3480_v45 = vsel %vm694_vm4, %v3464_v1, %v2645_v29  ;;  %v3384_v54 = vsel %vm570_vm3, %v3368_v27, %v2965_v21 }
 0x2c4   : > { %v11639_v32 = vpack.c.bf16 %v4361_v57, %v11535_v40  ;;  %v11647_v11 = vpack.c.bf16 %v4366_v53, %v4364_v52  ;;  %v11653_v40 = vsel %vm570_vm3, %v3480_v45, %v10994_v13  ;;  %v3565_v33 = vrot.slane %v3384_v54, 7 }
 0x2c5   : > { %v13964_v29 = vrot.slane %v11653_v40, 7  ;;  %v1449_v31 = vrot.slane %v1417_v8, 1  ;;  %v4367_v13 = vrot.slane %v11583_v36, 2  ;;  %v1608_v62 = vmul.f32 0.4, %v10996_v14 }
 0x2c6   : > { %14163 = vst [vmem:[#allocation29_spill] sm:$0xff] %v11639_v32  ;;  %14165 = vst [vmem:[#allocation30_spill] sm:$0xff] %v11647_v11  ;;  %9514 = vmatmul.mubr.msk.bf16.gmra.mrb[8].mxu1 %vm3697_vm8, %v11639_v32  ;;  %v11674_v60 = vsel %vm435_vm1, 0.0, %v3565_v33  ;;  %v1401_v46 = vmul.f32 0.5333333, %v10996_v14  ;;  %v1544_v49 = vrot.slane %v11658_v30, 1 }
 0x2c7   : > { %9517 = vmatprep.mubr.msk.bf16.mxu1 %vm3697_vm8, %v11647_v11  ;;  %v11671_v23 = vsel %vm435_vm1, %v3565_v33, %v13964_v29  ;;  %v1704_v48 = vmul.f32 0.8666667, %v10996_v14  ;;  %v1496_v0 = vmul.f32 0.06666666, %v10996_v14  ;;  %v1592_v35 = vmul.f32 0.6, %v10996_v14 }
 0x2c8   : > { %v11680_v9 = vpack.c.bf16 %v11671_v23, %v11674_v60  ;;  %v1481_v61 = vadd.f32 %v1449_v31, %v1401_v46  ;;  %v1640_v34 = vrot.slane %v1608_v62, 1  ;;  %v1688_v52 = vmul.f32 0.13333333, %v10996_v14 }
 0x2c9   : > { %v1784_v26 = vmul.f32 0.6666666, %v10996_v14  ;;  %v1800_v2 = vmul.f32 0.33333334, %v10996_v14  ;;  %v1896_v63 = vmul.f32 0.8, %v10996_v14  ;;  %v1576_v27 = vadd.f32 %v1544_v49, %v1496_v0 }
 0x2ca   : > { %14166 = vst [vmem:[#allocation31_spill] sm:$0xff] %v11680_v9  ;;  %9253 = vmatprep.mubr.msk.bf16.mxu0 %vm3697_vm8, %v11680_v9  ;;  %v14167_v57 = vrot.slane %v11569_v56, 7  ;;  %v1736_v1 = vrot.slane %v1704_v48, 1  ;;  %v1976_v41 = vmul.f32 0.73333335, %v10996_v14  ;;  %v1672_v31 = vadd.f32 %v1640_v34, %v1592_v35 }
 0x2cb   : > { %v1992_v53 = vmul.f32 0.26666668, %v10996_v14  ;;  %v1832_v45 = vrot.slane %v1800_v2, 1  ;;  %v1880_v54 = vmul.f32 0.19999999, %v10996_v14  ;;  %v1928_v62 = vrot.slane %v1896_v63, 1 }
 0x2cc   : > { %v11695_v8 = vsel %vm435_vm1, %v14167_v57, 0.0  ;;  %v2152_v33 = vmul.f32 0.2, %v10996_v14  ;;  %v2104_v46 = vrot.slane %v1976_v41, 1  ;;  %v2248_v56 = vmul.f32 0.6666667, %v10996_v14 }
 0x2cd   : > { %14168 = vst [vmem:[#allocation32_spill] sm:$0xff] %v11695_v8  ;;  %v2024_v57 = vrot.slane %v1992_v53, 1  ;;  %v2072_v50 = vmul.f32 0.26666665, %v10996_v14  ;;  %v2328_v24 = vmul.f32 0.13333334, %v10996_v14  ;;  %v1768_v15 = vadd.f32 %v1736_v1, %v1688_v52 }
 0x2ce   : > { %v2184_v21 = vrot.slane %v2152_v33, 1  ;;  %v1864_v10 = vadd.f32 %v1832_v45, %v1784_v26  ;;  %v2232_v0 = vmul.f32 0.3333333, %v10996_v14  ;;  %v2280_v49 = vrot.slane %v2248_v56, 1 }
 0x2cf   : > { %v2136_v2 = vadd.f32 %v2104_v46, %v2072_v50  ;;  %v2360_v37 = vrot.slane %v2328_v24, 1  ;;  %v2440_v29 = vrot.slane %v1592_v35, 1  ;;  %v2488_v34 = vmul.f32 0.06666667, %v10996_v14 }
 0x2d0   : > { %v1960_v42 = vadd.f32 %v1928_v62, %v1880_v54  ;;  %v2216_v9 = vadd.f32 %v2184_v21, %v1896_v63  ;;  %v2312_v11 = vadd.f32 %v2280_v49, %v2232_v0  ;;  %v2583_v53 = vmul.f32 0.53333336, %v10996_v14 }
 0x2d1   : > { %v2056_v32 = vadd.f32 %v2024_v57, %v1976_v41  ;;  %v2408_v33 = vmul.f32 0.39999998, %v10996_v14  ;;  %v2519_v12 = vrot.slane %v2488_v34, 1  ;;  %v2678_v51 = vrot.slane %v1481_v61, 7 }
 0x2d2   : > { %v2392_v52 = vadd.f32 %v2360_v37, %v1704_v48  ;;  %v2567_v26 = vmul.f32 0.46666664, %v10996_v14  ;;  %v2726_v1 = vrot.slane %v1576_v27, 6  ;;  %v14169_v50 = vrot.slane %v11580_v55, 2 }
 0x2d3   : > { %v2472_v35 = vadd.f32 %v2440_v29, %v2408_v33  ;;  %v2614_v45 = vrot.slane %v2583_v53, 1  ;;  %v2774_v21 = vrot.slane %v1672_v31, 6  ;;  %v3014_v63 = vrot.slane %v2136_v2, 3 }
 0x2d4   : > { %v11713_v24 = vsel %vm694_vm4, %v4367_v13, %v14169_v50  ;;  %v2551_v54 = vadd.f32 %v2519_v12, %v11658_v30  ;;  %v2822_v41 = vrot.slane %v1768_v15, 5  ;;  %v3062_v62 = vrot.slane %v2216_v9, 3 }
 0x2d5   : > { %v3110_v46 = vrot.slane %v2312_v11, 2  ;;  %v2870_v56 = vrot.slane %v1864_v10, 5  ;;  %v2918_v61 = vrot.slane %v1960_v42, 4  ;;  %v2966_v48 = vrot.slane %v2056_v32, 4 }
 0x2d6   : > { %v3286_v37 = vsel %vm435_vm1, %v10996_v14, %v2678_v51  ;;  %v3158_v27 = vrot.slane %v2392_v52, 2  ;;  %v3401_v13 = vsel %vm435_vm1, %v3014_v63, %v3062_v62  ;;  %v1418_v29 = vmul.f32 0.46666667, %v11003_v17 }
 0x2d7   : > { %v3302_v57 = vsel %vm478_vm0, %v3286_v37, %v2726_v1  ;;  %v3206_v31 = vrot.slane %v2472_v35, 1  ;;  %v3417_v12 = vsel %vm478_vm0, %v3401_v13, %v3110_v46  ;;  %v11724_v11 = vmul.f32 0.93333334, %v11003_v17 }
 0x2d8   : > { %v3319_v0 = vsel %vm3310_vm6, %v3302_v57, %v2774_v21  ;;  %v3254_v15 = vrot.slane %v2551_v54, 1  ;;  %v3433_v51 = vsel %vm3310_vm6, %v3417_v12, %v3158_v27  ;;  %v1609_v30 = vmul.f32 0.4, %v11003_v17 }
 0x2d9   : > { %v3336_v32 = vsel %vm3327_vm5, %v3319_v0, %v2822_v41  ;;  %v2646_v42 = vadd.f32 %v2614_v45, %v2567_v26  ;;  %v3449_v10 = vsel %vm3327_vm5, %v3433_v51, %v3206_v31  ;;  %v1402_v49 = vmul.f32 0.5333333, %v11003_v17 }
 0x2da   : > { %v3353_v9 = vsel %vm3344_vm7, %v3336_v32, %v2870_v56  ;;  %v3465_v34 = vsel %vm3344_vm7, %v3449_v10, %v3254_v15  ;;  %v1450_v53 = vrot.slane %v1418_v29, 1  ;;  %v1545_v33 = vrot.slane %v11724_v11, 1 }
 0x2db   : > { %v3369_v2 = vsel %vm694_vm4, %v3353_v9, %v2918_v61  ;;  %v3481_v1 = vsel %vm694_vm4, %v3465_v34, %v2646_v42  ;;  %v1641_v50 = vrot.slane %v1609_v30, 1  ;;  %v1705_v26 = vmul.f32 0.8666667, %v11003_v17 }
 0x2dc   : > { %v3385_v52 = vsel %vm570_vm3, %v3369_v2, %v2966_v48  ;;  %v11740_v35 = vsel %vm570_vm3, %v3481_v1, %v10996_v14  ;;  %v1497_v21 = vmul.f32 0.06666666, %v11003_v17  ;;  %v1593_v63 = vmul.f32 0.6, %v11003_v17 }
 0x2dd   : > { %v3568_v45 = vrot.slane %v3385_v52, 7  ;;  %v13973_v54 = vrot.slane %v11740_v35, 7  ;;  %v1689_v41 = vmul.f32 0.13333333, %v11003_v17  ;;  %v1737_v62 = vrot.slane %v1705_v26, 1 }
 0x2de   : > { %v1801_v46 = vmul.f32 0.33333334, %v11003_v17  ;;  %v1482_v61 = vadd.f32 %v1450_v53, %v1402_v49  ;;  %v1897_v48 = vmul.f32 0.8, %v11003_v17  ;;  %v1977_v14 = vmul.f32 0.73333335, %v11003_v17 }
 0x2df   : > { %v11748_v56 = vsel %vm435_vm1, 0.0, %v3568_v45  ;;  %v11755_v37 = vsel %vm435_vm1, %v3568_v45, %v13973_v54  ;;  %v1577_v27 = vadd.f32 %v1545_v33, %v1497_v21  ;;  %v1673_v57 = vadd.f32 %v1641_v50, %v1593_v63 }
 0x2e0   : > { %14170 = vst [vmem:[#allocation33_spill] sm:$0xff] %v11748_v56  ;;  %v1785_v13 = vmul.f32 0.6666666, %v11003_v17  ;;  %v11760_v29 = vpack.c.bf16 %v11755_v37, %v11748_v56  ;;  %v1833_v31 = vrot.slane %v1801_v46, 1  ;;  %v1881_v0 = vmul.f32 0.19999999, %v11003_v17 }
 0x2e1   : > { %v2441_v12 = vrot.slane %v1593_v63, 1  ;;  %v1769_v15 = vadd.f32 %v1737_v62, %v1689_v41  ;;  %v1929_v32 = vrot.slane %v1897_v48, 1  ;;  %v1993_v51 = vmul.f32 0.26666668, %v11003_v17 }
 0x2e2   : > { %14171 = vst [vmem:[#allocation34_spill] sm:$0xff] %v11760_v29  ;;  %v2105_v30 = vrot.slane %v1977_v14, 1  ;;  %9254 = vmatmul.mubr.msk.bf16.gmra.mrb[24].mxu0 %vm3697_vm8, %v11760_v29  ;;  %v1865_v42 = vadd.f32 %v1833_v31, %v1785_v13  ;;  %v2073_v9 = vmul.f32 0.26666665, %v11003_v17  ;;  %v2153_v10 = vmul.f32 0.2, %v11003_v17 }
 0x2e3   : > { %v2249_v49 = vmul.f32 0.6666667, %v11003_v17  ;;  %v1961_v2 = vadd.f32 %v1929_v32, %v1881_v0  ;;  %v2025_v34 = vrot.slane %v1993_v51, 1  ;;  %v2233_v53 = vmul.f32 0.3333333, %v11003_v17 }
 0x2e4   : > { %v2329_v33 = vmul.f32 0.13333334, %v11003_v17  ;;  %v2137_v52 = vadd.f32 %v2105_v30, %v2073_v9  ;;  %v2185_v1 = vrot.slane %v2153_v10, 1  ;;  %v2489_v45 = vmul.f32 0.06666667, %v11003_v17 }
 0x2e5   : > { %v2281_v50 = vrot.slane %v2249_v49, 1  ;;  %v2057_v21 = vadd.f32 %v2025_v34, %v1977_v14  ;;  %v2409_v41 = vmul.f32 0.39999998, %v11003_v17  ;;  %v2584_v62 = vmul.f32 0.53333336, %v11003_v17 }
 0x2e6   : > { %v2361_v63 = vrot.slane %v2329_v33, 1  ;;  %v2217_v46 = vadd.f32 %v2185_v1, %v1897_v48  ;;  %v2520_v31 = vrot.slane %v2489_v45, 1  ;;  %v2568_v0 = vmul.f32 0.46666664, %v11003_v17 }
 0x2e7   : > { %v2313_v13 = vadd.f32 %v2281_v50, %v2233_v53  ;;  %v2473_v51 = vadd.f32 %v2441_v12, %v2409_v41  ;;  %v2615_v54 = vrot.slane %v2584_v62, 1  ;;  %v2679_v29 = vrot.slane %v1482_v61, 7 }
 0x2e8   : > { %v2393_v32 = vadd.f32 %v2361_v63, %v1705_v26  ;;  %v2552_v30 = vadd.f32 %v2520_v31, %v11724_v11  ;;  %v2727_v9 = vrot.slane %v1577_v27, 6  ;;  %v2775_v10 = vrot.slane %v1673_v57, 6 }
 0x2e9   : > { %v2823_v49 = vrot.slane %v1769_v15, 5  ;;  %v2647_v14 = vadd.f32 %v2615_v54, %v2568_v0  ;;  %v2871_v34 = vrot.slane %v1865_v42, 5  ;;  %v2919_v33 = vrot.slane %v1961_v2, 4  ;;  %v11787_v54 = vld [vmem:[%s13920_s4 + $0x4] sm:$0xf] }
 0x2ea   : > { %v3015_v43 = vrot.slane %v2137_v52, 3  ;;  %v2967_v38 = vrot.slane %v2057_v21, 4  ;;  %v3063_v7 = vrot.slane %v2217_v46, 3  ;;  %v3111_v48 = vrot.slane %v2313_v13, 2  ;;  %10507 = vmatprep.subr.msk.bf16.mxu0 %vm3327_vm5, %v11787_v54 }
 0x2eb   : > { %v3159_v53 = vrot.slane %v2393_v32, 2  ;;  %v3207_v1 = vrot.slane %v2473_v51, 1  ;;  %v3287_v26 = vsel %vm435_vm1, %v11003_v17, %v2679_v29  ;;  %v4370_v12 = vrot.slane %v11695_v8, 2 }
 0x2ec   : > { %v14172_v61 = vrot.slane %v11653_v40, 7  ;;  %v3303_v27 = vsel %vm478_vm0, %v3287_v26, %v2727_v9  ;;  %v3402_v57 = vsel %vm435_vm1, %v3015_v43, %v3063_v7  ;;  %v14174_v15 = vrot.slane %v11671_v23, 2 }
 0x2ed   : > { %v14175_v29 = vrot.slane %v11674_v60, 2  ;;  %v3255_v2 = vrot.slane %v2552_v30, 1  ;;  %v3320_v52 = vsel %vm3310_vm6, %v3303_v27, %v2775_v10  ;;  %v3418_v50 = vsel %vm478_vm0, %v3402_v57, %v3111_v48 }
 0x2ee   : > { %v11782_v11 = vsel %vm435_vm1, %v14172_v61, 0.0  ;;  %v14176_v45 = vrot.slane %v11580_v55, 2  ;;  %v3337_v43 = vsel %vm3327_vm5, %v3320_v52, %v2823_v49  ;;  %v3434_v21 = vsel %vm3310_vm6, %v3418_v50, %v3159_v53 }
 0x2ef   : > { %14173 = vst [vmem:[#allocation35_spill] sm:$0xff] %v11782_v11  ;;  %v4374_v42 = vsel %vm694_vm4, %v14175_v29, %v14174_v15  ;;  %v4375_v40 = vrot.slane %v11782_v11, 2  ;;  %v14178_v41 = vmov %v14174_v15  ;;  %v3354_v46 = vsel %vm3344_vm7, %v3337_v43, %v2871_v34 }
 0x2f0   : > { %v4371_v7 = vsel %vm694_vm4, %v14176_v45, %v4370_v12  ;;  %v3450_v13 = vsel %vm3327_vm5, %v3434_v21, %v3207_v1  ;;  %v1419_v0 = vmul.f32 0.46666667, %v11005_v20  ;;  %v3370_v51 = vsel %vm694_vm4, %v3354_v46, %v2919_v33 }
 0x2f1   : > { %v11807_v63 = vpack.c.bf16 %v4371_v7, %v11713_v24  ;;  %v4376_v62 = vsel %vm694_vm4, %v14178_v41, %v4375_v40  ;;  %v3466_v30 = vsel %vm3344_vm7, %v3450_v13, %v3255_v2  ;;  %v11823_v24 = vmul.f32 0.93333334, %v11005_v20 }
 0x2f2   : > { %v11814_v31 = vpack.c.bf16 %v4376_v62, %v4374_v42  ;;  %v3386_v49 = vsel %vm570_vm3, %v3370_v51, %v2967_v38  ;;  %v3482_v34 = vsel %vm694_vm4, %v3466_v30, %v2647_v14  ;;  %v1451_v53 = vrot.slane %v1419_v0, 1 }
 0x2f3   : > { %14177 = vst [vmem:[#allocation36_spill] sm:$0xff] %v11807_v63  ;;  %9518 = vmatmul.mubr.msk.bf16.gmra.mrb[12].mxu1 %vm3697_vm8, %v11807_v63  ;;  %v11833_v33 = vsel %vm570_vm3, %v3482_v34, %v11003_v17  ;;  %v3571_v48 = vrot.slane %v3386_v49, 7  ;;  %v1610_v1 = vmul.f32 0.4, %v11005_v20  ;;  %v1546_v61 = vrot.slane %v11823_v24, 1 }
 0x2f4   : > { %14179 = vst [vmem:[#allocation37_spill] sm:$0xff] %v11814_v31  ;;  %9521 = vmatprep.mubr.msk.bf16.mxu1 %vm3697_vm8, %v11814_v31  ;;  %v13980_v12 = vrot.slane %v11833_v33, 7  ;;  %v1706_v38 = vmul.f32 0.8666667, %v11005_v20  ;;  %v4377_v14 = vrot.slane %v11748_v56, 2  ;;  %v13988_v27 = vrot.slane %v11755_v37, 2 }
 0x2f5   : > { %v11843_v57 = vsel %vm435_vm1, 0.0, %v3571_v48  ;;  %v1403_v17 = vmul.f32 0.5333333, %v11005_v20  ;;  %v1498_v29 = vmul.f32 0.06666666, %v11005_v20  ;;  %v1642_v42 = vrot.slane %v1610_v1, 1 }
 0x2f6   : > { %14180 = vst [vmem:[#allocation38_spill] sm:$0xff] %v11843_v57  ;;  %v11849_v15 = vsel %vm435_vm1, %v3571_v48, %v13980_v12  ;;  %v1738_v40 = vrot.slane %v1706_v38, 1  ;;  %v1594_v50 = vmul.f32 0.6, %v11005_v20  ;;  %v1690_v45 = vmul.f32 0.13333333, %v11005_v20 }
 0x2f7   : > { %14181 = vst [vmem:[#allocation39_spill] sm:$0xff] %v11849_v15  ;;  %v11854_v2 = vpack.c.bf16 %v11849_v15, %v11843_v57  ;;  %v1483_v52 = vadd.f32 %v1451_v53, %v1403_v17  ;;  %v1578_v7 = vadd.f32 %v1546_v61, %v1498_v29  ;;  %v1786_v43 = vmul.f32 0.6666666, %v11005_v20 }
 0x2f8   : > { %v1802_v21 = vmul.f32 0.33333334, %v11005_v20  ;;  %v1898_v41 = vmul.f32 0.8, %v11005_v20  ;;  %v1978_v13 = vmul.f32 0.73333335, %v11005_v20  ;;  %v1674_v51 = vadd.f32 %v1642_v42, %v1594_v50 }
 0x2f9   : > { %14182 = vst [vmem:[#allocation40_spill] sm:$0xff] %v11854_v2  ;;  %9257 = vmatprep.mubr.msk.bf16.mxu0 %vm3697_vm8, %v11854_v2  ;;  %v1994_v0 = vmul.f32 0.26666668, %v11005_v20  ;;  %v1770_v30 = vadd.f32 %v1738_v40, %v1690_v45  ;;  %v1882_v49 = vmul.f32 0.19999999, %v11005_v20  ;;  %v11875_v10 = vsel %vm694_vm4, %v4377_v14, %v13988_v27 }
 0x2fa   : > { %v2154_v34 = vmul.f32 0.2, %v11005_v20  ;;  %v1834_v48 = vrot.slane %v1802_v21, 1  ;;  %v2106_v53 = vrot.slane %v1978_v13, 1  ;;  %v2250_v1 = vmul.f32 0.6666667, %v11005_v20 }
 0x2fb   : > { %v2330_v61 = vmul.f32 0.13333334, %v11005_v20  ;;  %v1930_v17 = vrot.slane %v1898_v41, 1  ;;  %v2074_v29 = vmul.f32 0.26666665, %v11005_v20  ;;  %v2026_v42 = vrot.slane %v1994_v0, 1 }
 0x2fc   : > { %v2186_v26 = vrot.slane %v2154_v34, 1  ;;  %v2234_v40 = vmul.f32 0.3333333, %v11005_v20  ;;  %v2282_v45 = vrot.slane %v2250_v1, 1  ;;  %v2442_v62 = vrot.slane %v1594_v50, 1 }
 0x2fd   : > { %v2362_v32 = vrot.slane %v2330_v61, 1  ;;  %v2138_v21 = vadd.f32 %v2106_v53, %v2074_v29  ;;  %v2490_v46 = vmul.f32 0.06666667, %v11005_v20  ;;  %v1866_v12 = vadd.f32 %v1834_v48, %v1786_v43 }
 0x2fe   : > { %v2218_v9 = vadd.f32 %v2186_v26, %v1898_v41  ;;  %v2314_v2 = vadd.f32 %v2282_v45, %v2234_v40  ;;  %v2410_v31 = vmul.f32 0.39999998, %v11005_v20  ;;  %v2585_v34 = vmul.f32 0.53333336, %v11005_v20 }
 0x2ff   : > { %v1962_v63 = vadd.f32 %v1930_v17, %v1882_v49  ;;  %v2394_v11 = vadd.f32 %v2362_v32, %v1706_v38  ;;  %v2521_v14 = vrot.slane %v2490_v46, 1  ;;  %v2680_v27 = vrot.slane %v1483_v52, 7 }
 0x300   : > { %v2058_v0 = vadd.f32 %v2026_v42, %v1978_v13  ;;  %v2474_v56 = vadd.f32 %v2442_v62, %v2410_v31  ;;  %v2569_v1 = vmul.f32 0.46666664, %v11005_v20  ;;  %v2728_v61 = vrot.slane %v1578_v7, 6 }
 0x301   : > { %v2553_v26 = vadd.f32 %v2521_v14, %v11823_v24  ;;  %v2776_v50 = vrot.slane %v1674_v51, 6  ;;  %v3016_v41 = vrot.slane %v2138_v21, 3  ;;  %v3064_v53 = vrot.slane %v2218_v9, 3  ;;  %v11892_v9 = vld [vmem:[%s13921_s5 + $0x2] sm:$0x3] }
 0x302   : > { %v2616_v43 = vrot.slane %v2585_v34, 1  ;;  %v2824_v48 = vrot.slane %v1770_v30, 5  ;;  %v2872_v29 = vrot.slane %v1866_v12, 5  ;;  %v3112_v40 = vrot.slane %v2314_v2, 2  ;;  %14183 = vst [vmem:[#allocation41_spill] sm:$0xff] %v11892_v9  ;;  %10517 = vmatprep.subr.msk.bf16.mxu1 %vm478_vm0, %v11892_v9 }
 0x303   : > { %v2920_v45 = vrot.slane %v1962_v63, 4  ;;  %v3160_v8 = vrot.slane %v2394_v11, 2  ;;  %v3288_v32 = vsel %vm435_vm1, %v11005_v20, %v2680_v27  ;;  %v3403_v38 = vsel %vm435_vm1, %v3016_v41, %v3064_v53 }
 0x304   : > { %v3208_v31 = vrot.slane %v2474_v56, 1  ;;  %v3304_v52 = vsel %vm478_vm0, %v3288_v32, %v2728_v61  ;;  %v3419_v7 = vsel %vm478_vm0, %v3403_v38, %v3112_v40  ;;  %v1420_v24 = vmul.f32 0.46666667, %v11007_v22 }
 0x305   : > { %v3256_v12 = vrot.slane %v2553_v26, 1  ;;  %v3321_v11 = vsel %vm3310_vm6, %v3304_v52, %v2776_v50  ;;  %v3435_v63 = vsel %vm3310_vm6, %v3419_v7, %v3160_v8  ;;  %v11897_v27 = vmul.f32 0.93333334, %v11007_v22 }
 0x306   : > { %v2648_v56 = vadd.f32 %v2616_v43, %v2569_v1  ;;  %v3338_v2 = vsel %vm3327_vm5, %v3321_v11, %v2824_v48  ;;  %v3451_v62 = vsel %vm3327_vm5, %v3435_v63, %v3208_v31  ;;  %v1611_v46 = vmul.f32 0.4, %v11007_v22 }
 0x307   : > { %v2968_v13 = vrot.slane %v2058_v0, 4  ;;  %v3355_v51 = vsel %vm3344_vm7, %v3338_v2, %v2872_v29  ;;  %v3467_v30 = vsel %vm3344_vm7, %v3451_v62, %v3256_v12  ;;  %v1452_v49 = vrot.slane %v1420_v24, 1 }
 0x308   : > { %v3371_v8 = vsel %vm694_vm4, %v3355_v51, %v2920_v45  ;;  %v3483_v17 = vsel %vm694_vm4, %v3467_v30, %v2648_v56  ;;  %v1404_v42 = vmul.f32 0.5333333, %v11007_v22  ;;  %v1547_v21 = vrot.slane %v11897_v27, 1 }
 0x309   : > { %v3387_v34 = vsel %vm570_vm3, %v3371_v8, %v2968_v13  ;;  %v11913_v14 = vsel %vm570_vm3, %v3483_v17, %v11005_v20  ;;  %v1643_v0 = vrot.slane %v1611_v46, 1  ;;  %v1707_v1 = vmul.f32 0.8666667, %v11007_v22 }
 0x30a   : > { %v3574_v61 = vrot.slane %v3387_v34, 7  ;;  %v13991_v26 = vrot.slane %v11913_v14, 7  ;;  %v1499_v50 = vmul.f32 0.06666666, %v11007_v22  ;;  %v1595_v41 = vmul.f32 0.6, %v11007_v22 }
 0x30b   : > { %v1484_v53 = vadd.f32 %v1452_v49, %v1404_v42  ;;  %v1691_v43 = vmul.f32 0.13333333, %v11007_v22  ;;  %v1739_v48 = vrot.slane %v1707_v1, 1  ;;  %v1803_v29 = vmul.f32 0.33333334, %v11007_v22 }
 0x30c   : > { %v11924_v20 = vsel %vm435_vm1, %v3574_v61, %v13991_v26  ;;  %v11927_v40 = vsel %vm435_vm1, 0.0, %v3574_v61  ;;  %v1899_v45 = vmul.f32 0.8, %v11007_v22  ;;  %v1979_v32 = vmul.f32 0.73333335, %v11007_v22 }
 0x30d   : > { %14184 = vst [vmem:[#allocation42_spill] sm:$0xff] %v11927_v40  ;;  %v11933_v38 = vpack.c.bf16 %v11924_v20, %v11927_v40  ;;  %v1579_v31 = vadd.f32 %v1547_v21, %v1499_v50  ;;  %v1675_v52 = vadd.f32 %v1643_v0, %v1595_v41  ;;  %v1787_v7 = vmul.f32 0.6666666, %v11007_v22 }
 0x30e   : > { %v1835_v24 = vrot.slane %v1803_v29, 1  ;;  %v1883_v12 = vmul.f32 0.19999999, %v11007_v22  ;;  %v1931_v11 = vrot.slane %v1899_v45, 1  ;;  %v2443_v63 = vrot.slane %v1595_v41, 1 }
 0x30f   : > { %14185 = vst [vmem:[#allocation43_spill] sm:$0xff] %v11933_v38  ;;  %9258 = vmatmul.mubr.msk.bf16.gmra.mrb[28].mxu0 %vm3697_vm8, %v11933_v38  ;;  %v1771_v56 = vadd.f32 %v1739_v48, %v1691_v43  ;;  %v1995_v2 = vmul.f32 0.26666668, %v11007_v22  ;;  %v2075_v62 = vmul.f32 0.26666665, %v11007_v22  ;;  %v2107_v46 = vrot.slane %v1979_v32, 1 }
 0x310   : > { %v1867_v13 = vadd.f32 %v1835_v24, %v1787_v7  ;;  %v2155_v51 = vmul.f32 0.2, %v11007_v22  ;;  %v2235_v30 = vmul.f32 0.3333333, %v11007_v22  ;;  %v2681_v49 = vrot.slane %v1484_v53, 7 }
 0x311   : > { %v1963_v8 = vadd.f32 %v1931_v11, %v1883_v12  ;;  %v2027_v17 = vrot.slane %v1995_v2, 1  ;;  %v2251_v42 = vmul.f32 0.6666667, %v11007_v22  ;;  %v2331_v21 = vmul.f32 0.13333334, %v11007_v22 }
 0x312   : > { %v2139_v34 = vadd.f32 %v2107_v46, %v2075_v62  ;;  %v2187_v0 = vrot.slane %v2155_v51, 1  ;;  %v2411_v61 = vmul.f32 0.39999998, %v11007_v22  ;;  %v2491_v50 = vmul.f32 0.06666667, %v11007_v22 }
 0x313   : > { %v2059_v41 = vadd.f32 %v2027_v17, %v1979_v32  ;;  %v2283_v43 = vrot.slane %v2251_v42, 1  ;;  %v2363_v48 = vrot.slane %v2331_v21, 1  ;;  %v2729_v29 = vrot.slane %v1579_v31, 6 }
 0x314   : > { %v2219_v7 = vadd.f32 %v2187_v0, %v1899_v45  ;;  %v2475_v24 = vadd.f32 %v2443_v63, %v2411_v61  ;;  %v2522_v26 = vrot.slane %v2491_v50, 1  ;;  %v2586_v53 = vmul.f32 0.53333336, %v11007_v22 }
 0x315   : > { %v2315_v12 = vadd.f32 %v2283_v43, %v2235_v30  ;;  %v2395_v11 = vadd.f32 %v2363_v48, %v1707_v1  ;;  %v2570_v2 = vmul.f32 0.46666664, %v11007_v22  ;;  %v2777_v38 = vrot.slane %v1675_v52, 6 }
 0x316   : > { %v2554_v62 = vadd.f32 %v2522_v26, %v11897_v27  ;;  %v2617_v46 = vrot.slane %v2586_v53, 1  ;;  %v2825_v51 = vrot.slane %v1771_v56, 5  ;;  %v2873_v9 = vrot.slane %v1867_v13, 5 }
 0x317   : > { %v2921_v19 = vrot.slane %v1963_v8, 4  ;;  %v3017_v32 = vrot.slane %v2139_v34, 3  ;;  %v3065_v17 = vrot.slane %v2219_v7, 3  ;;  %v3113_v42 = vrot.slane %v2315_v12, 2 }
 0x318   : > { %v2649_v31 = vadd.f32 %v2617_v46, %v2570_v2  ;;  %v2969_v45 = vrot.slane %v2059_v41, 4  ;;  %v3161_v63 = vrot.slane %v2395_v11, 2  ;;  %v3209_v21 = vrot.slane %v2475_v24, 1 }
 0x319   : > { %v3289_v30 = vsel %vm435_vm1, %v11007_v22, %v2681_v49  ;;  %v3404_v1 = vsel %vm435_vm1, %v3017_v32, %v3065_v17  ;;  %v14186_v52 = vrot.slane %v11740_v35, 7  ;;  %v14188_v26 = vrot.slane %v11833_v33, 7 }
 0x31a   : > { %v3257_v13 = vrot.slane %v2554_v62, 1  ;;  %v3305_v8 = vsel %vm478_vm0, %v3289_v30, %v2729_v29  ;;  %v3420_v34 = vsel %vm478_vm0, %v3404_v1, %v3113_v42  ;;  %v14190_v35 = vrot.slane %v11849_v15, 2 }
 0x31b   : > { %v11956_v27 = vsel %vm435_vm1, %v14186_v52, 0.0  ;;  %v11961_v56 = vsel %vm435_vm1, %v14188_v26, 0.0  ;;  %v3322_v49 = vsel %vm3310_vm6, %v3305_v8, %v2777_v38  ;;  %v3436_v61 = vsel %vm3310_vm6, %v3420_v34, %v3161_v63 }
 0x31c   : > { %14187 = vst [vmem:[#allocation44_spill] sm:$0xff] %v11956_v27  ;;  %14189 = vst [vmem:[#allocation45_spill] sm:$0xff] %v11961_v56  ;;  %v4380_v0 = vrot.slane %v11956_v27, 2  ;;  %v14191_v50 = vrot.slane %v11843_v57, 2  ;;  %v4385_v41 = vrot.slane %v11961_v56, 2  ;;  %v3339_v43 = vsel %vm3327_vm5, %v3322_v49, %v2825_v51 }
 0x31d   : > { %v3452_v48 = vsel %vm3327_vm5, %v3436_v61, %v3209_v21  ;;  %v14192_v29 = vrot.slane %v11755_v37, 2  ;;  %v1421_v38 = vmul.f32 0.46666667, %v11010_v25  ;;  %v3356_v24 = vsel %vm3344_vm7, %v3339_v43, %v2873_v9 }
 0x31e   : > { %v4384_v33 = vsel %vm694_vm4, %v14191_v50, %v14190_v35  ;;  %v3468_v53 = vsel %vm3344_vm7, %v3452_v48, %v3257_v13  ;;  %v14194_v11 = vmov %v14190_v35  ;;  %v3372_v46 = vsel %vm694_vm4, %v3356_v24, %v2921_v19 }
 0x31f   : > { %v4381_v7 = vsel %vm694_vm4, %v14192_v29, %v4380_v0  ;;  %v4386_v2 = vsel %vm694_vm4, %v14194_v11, %v4385_v41  ;;  %v3484_v51 = vsel %vm694_vm4, %v3468_v53, %v2649_v31  ;;  %v3388_v17 = vsel %vm570_vm3, %v3372_v46, %v2969_v45 }
 0x320   : > { %v11983_v12 = vpack.c.bf16 %v4381_v7, %v11875_v10  ;;  %v11991_v32 = vpack.c.bf16 %v4386_v2, %v4384_v33  ;;  %v11996_v9 = vsel %vm570_vm3, %v3484_v51, %v11007_v22  ;;  %v1453_v10 = vrot.slane %v1421_v38, 1 }
 0x321   : > { %v12001_v42 = vmul.f32 0.93333334, %v11010_v25  ;;  %v3577_v31 = vrot.slane %v3388_v17, 7  ;;  %v13996_v21 = vrot.slane %v11996_v9, 7  ;;  %v4387_v22 = vrot.slane %v11927_v40, 2 }
 0x322   : > { %14193 = vst [vmem:[#allocation46_spill] sm:$0xff] %v11983_v12  ;;  %14195 = vst [vmem:[#allocation47_spill] sm:$0xff] %v11991_v32  ;;  %9522 = vmatmul.mubr.msk.bf16.gmra.mrb[16].mxu1 %vm3697_vm8, %v11983_v12  ;;  %v13997_v45 = vrot.slane %v11924_v20, 2  ;;  %v1405_v30 = vmul.f32 0.5333333, %v11010_v25  ;;  %v14197_v41 = vrot.slane %v11913_v14, 7 }
 0x323   : > { %9525 = vmatprep.mubr.msk.bf16.mxu1 %vm3697_vm8, %v11991_v32  ;;  %v1612_v1 = vmul.f32 0.4, %v11010_v25  ;;  %v12015_v52 = vsel %vm435_vm1, %v3577_v31, %v13996_v21  ;;  %v12018_v26 = vsel %vm435_vm1, 0.0, %v3577_v31  ;;  %v1548_v13 = vrot.slane %v12001_v42, 1 }
 0x324   : > { %v1708_v8 = vmul.f32 0.8666667, %v11010_v25  ;;  %v12024_v34 = vpack.c.bf16 %v12015_v52, %v12018_v26  ;;  %v1485_v0 = vadd.f32 %v1453_v10, %v1405_v30  ;;  %v1500_v49 = vmul.f32 0.06666666, %v11010_v25 }
 0x325   : > { %v1596_v61 = vmul.f32 0.6, %v11010_v25  ;;  %v1644_v35 = vrot.slane %v1612_v1, 1  ;;  %v1692_v50 = vmul.f32 0.13333333, %v11010_v25  ;;  %v12033_v43 = vsel %vm435_vm1, %v14197_v41, 0.0 }
 0x326   : > { %14196 = vst [vmem:[#allocation48_spill] sm:$0xff] %v12024_v34  ;;  %v1788_v33 = vmul.f32 0.6666666, %v11010_v25  ;;  %9261 = vmatprep.mubr.msk.bf16.mxu0 %vm3697_vm8, %v12024_v34  ;;  %v1804_v7 = vmul.f32 0.33333334, %v11010_v25  ;;  %v1580_v24 = vadd.f32 %v1548_v13, %v1500_v49  ;;  %v1740_v53 = vrot.slane %v1708_v8, 1 }
 0x327   : > { %v1900_v38 = vmul.f32 0.8, %v11010_v25  ;;  %v1980_v11 = vmul.f32 0.73333335, %v11010_v25  ;;  %v1996_v14 = vmul.f32 0.26666668, %v11010_v25  ;;  %v12048_v17 = vsel %vm694_vm4, %v4387_v22, %v13997_v45 }
 0x328   : > { %v1836_v2 = vrot.slane %v1804_v7, 1  ;;  %v1884_v46 = vmul.f32 0.19999999, %v11010_v25  ;;  %v2156_v51 = vmul.f32 0.2, %v11010_v25  ;;  %v1676_v10 = vadd.f32 %v1644_v35, %v1596_v61 }
 0x329   : > { %v1932_v31 = vrot.slane %v1900_v38, 1  ;;  %v2108_v30 = vrot.slane %v1980_v11, 1  ;;  %v2252_v1 = vmul.f32 0.6666667, %v11010_v25  ;;  %v2028_v13 = vrot.slane %v1996_v14, 1 }
 0x32a   : > { %v2076_v49 = vmul.f32 0.26666665, %v11010_v25  ;;  %v2188_v41 = vrot.slane %v2156_v51, 1  ;;  %v2332_v7 = vmul.f32 0.13333334, %v11010_v25  ;;  %v1772_v63 = vadd.f32 %v1740_v53, %v1692_v50 }
 0x32b   : > { %v1868_v19 = vadd.f32 %v1836_v2, %v1788_v33  ;;  %v2236_v62 = vmul.f32 0.3333333, %v11010_v25  ;;  %v2284_v48 = vrot.slane %v2252_v1, 1  ;;  %v2444_v22 = vrot.slane %v1596_v61, 1 }
 0x32c   : > { %v2140_v29 = vadd.f32 %v2108_v30, %v2076_v49  ;;  %v2364_v21 = vrot.slane %v2332_v7, 1  ;;  %v2492_v35 = vmul.f32 0.06666667, %v11010_v25  ;;  %v1964_v45 = vadd.f32 %v1932_v31, %v1884_v46 }
 0x32d   : > { %v2220_v34 = vadd.f32 %v2188_v41, %v1900_v38  ;;  %v2316_v32 = vadd.f32 %v2284_v48, %v2236_v62  ;;  %v2587_v14 = vmul.f32 0.53333336, %v11010_v25  ;;  %v2060_v12 = vadd.f32 %v2028_v13, %v1980_v11 }
 0x32e   : > { %v2412_v51 = vmul.f32 0.39999998, %v11010_v25  ;;  %v2523_v40 = vrot.slane %v2492_v35, 1  ;;  %v2682_v56 = vrot.slane %v1485_v0, 7  ;;  %v2396_v50 = vadd.f32 %v2364_v21, %v1708_v8 }
 0x32f   : > { %v2571_v33 = vmul.f32 0.46666664, %v11010_v25  ;;  %v2618_v53 = vrot.slane %v2587_v14, 1  ;;  %v2730_v2 = vrot.slane %v1580_v24, 6  ;;  %v2778_v1 = vrot.slane %v1676_v10, 6 }
 0x330   : > { %v2476_v30 = vadd.f32 %v2444_v22, %v2412_v51  ;;  %v2826_v61 = vrot.slane %v1772_v63, 5  ;;  %v3018_v49 = vrot.slane %v2140_v29, 3  ;;  %v2555_v46 = vadd.f32 %v2523_v40, %v12001_v42 }
 0x331   : > { %v2874_v38 = vrot.slane %v1868_v19, 5  ;;  %v3066_v62 = vrot.slane %v2220_v34, 3  ;;  %v3114_v48 = vrot.slane %v2316_v32, 2  ;;  %v2650_v31 = vadd.f32 %v2618_v53, %v2571_v33 }
 0x332   : > { %v2922_v11 = vrot.slane %v1964_v45, 4  ;;  %v2970_v13 = vrot.slane %v2060_v12, 4  ;;  %v3290_v0 = vsel %vm435_vm1, %v11010_v25, %v2682_v56  ;;  %v3162_v21 = vrot.slane %v2396_v50, 2 }
 0x333   : > { %v3306_v8 = vsel %vm478_vm0, %v3290_v0, %v2730_v2  ;;  %v3405_v24 = vsel %vm435_vm1, %v3018_v49, %v3066_v62  ;;  %v1422_v10 = vmul.f32 0.46666667, %v11218_v5  ;;  %v3210_v63 = vrot.slane %v2476_v30, 1 }
 0x334   : > { %v3323_v29 = vsel %vm3310_vm6, %v3306_v8, %v2778_v1  ;;  %v3421_v40 = vsel %vm478_vm0, %v3405_v24, %v3114_v48  ;;  %v12067_v32 = vmul.f32 0.93333334, %v11218_v5  ;;  %v3258_v42 = vrot.slane %v2555_v46, 1 }
 0x335   : > { %v3340_v12 = vsel %vm3327_vm5, %v3323_v29, %v2826_v61  ;;  %v3437_v56 = vsel %vm3310_vm6, %v3421_v40, %v3162_v21  ;;  %v1613_v19 = vmul.f32 0.4, %v11218_v5  ;;  %v1406_v41 = vmul.f32 0.5333333, %v11218_v5 }
 0x336   : > { %v3357_v45 = vsel %vm3344_vm7, %v3340_v12, %v2874_v38  ;;  %v3453_v34 = vsel %vm3327_vm5, %v3437_v56, %v3210_v63  ;;  %v1454_v7 = vrot.slane %v1422_v10, 1  ;;  %v1501_v14 = vmul.f32 0.06666666, %v11218_v5 }
 0x337   : > { %v3373_v22 = vsel %vm694_vm4, %v3357_v45, %v2922_v11  ;;  %v3469_v35 = vsel %vm3344_vm7, %v3453_v34, %v3258_v42  ;;  %v1549_v51 = vrot.slane %v12067_v32, 1  ;;  %v1645_v53 = vrot.slane %v1613_v19, 1 }
 0x338   : > { %v3389_v50 = vsel %vm570_vm3, %v3373_v22, %v2970_v13  ;;  %v3485_v33 = vsel %vm694_vm4, %v3469_v35, %v2650_v31  ;;  %v1709_v2 = vmul.f32 0.8666667, %v11218_v5  ;;  %v1597_v61 = vmul.f32 0.6, %v11218_v5 }
 0x339   : > { %v12084_v30 = vsel %vm570_vm3, %v3485_v33, %v11010_v25  ;;  %v3580_v1 = vrot.slane %v3389_v50, 7  ;;  %v1693_v49 = vmul.f32 0.13333333, %v11218_v5  ;;  %v1486_v38 = vadd.f32 %v1454_v7, %v1406_v41 }
 0x33a   : > { %v14006_v46 = vrot.slane %v12084_v30, 7  ;;  %v1741_v62 = vrot.slane %v1709_v2, 1  ;;  %v1805_v48 = vmul.f32 0.33333334, %v11218_v5  ;;  %v1581_v11 = vadd.f32 %v1549_v51, %v1501_v14 }
 0x33b   : > { %v12091_v31 = vsel %vm435_vm1, 0.0, %v3580_v1  ;;  %v1901_v13 = vmul.f32 0.8, %v11218_v5  ;;  %v1981_v25 = vmul.f32 0.73333335, %v11218_v5  ;;  %v1677_v21 = vadd.f32 %v1645_v53, %v1597_v61 }
 0x33c   : > { %v12098_v0 = vsel %vm435_vm1, %v3580_v1, %v14006_v46  ;;  %v1789_v8 = vmul.f32 0.6666666, %v11218_v5  ;;  %v1885_v24 = vmul.f32 0.19999999, %v11218_v5  ;;  %v1837_v29 = vrot.slane %v1805_v48, 1 }
 0x33d   : > { %v12104_v10 = vpack.c.bf16 %v12098_v0, %v12091_v31  ;;  %v2445_v40 = vrot.slane %v1597_v61, 1  ;;  %v1773_v42 = vadd.f32 %v1741_v62, %v1693_v49  ;;  %v1933_v12 = vrot.slane %v1901_v13, 1 }
 0x33e   : > { %v1997_v56 = vmul.f32 0.26666668, %v11218_v5  ;;  %v2109_v19 = vrot.slane %v1981_v25, 1  ;;  %v1869_v45 = vadd.f32 %v1837_v29, %v1789_v8  ;;  %v2077_v34 = vmul.f32 0.26666665, %v11218_v5 }
 0x33f   : > { %14198 = vst [vmem:[#allocation49_spill] sm:$0xff] %v12104_v10  ;;  %9262 = vmatmul.mubr.msk.bf16.gmra.mrb[32].mxu0 %vm3697_vm8, %v12104_v10  ;;  %v2157_v41 = vmul.f32 0.2, %v11218_v5  ;;  %v2253_v7 = vmul.f32 0.6666667, %v11218_v5  ;;  %v1965_v22 = vadd.f32 %v1933_v12, %v1885_v24  ;;  %v2683_v10 = vrot.slane %v1486_v38, 7 }
 0x340   : > { %v2029_v35 = vrot.slane %v1997_v56, 1  ;;  %v2237_v14 = vmul.f32 0.3333333, %v11218_v5  ;;  %v2333_v51 = vmul.f32 0.13333334, %v11218_v5  ;;  %v2141_v50 = vadd.f32 %v2109_v19, %v2077_v34 }
 0x341   : > { %v2189_v33 = vrot.slane %v2157_v41, 1  ;;  %v2285_v53 = vrot.slane %v2253_v7, 1  ;;  %v2493_v1 = vmul.f32 0.06666667, %v11218_v5  ;;  %v2413_v62 = vmul.f32 0.39999998, %v11218_v5 }
 0x342   : > { %v2061_v61 = vadd.f32 %v2029_v35, %v1981_v25  ;;  %v2365_v49 = vrot.slane %v2333_v51, 1  ;;  %v2588_v48 = vmul.f32 0.53333336, %v11218_v5  ;;  %v2572_v24 = vmul.f32 0.46666664, %v11218_v5 }
 0x343   : > { %v2221_v8 = vadd.f32 %v2189_v33, %v1901_v13  ;;  %v2317_v29 = vadd.f32 %v2285_v53, %v2237_v14  ;;  %v2524_v46 = vrot.slane %v2493_v1, 1  ;;  %v2477_v56 = vadd.f32 %v2445_v40, %v2413_v62 }
 0x344   : > { %v2397_v12 = vadd.f32 %v2365_v49, %v1709_v2  ;;  %v2619_v63 = vrot.slane %v2588_v48, 1  ;;  %v2731_v34 = vrot.slane %v1581_v11, 6  ;;  %v2779_v41 = vrot.slane %v1677_v21, 6 }
 0x345   : > { %v2556_v19 = vadd.f32 %v2524_v46, %v12067_v32  ;;  %v2827_v7 = vrot.slane %v1773_v42, 5  ;;  %v2875_v35 = vrot.slane %v1869_v45, 5  ;;  %v2923_v51 = vrot.slane %v1965_v22, 4 }
 0x346   : > { %v2651_v25 = vadd.f32 %v2619_v63, %v2572_v24  ;;  %v3019_v27 = vrot.slane %v2141_v50, 3  ;;  %v2971_v15 = vrot.slane %v2061_v61, 4  ;;  %v3067_v57 = vrot.slane %v2221_v8, 3 }
 0x347   : > { %v3115_v13 = vrot.slane %v2317_v29, 2  ;;  %v3163_v14 = vrot.slane %v2397_v12, 2  ;;  %v3211_v33 = vrot.slane %v2477_v56, 1  ;;  %v3291_v2 = vsel %vm435_vm1, %v11218_v5, %v2683_v10 }
 0x348   : > { %v4390_v40 = vrot.slane %v12033_v43, 2  ;;  %v14199_v38 = vrot.slane %v11996_v9, 7  ;;  %v3307_v46 = vsel %vm478_vm0, %v3291_v2, %v2731_v34  ;;  %v3406_v11 = vsel %vm435_vm1, %v3019_v27, %v3067_v57 }
 0x349   : > { %v14200_v21 = vrot.slane %v12015_v52, 2  ;;  %v14201_v63 = vrot.slane %v12018_v26, 2  ;;  %v3259_v10 = vrot.slane %v2556_v19, 1  ;;  %v3324_v22 = vsel %vm3310_vm6, %v3307_v46, %v2779_v41 }
 0x34a   : > { %v12126_v32 = vsel %vm435_vm1, %v14199_v38, 0.0  ;;  %v3422_v9 = vsel %vm478_vm0, %v3406_v11, %v3115_v13  ;;  %v14202_v50 = vrot.slane %v11924_v20, 2  ;;  %v3341_v1 = vsel %vm3327_vm5, %v3324_v22, %v2827_v7 }
 0x34b   : > { %v4394_v42 = vsel %vm694_vm4, %v14201_v63, %v14200_v21  ;;  %v4395_v45 = vrot.slane %v12126_v32, 2  ;;  %v3438_v57 = vsel %vm3310_vm6, %v3422_v9, %v3163_v14  ;;  %v14204_v61 = vmov %v14200_v21 }
 0x34c   : > { %v4391_v53 = vsel %vm694_vm4, %v14202_v50, %v4390_v40  ;;  %v3358_v62 = vsel %vm3344_vm7, %v3341_v1, %v2875_v35  ;;  %v3454_v48 = vsel %vm3327_vm5, %v3438_v57, %v3211_v33  ;;  %v1423_v29 = vmul.f32 0.46666667, %v11222_v44 }
 0x34d   : > { %v12144_v27 = vpack.c.bf16 %v4391_v53, %v12048_v17  ;;  %v4396_v49 = vsel %vm694_vm4, %v14204_v61, %v4395_v45  ;;  %v3374_v24 = vsel %vm694_vm4, %v3358_v62, %v2923_v51  ;;  %v3470_v12 = vsel %vm3344_vm7, %v3454_v48, %v3259_v10 }
 0x34e   : > { %v12151_v8 = vpack.c.bf16 %v4396_v49, %v4394_v42  ;;  %v1407_v17 = vmul.f32 0.5333333, %v11222_v44  ;;  %v12160_v56 = vmul.f32 0.93333334, %v11222_v44  ;;  %v3390_v19 = vsel %vm570_vm3, %v3374_v24, %v2971_v15 }
 0x34f   : > { %14203 = vst [vmem:[#allocation50_spill] sm:$0xff] %v12144_v27  ;;  %9526 = vmatmul.mubr.msk.bf16.gmra.mrb[20].mxu1 %vm3697_vm8, %v12144_v27  ;;  %v3486_v34 = vsel %vm694_vm4, %v3470_v12, %v2651_v25  ;;  %v1455_v41 = vrot.slane %v1423_v29, 1  ;;  %v1502_v7 = vmul.f32 0.06666666, %v11222_v44  ;;  %v3583_v51 = vrot.slane %v3390_v19, 7 }
 0x350   : > { %14205 = vst [vmem:[#allocation51_spill] sm:$0xff] %v12151_v8  ;;  %9529 = vmatprep.mubr.msk.bf16.mxu1 %vm3697_vm8, %v12151_v8  ;;  %v12169_v35 = vsel %vm570_vm3, %v3486_v34, %v11218_v5  ;;  %v1550_v13 = vrot.slane %v12160_v56, 1  ;;  %v1614_v14 = vmul.f32 0.4, %v11222_v44  ;;  %v14012_v33 = vrot.slane %v12098_v0, 2 }
 0x351   : > { %v14013_v15 = vrot.slane %v12169_v35, 7  ;;  %v1598_v25 = vmul.f32 0.6, %v11222_v44  ;;  %v1710_v2 = vmul.f32 0.8666667, %v11222_v44  ;;  %v12178_v40 = vsel %vm435_vm1, 0.0, %v3583_v51 }
 0x352   : > { %v12180_v38 = vadd.f32 %v1455_v41, %v1407_v17  ;;  %v1646_v5 = vrot.slane %v1614_v14, 1  ;;  %v1694_v46 = vmul.f32 0.13333333, %v11222_v44  ;;  %v12188_v21 = vadd.f32 %v1550_v13, %v1502_v7 }
 0x353   : > { %v12186_v11 = vsel %vm435_vm1, %v3583_v51, %v14013_v15  ;;  %v1742_v63 = vrot.slane %v1710_v2, 1  ;;  %v1790_v42 = vmul.f32 0.6666666, %v11222_v44  ;;  %v1806_v53 = vmul.f32 0.33333334, %v11222_v44 }
 0x354   : > { %v12193_v45 = vpack.c.bf16 %v12186_v11, %v12178_v40  ;;  %v1678_v9 = vadd.f32 %v1646_v5, %v1598_v25  ;;  %v1886_v1 = vmul.f32 0.19999999, %v11222_v44  ;;  %v1902_v57 = vmul.f32 0.8, %v11222_v44 }
 0x355   : > { %v12197_v50 = vadd.f32 %v1742_v63, %v1694_v46  ;;  %v1982_v61 = vmul.f32 0.73333335, %v11222_v44  ;;  %v1998_v49 = vmul.f32 0.26666668, %v11222_v44  ;;  %v2078_v62 = vmul.f32 0.26666665, %v11222_v44 }
 0x356   : > { %14206 = vst [vmem:[#allocation52_spill] sm:$0xff] %v12193_v45  ;;  %9265 = vmatprep.mubr.msk.bf16.mxu0 %vm3697_vm8, %v12193_v45  ;;  %v14207_v48 = vrot.slane %v12091_v31, 2  ;;  %v1838_v24 = vrot.slane %v1806_v53, 1  ;;  %v1934_v12 = vrot.slane %v1902_v57, 1  ;;  %v2158_v17 = vmul.f32 0.2, %v11222_v44 }
 0x357   : > { %v2238_v19 = vmul.f32 0.3333333, %v11222_v44  ;;  %v2030_v34 = vrot.slane %v1998_v49, 1  ;;  %v2110_v41 = vrot.slane %v1982_v61, 1  ;;  %v2254_v7 = vmul.f32 0.6666667, %v11222_v44 }
 0x358   : > { %v12212_v29 = vsel %vm694_vm4, %v14207_v48, %v14012_v33  ;;  %v2334_v51 = vmul.f32 0.13333334, %v11222_v44  ;;  %v1870_v13 = vadd.f32 %v1838_v24, %v1790_v42  ;;  %v1966_v14 = vadd.f32 %v1934_v12, %v1886_v1 }
 0x359   : > { %v2190_v5 = vrot.slane %v2158_v17, 1  ;;  %v2414_v46 = vmul.f32 0.39999998, %v11222_v44  ;;  %v2062_v63 = vadd.f32 %v2030_v34, %v1982_v61  ;;  %v2142_v48 = vadd.f32 %v2110_v41, %v2078_v62 }
 0x35a   : > { %v2286_v33 = vrot.slane %v2254_v7, 1  ;;  %v2366_v53 = vrot.slane %v2334_v51, 1  ;;  %v2446_v22 = vrot.slane %v1598_v25, 1  ;;  %v2494_v15 = vmul.f32 0.06666667, %v11222_v44 }
 0x35b   : > { %v2222_v10 = vadd.f32 %v2190_v5, %v1902_v57  ;;  %v2573_v49 = vmul.f32 0.46666664, %v11222_v44  ;;  %v2589_v27 = vmul.f32 0.53333336, %v11222_v44  ;;  %v2684_v42 = vrot.slane %v12180_v38, 7 }
 0x35c   : > { %v2318_v45 = vadd.f32 %v2286_v33, %v2238_v19  ;;  %v2398_v8 = vadd.f32 %v2366_v53, %v1710_v2  ;;  %v2478_v1 = vadd.f32 %v2446_v22, %v2414_v46  ;;  %v2525_v24 = vrot.slane %v2494_v15, 1  ;;  %v12229_v15 = vld [vmem:[%s13920_s4 + $0x8] sm:$0xf] }
 0x35d   : > { %v2732_v12 = vrot.slane %v12188_v21, 6  ;;  %v2780_v61 = vrot.slane %v1678_v9, 6  ;;  %v2620_v62 = vrot.slane %v2589_v27, 1  ;;  %v2828_v17 = vrot.slane %v12197_v50, 5 }
 0x35e   : > { %v2876_v57 = vrot.slane %v1870_v13, 5  ;;  %v2924_v25 = vrot.slane %v1966_v14, 4  ;;  %v2557_v34 = vadd.f32 %v2525_v24, %v12160_v56  ;;  %v2972_v41 = vrot.slane %v2062_v63, 4 }
 0x35f   : > { %v3020_v7 = vrot.slane %v2142_v48, 3  ;;  %v3068_v33 = vrot.slane %v2222_v10, 3  ;;  %v2652_v2 = vadd.f32 %v2620_v62, %v2573_v49  ;;  %v3116_v19 = vrot.slane %v2318_v45, 2 }
 0x360   : > { %v3164_v51 = vrot.slane %v2398_v8, 2  ;;  %v3212_v5 = vrot.slane %v2478_v1, 1  ;;  %v3260_v38 = vrot.slane %v2557_v34, 1  ;;  %v3292_v27 = vsel %vm435_vm1, %v11222_v44, %v2684_v42 }
 0x361   : > { %v3407_v21 = vsel %vm435_vm1, %v3020_v7, %v3068_v33  ;;  %v4142_v56 = vsel %vm3327_vm5, %v11787_v54, 0  ;;  %v3308_v10 = vsel %vm478_vm0, %v3292_v27, %v2732_v12  ;;  %v14208_v8 = vrot.slane %v12084_v30, 7 }
 0x362   : > { %v3423_v45 = vsel %vm478_vm0, %v3407_v21, %v3116_v19  ;;  %9270 = vmatpush3.bf16.msra.mxu0 %v4142_v56  ;;  %v14209_v9 = vrot.slane %v12169_v35, 7  ;;  %v3325_v13 = vsel %vm3310_vm6, %v3308_v10, %v2780_v61  ;;  %v14210_v46 = vrot.slane %v12186_v11, 2 }
 0x363   : > { %v12241_v22 = vsel %vm435_vm1, %v14208_v8, 0.0  ;;  %v3439_v14 = vsel %vm3310_vm6, %v3423_v45, %v3164_v51  ;;  %v14211_v63 = vrot.slane %v12178_v40, 2  ;;  %10508 = vmatprep.subr.msk.bf16.mxu0 %vm3327_vm5, %v12229_v15  ;;  %v3342_v35 = vsel %vm3327_vm5, %v3325_v13, %v2828_v17  ;;  %v14215_v17 = vld [vmem:[#allocation4_spill] sm:$0xff]  ;;  %v14223_v8 = vld [vmem:[#allocation14_spill] sm:$0xff] }
 0x364   : > { %v12246_v50 = vsel %vm435_vm1, %v14209_v9, 0.0  ;;  %v4400_v54 = vrot.slane %v12241_v22, 2  ;;  %v3455_v48 = vsel %vm3327_vm5, %v3439_v14, %v3212_v5  ;;  %v14212_v49 = vrot.slane %v11033_v4, 7 }
 0x365   : > { %v4404_v30 = vsel %vm694_vm4, %v14211_v63, %v14210_v46  ;;  %v4405_v53 = vrot.slane %v12246_v50, 2  ;;  %v3359_v1 = vsel %vm3344_vm7, %v3342_v35, %v2876_v57  ;;  %v3471_v24 = vsel %vm3344_vm7, %v3455_v48, %v3260_v38 }
 0x366   : > { %v12264_v42 = vsel %vm435_vm1, %v14212_v49, 0.0  ;;  %v14213_v12 = vrot.slane %v12098_v0, 2  ;;  %v14214_v62 = vrot.slane %v11046_v28, 1  ;;  %v14216_v34 = vrot.slane %v14215_v17, 1 }
 0x367   : > { %v3375_v33 = vsel %vm694_vm4, %v3359_v1, %v2924_v25  ;;  %v3487_v4 = vsel %vm694_vm4, %v3471_v24, %v2652_v2  ;;  %v14218_v57 = vmov %v14210_v46  ;;  %v3975_v21 = vrot.slane %v12264_v42, 1  ;;  %v14221_v2 = vld [vmem:[#allocation6_spill] sm:$0xff]  ;;  %v14226_v46 = vld [vmem:[#allocation8_spill] sm:$0xff] }
 0x368   : > { %v4401_v61 = vsel %vm694_vm4, %v14213_v12, %v4400_v54  ;;  %v3974_v7 = vsel %vm570_vm3, %v14216_v34, %v14214_v62  ;;  %v4406_v51 = vsel %vm694_vm4, %v14218_v57, %v4405_v53  ;;  %v3391_v5 = vsel %vm570_vm3, %v3375_v33, %v2972_v41  ;;  %v14234_v33 = vld [vmem:[#allocation11_spill] sm:$0xff]  ;;  %v14235_v57 = vld [vmem:[#allocation12_spill] sm:$0xff] }
 0x369   : > { %v12279_v19 = vpack.c.bf16 %v4401_v61, %v12212_v29  ;;  %v3503_v38 = vsel %vm570_vm3, %v3487_v4, %v11222_v44  ;;  %v12287_v27 = vpack.c.bf16 %v4406_v51, %v4404_v30  ;;  %v3586_v56 = vrot.slane %v3391_v5, 7  ;;  %v14237_v5 = vld [vmem:[#allocation10_spill] sm:$0xff] }
 0x36a   : > { %v3587_v25 = vrot.slane %v3503_v38, 7  ;;  %v14220_v29 = vrot.slane %v11105_v6, 1  ;;  %v14222_v10 = vrot.slane %v14221_v2, 1  ;;  %v3980_v41 = vrot.slane %v14223_v8, 1 }
 0x36b   : > { %14217 = vst [vmem:[#allocation4_spill] sm:$0xff] %v12279_v19  ;;  %14219 = vst [vmem:[#allocation53_spill] sm:$0xff] %v12287_v27  ;;  %9530 = vmatmul.mubr.msk.bf16.gmra.mrb[24].mxu1 %vm3697_vm8, %v12279_v19  ;;  %v4002_v9 = vrot.slane %v11583_v36, 1  ;;  %v4003_v44 = vrot.slane %v11580_v55, 1  ;;  %v14224_v13 = vmov %v14214_v62  ;;  %v14225_v54 = vrot.slane %v11174_v39, 1 }
 0x36c   : > { %v3979_v45 = vsel %vm570_vm3, %v14222_v10, %v14220_v29  ;;  %9533 = vmatprep.mubr.msk.bf16.mxu1 %vm3697_vm8, %v12287_v27  ;;  %v3976_v14 = vsel %vm570_vm3, %v14224_v13, %v3975_v21  ;;  %v14227_v63 = vrot.slane %v14226_v46, 1  ;;  %v12311_v35 = vsel %vm435_vm1, %v3586_v56, %v3587_v25  ;;  %v14244_v13 = vld [vmem:[#allocation20_spill] sm:$0xff]  ;;  %v14246_v46 = vld [vmem:[#allocation27_spill] sm:$0xff] }
 0x36d   : > { %v12314_v36 = vsel %vm435_vm1, 0.0, %v3586_v56  ;;  %v12316_v55 = vpack.c.bf16 %v3976_v14, %v3974_v7  ;;  %v14229_v48 = vmov %v14220_v29  ;;  %v4007_v49 = vrot.slane %v11674_v60, 1  ;;  %v14239_v56 = vld [vmem:[#allocation23_spill] sm:$0xff]  ;;  %v14240_v29 = vld [vmem:[#allocation16_spill] sm:$0xff] }
 0x36e   : > { %v3984_v30 = vsel %vm570_vm3, %v14227_v63, %v14225_v54  ;;  %v3981_v53 = vsel %vm570_vm3, %v14229_v48, %v3980_v41  ;;  %v4008_v1 = vrot.slane %v11671_v23, 1  ;;  %v12325_v24 = vpack.c.bf16 %v12311_v35, %v12314_v36 }
 0x36f   : > { %14228 = vst [vmem:[#allocation6_spill] sm:$0xff] %v12316_v55  ;;  %v4407_v12 = vrot.slane %v12314_v36, 2  ;;  %v4408_v61 = vrot.slane %v12311_v35, 2  ;;  %v12329_v62 = vpack.c.bf16 %v3981_v53, %v3979_v45  ;;  %v12332_v34 = vsel %vm435_vm1, %v3587_v25, 0.0 }
 0x370   : > { %14230 = vst [vmem:[#allocation14_spill] sm:$0xff] %v12325_v24  ;;  %v14232_v6 = vrot.slane %v11328_v3, 2  ;;  %v14233_v7 = vrot.slane %v11331_v18, 2  ;;  %9266 = vmatmul.mubr.msk.bf16.gmra.mrb[36].mxu0 %vm3697_vm8, %v12325_v24  ;;  %v4410_v23 = vrot.slane %v12332_v34, 2  ;;  %v3985_v4 = vrot.slane %v14234_v33, 1 }
 0x371   : > { %14231 = vst [vmem:[#allocation8_spill] sm:$0xff] %v12329_v62  ;;  %v14236_v51 = vrot.slane %v14235_v57, 1  ;;  %v14238_v38 = vrot.slane %v14237_v5, 1  ;;  %v3990_v25 = vrot.slane %v14239_v56, 1  ;;  %9271 = vmatprep.mubr.msk.bf16.mxu0 %vm3697_vm8, %v14240_v29  ;;  %v4409_v2 = vsel %vm694_vm4, %v4407_v12, %v4408_v61  ;;  %v14258_v57 = vld [vmem:[#allocation32_spill] sm:$0xff] }
 0x372   : > { %v5113_v60 = vsel %vm694_vm4, %v14233_v7, %v14232_v6  ;;  %v14241_v10 = vrot.slane %v11334_v16, 2  ;;  %v14242_v45 = vmov %v14232_v6  ;;  %v14243_v41 = vrot.slane %v11413_v59, 1 }
 0x373   : > { %v3989_v21 = vsel %vm570_vm3, %v14238_v38, %v14236_v51  ;;  %v14245_v14 = vrot.slane %v14244_v13, 1  ;;  %v3995_v63 = vrot.slane %v14246_v46, 1  ;;  %v4411_v48 = vsel %vm694_vm4, %v4408_v61, %v4410_v23 }
 0x374   : > { %v5115_v8 = vsel %vm694_vm4, %v14242_v45, %v14241_v10  ;;  %v14247_v53 = vrot.slane %v11174_v39, 1  ;;  %v14248_v16 = vmov %v14236_v51  ;;  %v14249_v7 = vrot.slane %v11507_v47, 1 }
 0x375   : > { %v3994_v54 = vsel %vm570_vm3, %v14245_v14, %v14243_v41  ;;  %v3991_v6 = vsel %vm570_vm3, %v14248_v16, %v3990_v25  ;;  %v14250_v33 = vrot.slane %v11510_v58, 1  ;;  %v12376_v5 = vpack.c.bf16 %v4411_v48, %v4409_v2  ;;  %v14259_v2 = vld [vmem:[#allocation33_spill] sm:$0xff]  ;;  %v12416_v48 = vld [vmem:[%s12390_s26 + $0x8] sm:$0xff]  ;;  %v14265_v16 = vld [vmem:[#allocation2_spill] sm:$0xff] }
 0x376   : > { %v3986_v12 = vsel %vm570_vm3, %v14247_v53, %v3985_v4  ;;  %v12380_v56 = vpack.c.bf16 %v3991_v6, %v3989_v21  ;;  %v14254_v39 = vmov %v14243_v41  ;;  %v12392_v58 = vpack.c.bf16 %v5115_v8, %v5113_v60  ;;  %v14261_v41 = vld [vmem:[#allocation35_spill] sm:$0xff]  ;;  %v5908_v53 = vld [vmem:[%s12390_s26 + $0x10] sm:$0xff] }
 0x377   : > { %v3999_v51 = vsel %vm570_vm3, %v14250_v33, %v14249_v7  ;;  %14251 = vst [vmem:[#allocation11_spill] sm:$0xff] %v12376_v5  ;;  %v12378_v38 = vpack.c.bf16 %v3986_v12, %v3984_v30  ;;  %v3996_v61 = vsel %vm570_vm3, %v14254_v39, %v3995_v63  ;;  %v14257_v30 = vld [vmem:[#allocation28_spill] sm:$0xff]  ;;  %9534 = vmatmul.mubr.msk.bf16.gmra.mrb[28].mxu1 %vm3697_vm8, %v12376_v5  ;;  %v4005_v21 = vrot.slane %v14258_v57, 1  ;;  %v12424_v12 = vld [vmem:[%s12390_s26 + $0x18] sm:$0xff] }
 0x378   : > { %14253 = vst [vmem:[#allocation10_spill] sm:$0xff] %v12380_v56  ;;  %14255 = vst [vmem:[#allocation23_spill] sm:$0xff] %v12392_v58  ;;  %v12394_v23 = vpack.c.bf16 %v3996_v61, %v3994_v54  ;;  %v4000_v4 = vrot.slane %v14257_v30, 1  ;;  %v4004_v59 = vsel %vm570_vm3, %v4002_v9, %v4003_v44  ;;  %v4009_v25 = vsel %vm570_vm3, %v4007_v49, %v4008_v1  ;;  %v14262_v9 = vld [vmem:[#allocation38_spill] sm:$0xff]  ;;  %v14263_v54 = vld [vmem:[#allocation39_spill] sm:$0xff] }
 0x379   : > { %14252 = vst [vmem:[#allocation12_spill] sm:$0xff] %v12378_v38  ;;  %v4012_v10 = vrot.slane %v14259_v2, 1  ;;  %v4013_v60 = vrot.slane %v11755_v37, 1  ;;  %9537 = vmatprep.mubr.msk.bf16.mxu1 %vm3697_vm8, %v12392_v58  ;;  %v14260_v45 = vmov %v14249_v7  ;;  %v4010_v13 = vrot.slane %v14261_v41, 1  ;;  %v5906_v49 = vld [vmem:[%s12390_s26] sm:$0xff]  ;;  %9272 = vmatmul.mubr.msk.bf16.vlgmr.msra.gmra.mrb[8].mxu0 %vm3697_vm8, %v12316_v55 }
 0x37a   : > { %14256 = vst [vmem:[#allocation20_spill] sm:$0xff] %v12394_v23  ;;  %v4001_v8 = vsel %vm570_vm3, %v14260_v45, %v4000_v4  ;;  %v4017_v14 = vrot.slane %v14262_v9, 1  ;;  %v4018_v46 = vrot.slane %v14263_v54, 1  ;;  %v4006_v37 = vsel %vm570_vm3, %v4003_v44, %v4005_v21  ;;  %9275 = vmatprep.mubr.msk.bf16.mxu0 %vm3697_vm8, %v12329_v62  ;;  %v14270_v21 = vld [vmem:[#allocation45_spill] sm:$0xff]  ;;  %v5934_v55 = vld [vmem:[%s12390_s26 + $0xe0] sm:$0xff] }
 0x37b   : > { %v12412_v63 = vpack.c.bf16 %v4001_v8, %v3999_v51  ;;  %v4011_v47 = vsel %vm570_vm3, %v4008_v1, %v4010_v13  ;;  %v12430_v6 = vpack.c.bf16 %v14265_v16, %v14265_v16  ;;  %v12432_v7 = vpack.c.bf16 %v4006_v37, %v4004_v59  ;;  %v14269_v1 = vld [vmem:[#allocation44_spill] sm:$0xff]  ;;  %v14271_v59 = vld [vmem:[#allocation42_spill] sm:$0xff] }
 0x37c   : > { %v12434_v33 = vpack.c.bf16 %v4011_v47, %v4009_v25  ;;  %v5970_v51 = vrot.slane %v5906_v49, 7  ;;  %v14023_v39 = vrot.slane %v12416_v48, 7  ;;  %v4014_v44 = vsel %vm570_vm3, %v4012_v10, %v4013_v60  ;;  %v5912_v37 = vld [vmem:[%s12390_s26 + $0x30] sm:$0xff] }
 0x37d   : > { %14264 = vst [vmem:[#allocation27_spill] sm:$0xff] %v12412_v63  ;;  %14266 = vst [vmem:[#allocation28_spill] sm:$0xff] %v12430_v6  ;;  %v4015_v61 = vrot.slane %v14269_v1, 1  ;;  %v5973_v30 = vrot.slane %v5908_v53, 7  ;;  %v14022_v4 = vrot.slane %v12424_v12, 7  ;;  %v4019_v57 = vsel %vm570_vm3, %v4017_v14, %v4018_v46  ;;  %v12479_v53 = vld [vmem:[%s12390_s26 + $0x38] sm:$0xff] }
 0x37e   : > { %14267 = vst [vmem:[#allocation32_spill] sm:$0xff] %v12432_v7  ;;  %14268 = vst [vmem:[#allocation33_spill] sm:$0xff] %v12434_v33  ;;  %v4020_v2 = vrot.slane %v14270_v21, 1  ;;  %v4022_v25 = vrot.slane %v14271_v59, 1  ;;  %v4023_v45 = vrot.slane %v11924_v20, 1  ;;  %v4027_v8 = vrot.slane %v12018_v26, 1 }
 0x37f   : > { %v4028_v10 = vrot.slane %v12015_v52, 1  ;;  %9538 = vmatmul.mubr.msk.bf16.gmra.mrb[0].mxu1 %vm3697_vm8, %v12430_v6  ;;  %v4016_v41 = vsel %vm570_vm3, %v4013_v60, %v4015_v61  ;;  %v14272_v13 = vmov 0.0|0.0   ;;  %v12453_v9 = vsel %vm435_vm1, %v5970_v51, %v14023_v39  ;;  %v5910_v26 = vld [vmem:[%s12390_s26 + $0x20] sm:$0xff]  ;;  %v12468_v60 = vld [vmem:[%s12390_s26 + $0x28] sm:$0xff]  ;;  %v14277_v59 = vld [vmem:[#allocation41_spill] sm:$0xff] }
 0x380   : > { %9543 = vmatprep.mubr.bf16.mxu1 %v14272_v13  ;;  %v12456_v14 = vsel %vm435_vm1, 0.0, %v5970_v51  ;;  %v12461_v20 = vsel %vm435_vm1, %v5973_v30, %v14022_v4  ;;  %v12464_v52 = vsel %vm435_vm1, 0.0, %v5973_v30  ;;  %v12470_v54 = vpack.c.bf16 %v4016_v41, %v4014_v44 }
 0x381   : > { %v4021_v49 = vsel %vm570_vm3, %v4018_v46, %v4020_v2  ;;  %9276 = vmatmul.mubr.msk.bf16.gmra.mrb[12].mxu0 %vm3697_vm8, %v12378_v38  ;;  %v12485_v16 = vpack.c.bf16 %v12453_v9, %v12456_v14  ;;  %v4024_v51 = vsel %vm570_vm3, %v4022_v25, %v4023_v45  ;;  %v4025_v44 = vrot.slane %v12033_v43, 1 }
 0x382   : > { %14273 = vst [vmem:[#allocation35_spill] sm:$0xff] %v12470_v54  ;;  %v12476_v47 = vpack.c.bf16 %v4021_v49, %v4019_v57  ;;  %9279 = vmatprep.mubr.msk.bf16.mxu0 %vm3697_vm8, %v12380_v56  ;;  %v4029_v46 = vsel %vm570_vm3, %v4027_v8, %v4028_v10  ;;  %v12492_v1 = vpack.c.bf16 %v12461_v20, %v12464_v52  ;;  %v5976_v61 = vrot.slane %v5910_v26, 7  ;;  %v12503_v8 = vld [vmem:[%s13921_s5 + $0x4] sm:$0x3] }
 0x383   : > { %14275 = vst [vmem:[#allocation39_spill] sm:$0xff] %v12485_v16  ;;  %v14021_v30 = vrot.slane %v12468_v60, 7  ;;  %v5979_v57 = vrot.slane %v5912_v37, 7  ;;  %v4032_v21 = vrot.slane %v12091_v31, 1  ;;  %v4033_v2 = vrot.slane %v12098_v0, 1  ;;  %v5914_v37 = vld [vmem:[%s12390_s26 + $0x40] sm:$0xff] }
 0x384   : > { %14274 = vst [vmem:[#allocation38_spill] sm:$0xff] %v12476_v47  ;;  %14276 = vst [vmem:[#allocation2_spill] sm:$0xff] %v12492_v1  ;;  %v6563_v25 = vsel %vm478_vm0, %v14277_v59, 0  ;;  %v14020_v43 = vrot.slane %v12479_v53, 7  ;;  %v4026_v41 = vsel %vm570_vm3, %v4023_v45, %v4025_v44  ;;  %v4030_v31 = vrot.slane %v12126_v32, 1  ;;  %v12531_v44 = vld [vmem:[%s12390_s26 + $0x48] sm:$0xff] }
 0x385   : > { %v12514_v0 = vsel %vm435_vm1, %v5976_v61, %v14021_v30  ;;  %v12517_v26 = vsel %vm435_vm1, 0.0, %v5976_v61  ;;  %v12520_v49 = vsel %vm435_vm1, 0.0, %v5979_v57  ;;  %v12522_v45 = vpack.c.bf16 %v4026_v41, %v4024_v51  ;;  %v12546_v30 = vld [vmem:[%s12390_s26 + $0x58] sm:$0xff] }
 0x386   : > { %v12527_v32 = vsel %vm435_vm1, %v5979_v57, %v14020_v43  ;;  %v4031_v59 = vsel %vm570_vm3, %v4028_v10, %v4030_v31  ;;  %v4035_v61 = vrot.slane %v12241_v22, 1  ;;  %v4037_v51 = vrot.slane %v12178_v40, 1  ;;  %v5916_v43 = vld [vmem:[%s12390_s26 + $0x50] sm:$0xff] }
 0x387   : > { %9544 = vmatmul.mubr.msk.bf16.vlgmr.msra.gmra.mrb[4].mxu1 %vm465_vm2, %v12485_v16  ;;  %14278 = vst [vmem:[#allocation44_spill] sm:$0xff] %v12522_v45  ;;  %v4038_v41 = vrot.slane %v12186_v11, 1  ;;  %v12542_v57 = vpack.c.bf16 %v4031_v59, %v4029_v46  ;;  %v12552_v22 = vpack.c.bf16 %v12514_v0, %v12517_v26  ;;  %v12556_v40 = vpack.c.bf16 %v12527_v32, %v12520_v49 }
 0x388   : > { %9576 = vmatpush3.bf16.msra.mxu1 %v6563_v25  ;;  %9547 = vmatprep.mubr.msk.bf16.mxu1 %vm465_vm2, %v12492_v1  ;;  %v4034_v25 = vsel %vm570_vm3, %v4032_v21, %v4033_v2  ;;  %v5982_v11 = vrot.slane %v5914_v37, 7  ;;  %v14024_v10 = vrot.slane %v12531_v44, 7  ;;  %v4036_v46 = vsel %vm570_vm3, %v4033_v2, %v4035_v61  ;;  %v5918_v61 = vld [vmem:[%s12390_s26 + $0x60] sm:$0xff]  ;;  %v12732_v1 = vld [vmem:[%s12390_s26 + $0xc8] sm:$0xff] }
 0x389   : > { %10518 = vmatprep.subr.msk.bf16.mxu1 %vm478_vm0, %v12503_v8  ;;  %9280 = vmatmul.mubr.msk.bf16.gmra.mrb[16].mxu0 %vm3697_vm8, %v12394_v23  ;;  %14279 = vst [vmem:[#allocation45_spill] sm:$0xff] %v12542_v57  ;;  %14280 = vst [vmem:[#allocation42_spill] sm:$0xff] %v12552_v22  ;;  %v5985_v21 = vrot.slane %v5916_v43, 7  ;;  %v14025_v31 = vrot.slane %v12546_v30, 7  ;;  %v12561_v59 = vpack.c.bf16 %v4036_v46, %v4034_v25  ;;  %v4040_v39 = vrot.slane %v12246_v50, 1  ;;  %v5932_v23 = vld [vmem:[%s12390_s26 + $0xd0] sm:$0xff] }
 0x38a   : > { %9283 = vmatprep.mubr.msk.bf16.mxu0 %vm3697_vm8, %v12412_v63  ;;  %14281 = vst [vmem:[#allocation41_spill] sm:$0xff] %v12556_v40  ;;  %v4039_v4 = vsel %vm570_vm3, %v4037_v51, %v4038_v41  ;;  %v12572_v2 = vsel %vm435_vm1, %v5982_v11, %v14024_v10  ;;  %v12575_v43 = vsel %vm435_vm1, 0.0, %v5982_v11  ;;  %v12588_v51 = vld [vmem:[%s12390_s26 + $0x68] sm:$0xff]  ;;  %v4337_v10 = vrot.slane %v14215_v17, 2 }
 0x38b   : > { %14282 = vst [vmem:[#allocation54_spill] sm:$0xff] %v12561_v59  ;;  %v4041_v37 = vsel %vm570_vm3, %v4038_v41, %v4040_v39  ;;  %v12581_v50 = vsel %vm435_vm1, %v5985_v21, %v14025_v31  ;;  %v12584_v25 = vsel %vm435_vm1, 0.0, %v5985_v21  ;;  %v4338_v11 = vrot.slane %v11046_v28, 2  ;;  %v5920_v39 = vld [vmem:[%s12390_s26 + $0x70] sm:$0xff]  ;;  %v12598_v41 = vld [vmem:[%s12390_s26 + $0x78] sm:$0xff] }
 0x38c   : > { %v12590_v46 = vpack.c.bf16 %v4041_v37, %v4039_v4  ;;  %v12604_v21 = vpack.c.bf16 %v12572_v2, %v12575_v43  ;;  %v12608_v4 = vpack.c.bf16 %v12581_v50, %v12584_v25  ;;  %v5988_v17 = vrot.slane %v5918_v61, 7  ;;  %v12614_v37 = vld [vmem:[%s13920_s4 + $0xc] sm:$0xf] }
 0x38d   : > { %v5991_v31 = vrot.slane %v5920_v39, 7  ;;  %v4507_v58 = vsel %vm3327_vm5, %v12229_v15, 0  ;;  %v4339_v61 = vsel %vm694_vm4, %v4337_v10, %v4338_v11  ;;  %v4340_v28 = vrot.slane %v12264_v42, 2 }
 0x38e   : > { %14283 = vst [vmem:[#allocation55_spill] sm:$0xff] %v12590_v46  ;;  %14284 = vst [vmem:[#allocation56_spill] sm:$0xff] %v12604_v21  ;;  %9304 = vmatpush3.bf16.msra.mxu0 %v4507_v58  ;;  %v14286_v39 = vrot.slane %v12588_v51, 7  ;;  %v12633_v15 = vsel %vm435_vm1, 0.0, %v5988_v17  ;;  %v14287_v58 = vrot.slane %v12598_v41, 7  ;;  %v14305_v24 = vrot.slane %v12453_v9, 1 }
 0x38f   : > { %9548 = vmatmul.mubr.msk.bf16.gmra.mrb[8].mxu1 %vm465_vm2, %v12552_v22  ;;  %14285 = vst [vmem:[#allocation57_spill] sm:$0xff] %v12608_v4  ;;  %10509 = vmatprep.subr.msk.bf16.mxu0 %vm3327_vm5, %v12614_v37  ;;  %v12641_v42 = vsel %vm435_vm1, 0.0, %v5991_v31  ;;  %v14311_v19 = vrot.slane %v12464_v52, 1 }
 0x390   : > { %9551 = vmatprep.mubr.msk.bf16.mxu1 %vm465_vm2, %v12556_v40  ;;  %v12630_v13 = vsel %vm435_vm1, %v5988_v17, %v14286_v39  ;;  %v12638_v10 = vsel %vm435_vm1, %v5991_v31, %v14287_v58  ;;  %v12651_v39 = vld [vmem:[%s12390_s26 + $0x98] sm:$0xff]  ;;  %v4341_v17 = vsel %vm694_vm4, %v4338_v11, %v4340_v28  ;;  %v4042_v28 = vrot.slane %v12314_v36, 1 }
 0x391   : > { %9284 = vmatmul.mubr.msk.bf16.gmra.mrb[20].mxu0 %vm3697_vm8, %v12432_v7  ;;  %v12658_v58 = vpack.c.bf16 %v12630_v13, %v12633_v15  ;;  %v12660_v31 = vpack.c.bf16 %v4341_v17, %v4339_v61  ;;  %v12664_v40 = vpack.c.bf16 %v12638_v10, %v12641_v42  ;;  %v5926_v17 = vld [vmem:[%s12390_s26 + $0xa0] sm:$0xff]  ;;  %v14291_v11 = vrot.slane %v12651_v39, 7 }
 0x392   : > { %9287 = vmatprep.mubr.msk.bf16.mxu0 %vm3697_vm8, %v12434_v33  ;;  %v5922_v33 = vld [vmem:[%s12390_s26 + $0x80] sm:$0xff] }
 0x393   : > { %14288 = vst [vmem:[#allocation58_spill] sm:$0xff] %v12658_v58  ;;  %14289 = vst [vmem:[#allocation59_spill] sm:$0xff] %v12660_v31  ;;  %v5994_v7 = vrot.slane %v5922_v33, 7  ;;  %v12690_v33 = vld [vmem:[%s12390_s26 + $0xa8] sm:$0xff] }
 0x394   : > { %14290 = vst [vmem:[#allocation60_spill] sm:$0xff] %v12664_v40  ;;  %v14294_v56 = vrot.slane %v12690_v33, 7 }
 0x395   : > { %v12686_v36 = vsel %vm435_vm1, 0.0, %v5994_v7 }
 0x397   : > { %9552 = vmatmul.mubr.msk.bf16.gmra.mrb[12].mxu1 %vm465_vm2, %v12604_v21  ;;  %v12645_v21 = vld [vmem:[%s12390_s26 + $0x88] sm:$0xff] }
 0x398   : > { %9555 = vmatprep.mubr.msk.bf16.mxu1 %vm465_vm2, %v12608_v4  ;;  %v5924_v4 = vld [vmem:[%s12390_s26 + $0x90] sm:$0xff] }
 0x399   : > { %9288 = vmatmul.mubr.msk.bf16.gmra.mrb[24].mxu0 %vm3697_vm8, %v12470_v54  ;;  %v14047_v54 = vrot.slane %v12645_v21, 7  ;;  %v5997_v63 = vrot.slane %v5924_v4, 7 }
 0x39a   : > { %9291 = vmatprep.mubr.msk.bf16.mxu0 %vm3697_vm8, %v12476_v47  ;;  %v4043_v47 = vrot.slane %v12311_v35, 1 }
 0x39b   : > { %v12683_v35 = vsel %vm435_vm1, %v5994_v7, %v14047_v54  ;;  %v12697_v61 = vsel %vm435_vm1, %v5997_v63, %v14291_v11  ;;  %v5928_v54 = vld [vmem:[%s12390_s26 + $0xb0] sm:$0xff]  ;;  %v4045_v11 = vrot.slane %v12332_v34, 1  ;;  %v6000_v7 = vrot.slane %v5926_v17, 7  ;;  %v5930_v17 = vld [vmem:[%s12390_s26 + $0xc0] sm:$0xff] }
 0x39c   : > { %v6003_v4 = vrot.slane %v5928_v54, 7 }
 0x39d   : > { %v4046_v34 = vsel %vm570_vm3, %v4043_v47, %v4045_v11  ;;  %v12745_v16 = vsel %vm435_vm1, %v6000_v7, %v14294_v56  ;;  %v12748_v38 = vsel %vm435_vm1, 0.0, %v6000_v7  ;;  %v12763_v56 = vld [vmem:[%s12390_s26 + $0xd8] sm:$0xff]  ;;  %v14298_v11 = vrot.slane %v12416_v48, 7 }
 0x39e   : > { %v12792_v62 = vpack.c.bf16 %v12745_v16, %v12748_v38  ;;  %v6009_v48 = vrot.slane %v5932_v23, 7 }
 0x39f   : > { %9556 = vmatmul.mubr.msk.bf16.gmra.mrb[16].mxu1 %vm465_vm2, %v12658_v58  ;;  %v12704_v58 = vld [vmem:[%s12390_s26 + $0xb8] sm:$0xff]  ;;  %v12781_v7 = vsel %vm435_vm1, %v14298_v11, 0.0  ;;  %v14302_v11 = vrot.slane %v12732_v1, 7 }
 0x3a0   : > { %9559 = vmatprep.mubr.msk.bf16.mxu1 %vm465_vm2, %v12664_v40  ;;  %v12700_v40 = vsel %vm435_vm1, 0.0, %v5997_v63  ;;  %v12716_v63 = vpack.c.bf16 %v12683_v35, %v12686_v36  ;;  %14300 = vst [vmem:[#allocation65_spill] sm:$0xff] %v12792_v62  ;;  %v6398_v18 = vrot.slane %v12781_v7, 1 }
 0x3a1   : > { %9292 = vmatmul.mubr.msk.bf16.gmra.mrb[28].mxu0 %vm3697_vm8, %v12522_v45  ;;  %v12723_v22 = vpack.c.bf16 %v12697_v61, %v12700_v40  ;;  %v14295_v45 = vrot.slane %v12704_v58, 7 }
 0x3a2   : > { %9295 = vmatprep.mubr.msk.bf16.mxu0 %vm3697_vm8, %v12542_v57  ;;  %14292 = vst [vmem:[#allocation61_spill] sm:$0xff] %v12716_v63  ;;  %v4044_v57 = vsel %vm570_vm3, %v4042_v28, %v4043_v47  ;;  %v12758_v28 = vsel %vm435_vm1, 0.0, %v6003_v4  ;;  %v6006_v47 = vrot.slane %v5930_v17, 7 }
 0x3a3   : > { %14293 = vst [vmem:[#allocation62_spill] sm:$0xff] %v12723_v22  ;;  %v12755_v54 = vsel %vm435_vm1, %v6003_v4, %v14295_v45  ;;  %v12771_v45 = vld [vmem:[%s12390_s26 + $0xe8] sm:$0xff]  ;;  %v12776_v17 = vpack.c.bf16 %v4046_v34, %v4044_v57  ;;  %v6012_v4 = vrot.slane %v5934_v55, 7  ;;  %v12828_v34 = vsel %vm435_vm1, 0.0, %v6009_v48 }
 0x3a4   : > { %14296 = vst [vmem:[#allocation63_spill] sm:$0xff] %v12771_v45  ;;  %v12796_v57 = vpack.c.bf16 %v12755_v54, %v12758_v28 }
 0x3a5   : > { %14297 = vst [vmem:[#allocation64_spill] sm:$0xff] %v12776_v17 }
 0x3a6   : > { %14301 = vst [vmem:[#allocation66_spill] sm:$0xff] %v12796_v57 }
 0x3a7   : > { %9560 = vmatmul.mubr.msk.bf16.gmra.mrb[20].mxu1 %vm465_vm2, %v12716_v63  ;;  %v14299_v63 = vrot.slane %v12424_v12, 7  ;;  %v12802_v12 = vsel %vm435_vm1, %v6006_v47, %v14302_v11  ;;  %v14306_v11 = vrot.slane %v12456_v14, 1 }
 0x3a8   : > { %9563 = vmatprep.mubr.msk.bf16.mxu1 %vm465_vm2, %v12723_v22 }
 0x3a9   : > { %9296 = vmatmul.mubr.msk.bf16.gmra.mrb[32].mxu0 %vm3697_vm8, %v12561_v59  ;;  %v12786_v22 = vsel %vm435_vm1, %v14299_v63, 0.0  ;;  %v12805_v63 = vsel %vm435_vm1, 0.0, %v6006_v47  ;;  %v14304_v59 = vrot.slane %v12763_v56, 7  ;;  %v6397_v47 = vsel %vm570_vm3, %v14306_v11, %v14305_v24 }
 0x3aa   : > { %9299 = vmatprep.mubr.msk.bf16.mxu0 %vm3697_vm8, %v12590_v46  ;;  %v6403_v23 = vrot.slane %v12786_v22, 1  ;;  %v12820_v55 = vpack.c.bf16 %v12802_v12, %v12805_v63  ;;  %v14309_v11 = vmov %v14305_v24  ;;  %v14310_v46 = vrot.slane %v12461_v20, 1 }
 0x3ab   : > { %v12825_v3 = vsel %vm435_vm1, %v6009_v48, %v14304_v59  ;;  %v12844_v59 = vsel %vm435_vm1, 0.0, %v6012_v4  ;;  %v14308_v48 = vrot.slane %v12468_v60, 7 }
 0x3ac   : > { %14303 = vst [vmem:[#allocation67_spill] sm:$0xff] %v12820_v55  ;;  %v12867_v60 = vpack.c.bf16 %v12825_v3, %v12828_v34 }
 0x3ad   : > { %v12849_v27 = vsel %vm435_vm1, %v14308_v48, 0.0 }
 0x3ae   : > { %14313 = vst [vmem:[#allocation68_spill] sm:$0xff] %v12867_v60 }
 0x3af   : > { %9564 = vmatmul.mubr.msk.bf16.gmra.mrb[24].mxu1 %vm465_vm2, %v12792_v62  ;;  %v14307_v62 = vrot.slane %v12771_v45, 7 }
 0x3b0   : > { %9567 = vmatprep.mubr.msk.bf16.mxu1 %vm465_vm2, %v12796_v57  ;;  %v6399_v57 = vsel %vm570_vm3, %v14309_v11, %v6398_v18  ;;  %v14315_v11 = vrot.slane %v12479_v53, 7  ;;  %v14319_v53 = vrot.slane %v12598_v41, 7  ;;  %v6761_v41 = vrot.slane %v12781_v7, 2 }
 0x3b1   : > { %v12841_v5 = vsel %vm435_vm1, %v6012_v4, %v14307_v62  ;;  %v6402_v62 = vsel %vm570_vm3, %v14311_v19, %v14310_v46  ;;  %v14312_v4 = vmov %v14310_v46  ;;  %9300 = vmatmul.mubr.msk.bf16.gmra.mrb[36].mxu0 %vm3697_vm8, %v12776_v17  ;;  %v12884_v48 = vpack.c.bf16 %v6399_v57, %v6397_v47 }
 0x3b2   : > { %v6404_v45 = vsel %vm570_vm3, %v14312_v4, %v6403_v23  ;;  %9305 = vmatprep.mubr.msk.bf16.mxu0 %vm3697_vm8, %v12430_v6  ;;  %v12876_v19 = vpack.c.bf16 %v12841_v5, %v12844_v59  ;;  %v12881_v23 = vsel %vm478_vm0, %v12503_v8, 0  ;;  %v12891_v24 = vsel %vm435_vm1, %v14315_v11, 0.0 }
 0x3b3   : > { %v12886_v18 = vpack.c.bf16 %v6404_v45, %v6402_v62  ;;  %v14316_v17 = vrot.slane %v12531_v44, 7  ;;  %v14317_v46 = vrot.slane %v12546_v30, 7  ;;  %v14318_v57 = vrot.slane %v12588_v51, 7 }
 0x3b4   : > { %14314 = vst [vmem:[#allocation69_spill] sm:$0xff] %v12876_v19  ;;  %v12911_v47 = vsel %vm435_vm1, %v14319_v53, 0.0  ;;  %v14320_v44 = vrot.slane %v12453_v9, 2  ;;  %v14322_v30 = vrot.slane %v12645_v21, 7  ;;  %v14323_v51 = vrot.slane %v12651_v39, 7 }
 0x3b5   : > { %v12896_v6 = vsel %vm435_vm1, %v14316_v17, 0.0  ;;  %v12901_v8 = vsel %vm435_vm1, %v14317_v46, 0.0  ;;  %v12906_v45 = vsel %vm435_vm1, %v14318_v57, 0.0  ;;  %v14321_v17 = vrot.slane %v12456_v14, 2 }
 0x3b6   : > { %v12921_v11 = vsel %vm435_vm1, %v14322_v30, 0.0  ;;  %v12926_v46 = vsel %vm435_vm1, %v14323_v51, 0.0  ;;  %v14324_v57 = vrot.slane %v12461_v20, 2  ;;  %v14325_v53 = vrot.slane %v12464_v52, 2 }
 0x3b7   : > { %v6760_v62 = vsel %vm694_vm4, %v14321_v17, %v14320_v44  ;;  %9568 = vmatmul.mubr.msk.bf16.gmra.mrb[28].mxu1 %vm465_vm2, %v12820_v55  ;;  %v4707_v21 = vsel %vm3327_vm5, %v12614_v37, 0  ;;  %v6766_v44 = vrot.slane %v12786_v22, 2  ;;  %v14326_v39 = vrot.slane %v12514_v0, 2 }
 0x3b8   : > { %v6765_v14 = vsel %vm694_vm4, %v14325_v53, %v14324_v57  ;;  %v14327_v17 = vrot.slane %v12517_v26, 2  ;;  %v6771_v30 = vrot.slane %v12849_v27, 2  ;;  %9571 = vmatprep.mubr.msk.bf16.mxu1 %vm465_vm2, %v12867_v60  ;;  %v14328_v52 = vrot.slane %v12690_v33, 7 }
 0x3b9   : > { %v14329_v37 = vrot.slane %v12453_v9, 2  ;;  %v14330_v57 = vrot.slane %v12527_v32, 2  ;;  %v14331_v53 = vrot.slane %v12520_v49, 2  ;;  %v14332_v60 = vrot.slane %v12461_v20, 2  ;;  %9306 = vmatmul.mubr.msk.bf16.vlgmr.msra.gmra.mrb[8].mxu0 %vm3697_vm8, %v12660_v31 }
 0x3ba   : > { %v6770_v7 = vsel %vm694_vm4, %v14327_v17, %v14326_v39  ;;  %v12950_v51 = vsel %vm435_vm1, %v14328_v52, 0.0  ;;  %v6776_v17 = vrot.slane %v12891_v24, 2  ;;  %v14333_v52 = vrot.slane %v12514_v0, 2  ;;  %9338 = vmatpush3.bf16.msra.mxu0 %v4707_v21 }
 0x3bb   : > { %v6762_v22 = vsel %vm694_vm4, %v14329_v37, %v6761_v41  ;;  %v6775_v39 = vsel %vm694_vm4, %v14331_v53, %v14330_v57  ;;  %v6767_v33 = vsel %vm694_vm4, %v14332_v60, %v6766_v44  ;;  %v14334_v41 = vrot.slane %v12572_v2, 2  ;;  %v12977_v57 = vld [vmem:[%s13920_s4 + $0x10] sm:$0xf] }
 0x3bc   : > { %v12961_v4 = vpack.c.bf16 %v6762_v22, %v6760_v62  ;;  %v6772_v9 = vsel %vm694_vm4, %v14333_v52, %v6771_v30  ;;  %v14335_v37 = vrot.slane %v12575_v43, 2  ;;  %v12981_v20 = vpack.c.bf16 %v6767_v33, %v6765_v14  ;;  %v14338_v22 = vld [vmem:[#allocation15_spill] sm:$0xff]  ;;  %10510 = vmatprep.subr.msk.bf16.mxu0 %vm3327_vm5, %v12977_v57 }
 0x3bd   : > { %v12983_v60 = vpack.c.bf16 %v6772_v9, %v6770_v7  ;;  %v14337_v62 = vrot.slane %v12527_v32, 2  ;;  %v6781_v30 = vrot.slane %v12896_v6, 2  ;;  %9309 = vmatprep.mubr.msk.bf16.mxu0 %vm3697_vm8, %v14338_v22  ;;  %v14340_v52 = vrot.slane %v12581_v50, 2 }
 0x3be   : > { %v6780_v55 = vsel %vm694_vm4, %v14335_v37, %v14334_v41  ;;  %v14341_v41 = vrot.slane %v12584_v25, 2  ;;  %v6786_v7 = vrot.slane %v12901_v8, 2  ;;  %v14342_v33 = vrot.slane %v12630_v13, 2 }
 0x3bf   : > { %14336 = vst [vmem:[#allocation70_spill] sm:$0xff] %v12983_v60  ;;  %v6777_v44 = vsel %vm694_vm4, %v14337_v62, %v6776_v17  ;;  %v14343_v17 = vrot.slane %v12633_v15, 2  ;;  %v14344_v37 = vrot.slane %v12572_v2, 2  ;;  %v14345_v62 = vrot.slane %v12638_v10, 2  ;;  %9572 = vmatmul.mubr.msk.bf16.gmra.mrb[0].mxu1 %vm465_vm2, %v12876_v19  ;;  %v14370_v19 = vld [vmem:[#allocation63_spill] sm:$0xff] }
 0x3c0   : > { %v12991_v53 = vpack.c.bf16 %v6777_v44, %v6775_v39  ;;  %v6785_v14 = vsel %vm694_vm4, %v14341_v41, %v14340_v52  ;;  %v6791_v39 = vrot.slane %v12906_v45, 2  ;;  %v14346_v44 = vrot.slane %v12641_v42, 2  ;;  %9577 = vmatprep.mubr.msk.bf16.mxu1 %vm465_vm2, %v14240_v29  ;;  %v14368_v29 = vld [vmem:[#allocation22_spill] sm:$0xff] }
 0x3c1   : > { %v6790_v9 = vsel %vm694_vm4, %v14343_v17, %v14342_v33  ;;  %v6782_v21 = vsel %vm694_vm4, %v14344_v37, %v6781_v30  ;;  %v6796_v41 = vrot.slane %v12911_v47, 2  ;;  %v14348_v33 = vrot.slane %v12581_v50, 2  ;;  %9310 = vmatmul.mubr.msk.bf16.gmra.mrb[12].mxu0 %vm3697_vm8, %v14368_v29 }
 0x3c2   : > { %14339 = vst [vmem:[#allocation71_spill] sm:$0xff] %v12991_v53  ;;  %v6795_v52 = vsel %vm694_vm4, %v14346_v44, %v14345_v62  ;;  %v13016_v22 = vpack.c.bf16 %v6782_v21, %v6780_v55  ;;  %v14349_v30 = vrot.slane %v12683_v35, 2  ;;  %v14350_v37 = vrot.slane %v12686_v36, 2 }
 0x3c3   : > { %v6787_v17 = vsel %vm694_vm4, %v14348_v33, %v6786_v7  ;;  %v6801_v53 = vrot.slane %v12921_v11, 2  ;;  %v14351_v62 = vrot.slane %v12704_v58, 7  ;;  %v14353_v55 = vrot.slane %v12630_v13, 2 }
 0x3c4   : > { %14347 = vst [vmem:[#allocation72_spill] sm:$0xff] %v13016_v22  ;;  %v6800_v31 = vsel %vm694_vm4, %v14350_v37, %v14349_v30  ;;  %v13032_v60 = vpack.c.bf16 %v6787_v17, %v6785_v14  ;;  %v14354_v7 = vrot.slane %v12638_v10, 2  ;;  %v14357_v58 = vrot.slane %v12683_v35, 2 }
 0x3c5   : > { %v13030_v44 = vsel %vm435_vm1, %v14351_v62, 0.0  ;;  %v6792_v21 = vsel %vm694_vm4, %v14353_v55, %v6791_v39  ;;  %v14358_v17 = vrot.slane %v12697_v61, 2  ;;  %v14359_v62 = vrot.slane %v12700_v40, 2 }
 0x3c6   : > { %14352 = vst [vmem:[#allocation73_spill] sm:$0xff] %v13032_v60  ;;  %v6797_v33 = vsel %vm694_vm4, %v14354_v7, %v6796_v41  ;;  %v13042_v30 = vpack.c.bf16 %v6792_v21, %v6790_v9  ;;  %v6802_v14 = vsel %vm694_vm4, %v14357_v58, %v6801_v53  ;;  %v14360_v41 = vrot.slane %v12732_v1, 7 }
 0x3c7   : > { %v13044_v37 = vpack.c.bf16 %v6797_v33, %v6795_v52  ;;  %v6805_v39 = vsel %vm694_vm4, %v14359_v62, %v14358_v17  ;;  %v13061_v52 = vpack.c.bf16 %v6802_v14, %v6800_v31  ;;  %v6806_v55 = vrot.slane %v12926_v46, 2  ;;  %9578 = vmatmul.mubr.msk.bf16.vlgmr.msra.gmra.mrb[4].mxu1 %vm465_vm2, %v12884_v48 }
 0x3c8   : > { %14355 = vst [vmem:[#allocation74_spill] sm:$0xff] %v13042_v30  ;;  %v13059_v9 = vsel %vm435_vm1, %v14360_v41, 0.0  ;;  %v14362_v53 = vrot.slane %v12745_v16, 2  ;;  %v14363_v21 = vrot.slane %v12748_v38, 2  ;;  %v6811_v33 = vrot.slane %v12950_v51, 2  ;;  %9610 = vmatpush3.bf16.msra.mxu1 %v12881_v23  ;;  %9581 = vmatprep.mubr.msk.bf16.mxu1 %vm465_vm2, %v12886_v18 }
 0x3c9   : > { %14356 = vst [vmem:[#allocation75_spill] sm:$0xff] %v13044_v37  ;;  %14361 = vst [vmem:[#allocation76_spill] sm:$0xff] %v13061_v52  ;;  %v14364_v58 = vrot.slane %v12755_v54, 2  ;;  %v14365_v17 = vrot.slane %v12758_v28, 2  ;;  %v6816_v62 = vrot.slane %v13030_v44, 2  ;;  %v14366_v31 = vrot.slane %v12802_v12, 2 }
 0x3ca   : > { %v6810_v7 = vsel %vm694_vm4, %v14363_v21, %v14362_v53  ;;  %v14367_v14 = vrot.slane %v12805_v63, 2  ;;  %v14369_v53 = vrot.slane %v12763_v56, 7  ;;  %v14371_v52 = vrot.slane %v14370_v19, 7 }
 0x3cb   : > { %v6815_v1 = vsel %vm694_vm4, %v14365_v17, %v14364_v58  ;;  %v14372_v17 = vrot.slane %v12697_v61, 2  ;;  %v6821_v30 = vrot.slane %v13059_v9, 2  ;;  %v14374_v56 = vrot.slane %v12745_v16, 2 }
 0x3cc   : > { %v6820_v41 = vsel %vm694_vm4, %v14367_v14, %v14366_v31  ;;  %v13086_v21 = vsel %vm435_vm1, %v14369_v53, 0.0  ;;  %v13091_v58 = vsel %vm435_vm1, %v14371_v52, 0.0  ;;  %v14373_v31 = vld [vmem:[#allocation24_spill] sm:$0xff]  ;;  %v14375_v19 = vrot.slane %v12755_v54, 2 }
 0x3cd   : > { %v6807_v37 = vsel %vm694_vm4, %v14372_v17, %v6806_v55  ;;  %9313 = vmatprep.mubr.msk.bf16.mxu0 %vm3697_vm8, %v14373_v31  ;;  %v6812_v53 = vsel %vm694_vm4, %v14374_v56, %v6811_v33  ;;  %v14376_v29 = vrot.slane %v12825_v3, 2  ;;  %v14377_v60 = vrot.slane %v12828_v34, 2 }
 0x3ce   : > { %v13099_v14 = vpack.c.bf16 %v6807_v37, %v6805_v39  ;;  %v6817_v52 = vsel %vm694_vm4, %v14375_v19, %v6816_v62  ;;  %v13112_v17 = vpack.c.bf16 %v6812_v53, %v6810_v7  ;;  %v14379_v37 = vrot.slane %v12802_v12, 2  ;;  %v13132_v7 = vld [vmem:[%s13921_s5 + $0x6] sm:$0x3] }
 0x3cf   : > { %v6825_v55 = vsel %vm694_vm4, %v14377_v60, %v14376_v29  ;;  %v13114_v22 = vpack.c.bf16 %v6817_v52, %v6815_v1  ;;  %v6826_v33 = vrot.slane %v13086_v21, 2  ;;  %v6413_v56 = vrot.slane %v12891_v24, 1  ;;  %10519 = vmatprep.subr.msk.bf16.mxu1 %vm478_vm0, %v13132_v7 }
 0x3d0   : > { %v6822_v39 = vsel %vm694_vm4, %v14379_v37, %v6821_v30  ;;  %v14381_v62 = vrot.slane %v12841_v5, 2  ;;  %v14382_v19 = vrot.slane %v12844_v59, 2  ;;  %v6831_v60 = vrot.slane %v13091_v58, 2 }
 0x3d1   : > { %14378 = vst [vmem:[#allocation63_spill] sm:$0xff] %v13114_v22  ;;  %v13121_v31 = vpack.c.bf16 %v6822_v39, %v6820_v41  ;;  %v14383_v30 = vrot.slane %v12825_v3, 2  ;;  %v14386_v52 = vrot.slane %v12514_v0, 1  ;;  %v14387_v37 = vrot.slane %v12517_v26, 1  ;;  %v14395_v0 = vld [vmem:[#allocation30_spill] sm:$0xff] }
 0x3d2   : > { %v6830_v29 = vsel %vm694_vm4, %v14382_v19, %v14381_v62  ;;  %v14385_v41 = vmov %v14381_v62  ;;  %v14392_v23 = vrot.slane %v12520_v49, 1  ;;  %v6416_v49 = vrot.slane %v12572_v2, 1 }
 0x3d3   : > { %14380 = vst [vmem:[#allocation77_spill] sm:$0xff] %v13121_v31  ;;  %v6827_v1 = vsel %vm694_vm4, %v14383_v30, %v6826_v33  ;;  %v6832_v53 = vsel %vm694_vm4, %v14385_v41, %v6831_v60  ;;  %v6407_v39 = vsel %vm570_vm3, %v14387_v37, %v14386_v52  ;;  %v14388_v33 = vrot.slane %v12849_v27, 1  ;;  %v14394_v27 = vld [vmem:[#allocation29_spill] sm:$0xff] }
 0x3d4   : > { %v13139_v24 = vpack.c.bf16 %v6827_v1, %v6825_v55  ;;  %v14389_v55 = vmov %v14386_v52  ;;  %v13157_v19 = vpack.c.bf16 %v6832_v53, %v6830_v29  ;;  %v14391_v60 = vrot.slane %v12527_v32, 1  ;;  %9314 = vmatmul.mubr.msk.bf16.gmra.mrb[16].mxu0 %vm3697_vm8, %v14394_v27 }
 0x3d5   : > { %v6409_v62 = vsel %vm570_vm3, %v14389_v55, %v14388_v33  ;;  %9317 = vmatprep.mubr.msk.bf16.mxu0 %vm3697_vm8, %v14395_v0  ;;  %v6415_v41 = vrot.slane %v12575_v43, 1  ;;  %v6418_v32 = vrot.slane %v12896_v6, 1  ;;  %v6421_v52 = vrot.slane %v12581_v50, 1  ;;  %v14396_v33 = vld [vmem:[#allocation36_spill] sm:$0xff]  ;;  %v14397_v50 = vld [vmem:[#allocation37_spill] sm:$0xff] }
 0x3d6   : > { %14384 = vst [vmem:[#allocation78_spill] sm:$0xff] %v13139_v24  ;;  %14390 = vst [vmem:[#allocation79_spill] sm:$0xff] %v13157_v19  ;;  %v6412_v30 = vsel %vm570_vm3, %v14392_v23, %v14391_v60  ;;  %v14393_v1 = vmov %v14391_v60  ;;  %v13173_v29 = vpack.c.bf16 %v6409_v62, %v6407_v39  ;;  %v6423_v37 = vrot.slane %v12901_v8, 1 }
 0x3d7   : > { %v6414_v26 = vsel %vm570_vm3, %v14393_v1, %v6413_v56  ;;  %v6420_v56 = vrot.slane %v12584_v25, 1  ;;  %v6417_v43 = vsel %vm570_vm3, %v6415_v41, %v6416_v49  ;;  %v6419_v2 = vsel %vm570_vm3, %v6416_v49, %v6418_v32  ;;  %v14398_v41 = vld [vmem:[#allocation46_spill] sm:$0xff] }
 0x3d8   : > { %v13177_v53 = vpack.c.bf16 %v6414_v26, %v6412_v30  ;;  %9582 = vmatmul.mubr.msk.bf16.gmra.mrb[8].mxu1 %vm465_vm2, %v13173_v29  ;;  %v6424_v6 = vsel %vm570_vm3, %v6421_v52, %v6423_v37  ;;  %v13195_v25 = vpack.c.bf16 %v6419_v2, %v6417_v43  ;;  %v6425_v8 = vrot.slane %v12633_v15, 1 }
 0x3d9   : > { %v6422_v39 = vsel %vm570_vm3, %v6420_v56, %v6421_v52  ;;  %v6426_v55 = vrot.slane %v12630_v13, 1  ;;  %v6428_v60 = vrot.slane %v12906_v45, 1  ;;  %v6430_v23 = vrot.slane %v12641_v42, 1 }
 0x3da   : > { %9585 = vmatprep.mubr.msk.bf16.mxu1 %vm465_vm2, %v13177_v53  ;;  %v13199_v62 = vpack.c.bf16 %v6424_v6, %v6422_v39  ;;  %v6431_v30 = vrot.slane %v12638_v10, 1  ;;  %v6433_v1 = vrot.slane %v12911_v47, 1  ;;  %v14399_v10 = vld [vmem:[#allocation47_spill] sm:$0xff]  ;;  %v6435_v47 = vrot.slane %v12686_v36, 1  ;;  %v14400_v39 = vld [vmem:[#allocation50_spill] sm:$0xff] }
 0x3db   : > { %v6427_v15 = vsel %vm570_vm3, %v6425_v8, %v6426_v55  ;;  %v6429_v13 = vsel %vm570_vm3, %v6426_v55, %v6428_v60  ;;  %v6436_v49 = vrot.slane %v12683_v35, 1  ;;  %v6438_v56 = vrot.slane %v12921_v11, 1 }
 0x3dc   : > { %9318 = vmatmul.mubr.msk.bf16.gmra.mrb[20].mxu0 %vm3697_vm8, %v14396_v33  ;;  %v6432_v26 = vsel %vm570_vm3, %v6430_v23, %v6431_v30  ;;  %v6434_v45 = vsel %vm570_vm3, %v6431_v30, %v6433_v1  ;;  %v13217_v42 = vpack.c.bf16 %v6429_v13, %v6427_v15  ;;  %v6440_v52 = vrot.slane %v12700_v40, 1  ;;  %v14401_v40 = vld [vmem:[#allocation51_spill] sm:$0xff]  ;;  %v14402_v15 = vld [vmem:[#allocation4_spill] sm:$0xff] }
 0x3dd   : > { %9321 = vmatprep.mubr.msk.bf16.mxu0 %vm3697_vm8, %v14397_v50  ;;  %v13221_v32 = vpack.c.bf16 %v6434_v45, %v6432_v26  ;;  %v6441_v37 = vrot.slane %v12697_v61, 1  ;;  %v6443_v43 = vrot.slane %v12926_v46, 1  ;;  %v6437_v36 = vsel %vm570_vm3, %v6435_v47, %v6436_v49 }
 0x3de   : > { %v6439_v35 = vsel %vm570_vm3, %v6436_v49, %v6438_v56  ;;  %v6445_v46 = vrot.slane %v12748_v38, 1  ;;  %v6446_v6 = vrot.slane %v12745_v16, 1  ;;  %v6448_v55 = vrot.slane %v12950_v51, 1 }
 0x3df   : > { %v6442_v2 = vsel %vm570_vm3, %v6440_v52, %v6441_v37  ;;  %v6444_v11 = vsel %vm570_vm3, %v6441_v37, %v6443_v43  ;;  %v13239_v61 = vpack.c.bf16 %v6439_v35, %v6437_v36  ;;  %v6450_v60 = vrot.slane %v12758_v28, 1  ;;  %v14404_v37 = vld [vmem:[#allocation11_spill] sm:$0xff] }
 0x3e0   : > { %9586 = vmatmul.mubr.msk.bf16.gmra.mrb[12].mxu1 %vm465_vm2, %v13195_v25  ;;  %v13243_v8 = vpack.c.bf16 %v6444_v11, %v6442_v2  ;;  %v6451_v23 = vrot.slane %v12755_v54, 1  ;;  %v6453_v30 = vrot.slane %v13030_v44, 1  ;;  %v6447_v38 = vsel %vm570_vm3, %v6445_v46, %v6446_v6  ;;  %v14403_v54 = vld [vmem:[#allocation53_spill] sm:$0xff] }
 0x3e1   : > { %9589 = vmatprep.mubr.msk.bf16.mxu1 %vm465_vm2, %v13199_v62  ;;  %v6449_v16 = vsel %vm570_vm3, %v6446_v6, %v6448_v55  ;;  %v6455_v44 = vrot.slane %v12805_v63, 1  ;;  %v6456_v13 = vrot.slane %v12802_v12, 1  ;;  %v6458_v45 = vrot.slane %v13059_v9, 1  ;;  %v14408_v55 = vld [vmem:[#allocation28_spill] sm:$0xff] }
 0x3e2   : > { %v6452_v1 = vsel %vm570_vm3, %v6450_v60, %v6451_v23  ;;  %v6454_v51 = vsel %vm570_vm3, %v6451_v23, %v6453_v30  ;;  %v13261_v28 = vpack.c.bf16 %v6449_v16, %v6447_v38  ;;  %v6460_v47 = vrot.slane %v12828_v34, 1  ;;  %v14410_v60 = vld [vmem:[#allocation21_spill] sm:$0xff]  ;;  %v6102_v30 = vld [vmem:[%s13921_s5 + $0x8] sm:$0x3]  ;;  %v14412_v16 = vld [vmem:[#allocation26_spill] sm:$0xff] }
 0x3e3   : > { %v13265_v26 = vpack.c.bf16 %v6454_v51, %v6452_v1  ;;  %v6461_v49 = vrot.slane %v12825_v3, 1  ;;  %v6463_v56 = vrot.slane %v13086_v21, 1  ;;  %v6457_v63 = vsel %vm570_vm3, %v6455_v44, %v6456_v13  ;;  %v14405_v3 = vld [vmem:[#allocation5_spill] sm:$0xff]  ;;  %v14414_v1 = vld [vmem:[#allocation71_spill] sm:$0xff]  ;;  %v14416_v44 = vld [vmem:[#allocation34_spill] sm:$0xff] }
 0x3e4   : > { %9322 = vmatmul.mubr.msk.bf16.gmra.mrb[24].mxu0 %vm3697_vm8, %v14398_v41  ;;  %v6459_v12 = vsel %vm570_vm3, %v6456_v13, %v6458_v45  ;;  %v6465_v21 = vrot.slane %v12844_v59, 1  ;;  %v6466_v43 = vrot.slane %v12841_v5, 1  ;;  %v6468_v35 = vrot.slane %v13091_v58, 1  ;;  %v3677_v5 = vld [vmem:[%s13920_s4 + $0x14] sm:$0xf]  ;;  %v14406_v59 = vld [vmem:[#allocation7_spill] sm:$0xff] }
 0x3e5   : > { %9325 = vmatprep.mubr.msk.bf16.mxu0 %vm3697_vm8, %v14399_v10  ;;  %v6462_v52 = vsel %vm570_vm3, %v6460_v47, %v6461_v49  ;;  %v6464_v9 = vsel %vm570_vm3, %v6461_v49, %v6463_v56  ;;  %v13283_v34 = vpack.c.bf16 %v6459_v12, %v6457_v63  ;;  %v4916_v46 = vsel %vm3327_vm5, %v12977_v57, 0  ;;  %v14407_v58 = vld [vmem:[#allocation9_spill] sm:$0xff]  ;;  %v14415_v51 = vld [vmem:[#allocation31_spill] sm:$0xff]  ;;  %v14417_v13 = vld [vmem:[#allocation72_spill] sm:$0xff] }
 0x3e6   : > { %v13287_v36 = vpack.c.bf16 %v6464_v9, %v6462_v52  ;;  %v6467_v2 = vsel %vm570_vm3, %v6465_v21, %v6466_v43  ;;  %v6469_v11 = vsel %vm570_vm3, %v6466_v43, %v6468_v35  ;;  %v14409_v57 = vld [vmem:[#allocation13_spill] sm:$0xff]  ;;  %v7126_v23 = vsel %vm478_vm0, %v13132_v7, 0  ;;  %v14413_v7 = vld [vmem:[#allocation70_spill] sm:$0xff]  ;;  %v14419_v47 = vld [vmem:[#allocation40_spill] sm:$0xff] }
 0x3e7   : > { %v13305_v6 = vpack.c.bf16 %v6469_v11, %v6467_v2  ;;  %v14411_v38 = vld [vmem:[#allocation25_spill] sm:$0xff]  ;;  %v14420_v49 = vld [vmem:[#allocation43_spill] sm:$0xff]  ;;  %v14421_v56 = vld [vmem:[#allocation74_spill] sm:$0xff] }
 0x3e8   : > { %9590 = vmatmul.mubr.msk.bf16.gmra.mrb[16].mxu1 %vm465_vm2, %v13217_v42  ;;  %v14418_v45 = vld [vmem:[#allocation73_spill] sm:$0xff]  ;;  %v14422_v63 = vld [vmem:[#allocation75_spill] sm:$0xff]  ;;  %v14423_v12 = vld [vmem:[#allocation48_spill] sm:$0xff] }
 0x3e9   : > { %9593 = vmatprep.mubr.msk.bf16.mxu1 %vm465_vm2, %v13221_v32  ;;  %v14424_v52 = vld [vmem:[#allocation49_spill] sm:$0xff]  ;;  %v14425_v9 = vld [vmem:[#allocation76_spill] sm:$0xff]  ;;  %v14427_v21 = vld [vmem:[#allocation14_spill] sm:$0xff] }
 0x3ea   : > { %v14428_v43 = vld [vmem:[#allocation18_spill] sm:$0xff]  ;;  %v14429_v35 = vld [vmem:[#allocation17_spill] sm:$0xff] }
 0x3eb   : > { %v13366_v2 = vpack.c.bf16 %v14429_v35, %v14428_v43  ;;  %v14431_v11 = vld [vmem:[#allocation6_spill] sm:$0xff]  ;;  %v14432_v43 = vld [vmem:[#allocation8_spill] sm:$0xff] }
 0x3ec   : > { %9326 = vmatmul.mubr.msk.bf16.gmra.mrb[28].mxu0 %vm3697_vm8, %v14400_v39  ;;  %v14433_v35 = vld [vmem:[#allocation12_spill] sm:$0xff] }
 0x3ed   : > { %9329 = vmatprep.mubr.msk.bf16.mxu0 %vm3697_vm8, %v14401_v40  ;;  %14430 = vst [vmem:[#allocation29_spill] sm:$0xff] %v13366_v2 }
 0x3f0   : > { %9594 = vmatmul.mubr.msk.bf16.gmra.mrb[20].mxu1 %vm465_vm2, %v13239_v61 }
 0x3f1   : > { %9597 = vmatprep.mubr.msk.bf16.mxu1 %vm465_vm2, %v13243_v8 }
 0x3f4   : > { %9330 = vmatmul.mubr.msk.bf16.gmra.mrb[32].mxu0 %vm3697_vm8, %v14402_v15 }
 0x3f5   : > { %9333 = vmatprep.mubr.msk.bf16.mxu0 %vm3697_vm8, %v14403_v54 }
 0x3f8   : > { %9598 = vmatmul.mubr.msk.bf16.gmra.mrb[24].mxu1 %vm465_vm2, %v13261_v28 }
 0x3f9   : > { %9601 = vmatprep.mubr.msk.bf16.mxu1 %vm465_vm2, %v13265_v26 }
 0x3fc   : > { %9334 = vmatmul.mubr.msk.bf16.gmra.mrb[36].mxu0 %vm3697_vm8, %v14404_v37 }
 0x3fd   : > { %9339 = vmatprep.mubr.msk.bf16.mxu0 %vm3697_vm8, %v14405_v3  ;;  %v14426_v3 = vld [vmem:[#allocation52_spill] sm:$0xff] }
 0x400   : > { %9602 = vmatmul.mubr.msk.bf16.gmra.mrb[28].mxu1 %vm465_vm2, %v13283_v34 }
 0x401   : > { %9605 = vmatprep.mubr.msk.bf16.mxu1 %vm465_vm2, %v13287_v36 }
 0x404   : > { %9340 = vmatmul.mubr.msk.bf16.vlgmr.msra.gmra.mrb[8].mxu0 %vm3697_vm8, %v14406_v59 }
 0x405   : > { %9343 = vmatprep.mubr.msk.bf16.mxu0 %vm3697_vm8, %v14407_v58  ;;  %9372 = vmatpush3.bf16.msra.mxu0 %v4916_v46  ;;  %v5123_v46 = vsel %vm3327_vm5, %v3677_v5, 0 }
 0x406   : > { %10511 = vmatprep.subr.msk.bf16.mxu0 %vm3327_vm5, %v3677_v5  ;;  %v14435_v5 = vld [vmem:[#allocation10_spill] sm:$0xff] }
 0x408   : > { %9606 = vmatmul.mubr.msk.bf16.gmra.mrb[0].mxu1 %vm465_vm2, %v13305_v6 }
 0x409   : > { %9611 = vmatprep.mubr.msk.bf16.mxu1 %vm465_vm2, %v14408_v55  ;;  %v14436_v55 = vld [vmem:[#allocation20_spill] sm:$0xff] }
 0x40c   : > { %9344 = vmatmul.mubr.msk.bf16.gmra.mrb[12].mxu0 %vm3697_vm8, %v14409_v57 }
 0x40d   : > { %9347 = vmatprep.mubr.msk.bf16.mxu0 %vm3697_vm8, %v14410_v60 }
 0x410   : > { %9612 = vmatmul.mubr.msk.bf16.vlgmr.msra.gmra.mrb[4].mxu1 %vm465_vm2, %v12961_v4 }
 0x411   : > { %9644 = vmatpush3.bf16.msra.mxu1 %v7126_v23  ;;  %9615 = vmatprep.mubr.msk.bf16.mxu1 %vm465_vm2, %v12981_v20  ;;  %v3678_v23 = vld [vmem:[%s13920_s4 + $0x18] sm:$0xf] }
 0x412   : > { %10520 = vmatprep.subr.msk.bf16.mxu1 %vm478_vm0, %v6102_v30 }
 0x414   : > { %9348 = vmatmul.mubr.msk.bf16.gmra.mrb[16].mxu0 %vm3697_vm8, %v14411_v38 }
 0x415   : > { %9351 = vmatprep.mubr.msk.bf16.mxu0 %vm3697_vm8, %v14412_v16 }
 0x418   : > { %9616 = vmatmul.mubr.msk.bf16.gmra.mrb[8].mxu1 %vm465_vm2, %v14413_v7 }
 0x419   : > { %9619 = vmatprep.mubr.msk.bf16.mxu1 %vm465_vm2, %v14414_v1 }
 0x41c   : > { %9352 = vmatmul.mubr.msk.bf16.gmra.mrb[20].mxu0 %vm3697_vm8, %v14415_v51 }
 0x41d   : > { %9355 = vmatprep.mubr.msk.bf16.mxu0 %vm3697_vm8, %v14416_v44 }
 0x420   : > { %9620 = vmatmul.mubr.msk.bf16.gmra.mrb[12].mxu1 %vm465_vm2, %v14417_v13 }
 0x421   : > { %9623 = vmatprep.mubr.msk.bf16.mxu1 %vm465_vm2, %v14418_v45 }
 0x424   : > { %9356 = vmatmul.mubr.msk.bf16.gmra.mrb[24].mxu0 %vm3697_vm8, %v14419_v47 }
 0x425   : > { %9359 = vmatprep.mubr.msk.bf16.mxu0 %vm3697_vm8, %v14420_v49 }
 0x428   : > { %9624 = vmatmul.mubr.msk.bf16.gmra.mrb[16].mxu1 %vm465_vm2, %v14421_v56 }
 0x429   : > { %9627 = vmatprep.mubr.msk.bf16.mxu1 %vm465_vm2, %v14422_v63 }
 0x42c   : > { %9360 = vmatmul.mubr.msk.bf16.gmra.mrb[28].mxu0 %vm3697_vm8, %v14423_v12 }
 0x42d   : > { %9363 = vmatprep.mubr.msk.bf16.mxu0 %vm3697_vm8, %v14424_v52 }
 0x430   : > { %9628 = vmatmul.mubr.msk.bf16.gmra.mrb[20].mxu1 %vm465_vm2, %v14425_v9 }
 0x431   : > { %9631 = vmatprep.mubr.msk.bf16.mxu1 %vm465_vm2, %v13099_v14 }
 0x434   : > { %9364 = vmatmul.mubr.msk.bf16.gmra.mrb[32].mxu0 %vm3697_vm8, %v14426_v3 }
 0x435   : > { %9367 = vmatprep.mubr.msk.bf16.mxu0 %vm3697_vm8, %v14427_v21  ;;  %v14463_v21 = vld [vmem:[#allocation15_spill] sm:$0xff] }
 0x438   : > { %9632 = vmatmul.mubr.msk.bf16.gmra.mrb[24].mxu1 %vm465_vm2, %v13112_v17 }
 0x439   : > { %9635 = vmatprep.mubr.msk.bf16.mxu1 %vm465_vm2, %v13114_v22 }
 0x43c   : > { %9368 = vmatmul.mubr.msk.bf16.gmra.mrb[36].mxu0 %vm3697_vm8, %v13366_v2  ;;  %v5319_v2 = vsel %vm3327_vm5, %v3678_v23, 0 }
 0x43d   : > { %9373 = vmatprep.mubr.msk.bf16.mxu0 %vm3697_vm8, %v14431_v11  ;;  %v14434_v11 = vld [vmem:[#allocation39_spill] sm:$0xff] }
 0x440   : > { %9636 = vmatmul.mubr.msk.bf16.gmra.mrb[28].mxu1 %vm465_vm2, %v13121_v31  ;;  %v14459_v31 = vld [vmem:[#allocation19_spill] sm:$0xff] }
 0x441   : > { %9639 = vmatprep.mubr.msk.bf16.mxu1 %vm465_vm2, %v13139_v24  ;;  %v7335_v24 = vsel %vm478_vm0, %v6102_v30, 0  ;;  %v14441_v30 = vld [vmem:[#allocation41_spill] sm:$0xff] }
 0x444   : > { %9374 = vmatmul.mubr.msk.bf16.vlgmr.msra.gmra.mrb[8].mxu0 %vm3697_vm8, %v14432_v43  ;;  %v14443_v43 = vld [vmem:[#allocation33_spill] sm:$0xff] }
 0x445   : > { %9377 = vmatprep.mubr.msk.bf16.mxu0 %vm3697_vm8, %v14433_v35  ;;  %9406 = vmatpush3.bf16.msra.mxu0 %v5123_v46  ;;  %v6103_v46 = vld [vmem:[%s13921_s5 + $0xa] sm:$0x3]  ;;  %v14437_v35 = vld [vmem:[#allocation2_spill] sm:$0xff] }
 0x446   : > { %10512 = vmatprep.subr.msk.bf16.mxu0 %vm3327_vm5, %v3678_v23 }
 0x448   : > { %9640 = vmatmul.mubr.msk.bf16.gmra.mrb[0].mxu1 %vm465_vm2, %v13157_v19  ;;  %v14438_v19 = vld [vmem:[#allocation42_spill] sm:$0xff] }
 0x449   : > { %9645 = vmatprep.mubr.msk.bf16.mxu1 %vm465_vm2, %v14434_v11  ;;  %v14439_v11 = vld [vmem:[#allocation27_spill] sm:$0xff] }
 0x44c   : > { %9378 = vmatmul.mubr.msk.bf16.gmra.mrb[12].mxu0 %vm3697_vm8, %v14435_v5  ;;  %v14440_v5 = vld [vmem:[#allocation32_spill] sm:$0xff] }
 0x44d   : > { %9381 = vmatprep.mubr.msk.bf16.mxu0 %vm3697_vm8, %v14436_v55  ;;  %v14442_v55 = vld [vmem:[#allocation56_spill] sm:$0xff] }
 0x450   : > { %9646 = vmatmul.mubr.msk.bf16.vlgmr.msra.gmra.mrb[4].mxu1 %vm465_vm2, %v14437_v35  ;;  %v14452_v35 = vld [vmem:[#allocation54_spill] sm:$0xff] }
 0x451   : > { %9678 = vmatpush3.bf16.msra.mxu1 %v7335_v24  ;;  %9649 = vmatprep.mubr.msk.bf16.mxu1 %vm465_vm2, %v14438_v19  ;;  %v14444_v24 = vld [vmem:[#allocation35_spill] sm:$0xff]  ;;  %v14445_v19 = vld [vmem:[#allocation57_spill] sm:$0xff] }
 0x452   : > { %10521 = vmatprep.subr.msk.bf16.mxu1 %vm478_vm0, %v6103_v46 }
 0x454   : > { %9382 = vmatmul.mubr.msk.bf16.gmra.mrb[16].mxu0 %vm3697_vm8, %v14439_v11  ;;  %v14446_v11 = vld [vmem:[#allocation58_spill] sm:$0xff] }
 0x455   : > { %9385 = vmatprep.mubr.msk.bf16.mxu0 %vm3697_vm8, %v14440_v5  ;;  %v14447_v5 = vld [vmem:[#allocation38_spill] sm:$0xff] }
 0x458   : > { %9650 = vmatmul.mubr.msk.bf16.gmra.mrb[8].mxu1 %vm465_vm2, %v14441_v30  ;;  %v14448_v30 = vld [vmem:[#allocation44_spill] sm:$0xff] }
 0x459   : > { %9653 = vmatprep.mubr.msk.bf16.mxu1 %vm465_vm2, %v14442_v55  ;;  %v14449_v55 = vld [vmem:[#allocation60_spill] sm:$0xff] }
 0x45c   : > { %9386 = vmatmul.mubr.msk.bf16.gmra.mrb[20].mxu0 %vm3697_vm8, %v14443_v43  ;;  %v14450_v43 = vld [vmem:[#allocation61_spill] sm:$0xff] }
 0x45d   : > { %9389 = vmatprep.mubr.msk.bf16.mxu0 %vm3697_vm8, %v14444_v24  ;;  %v14451_v24 = vld [vmem:[#allocation45_spill] sm:$0xff] }
 0x460   : > { %9654 = vmatmul.mubr.msk.bf16.gmra.mrb[12].mxu1 %vm465_vm2, %v14445_v19  ;;  %v14453_v19 = vld [vmem:[#allocation62_spill] sm:$0xff] }
 0x461   : > { %9657 = vmatprep.mubr.msk.bf16.mxu1 %vm465_vm2, %v14446_v11  ;;  %v14454_v11 = vld [vmem:[#allocation65_spill] sm:$0xff] }
 0x464   : > { %9390 = vmatmul.mubr.msk.bf16.gmra.mrb[24].mxu0 %vm3697_vm8, %v14447_v5  ;;  %v14455_v5 = vld [vmem:[#allocation55_spill] sm:$0xff] }
 0x465   : > { %9393 = vmatprep.mubr.msk.bf16.mxu0 %vm3697_vm8, %v14448_v30  ;;  %v14456_v30 = vld [vmem:[#allocation64_spill] sm:$0xff] }
 0x468   : > { %9658 = vmatmul.mubr.msk.bf16.gmra.mrb[16].mxu1 %vm465_vm2, %v14449_v55  ;;  %v14457_v55 = vld [vmem:[#allocation66_spill] sm:$0xff] }
 0x469   : > { %9661 = vmatprep.mubr.msk.bf16.mxu1 %vm465_vm2, %v14450_v43  ;;  %v14458_v43 = vld [vmem:[#allocation67_spill] sm:$0xff] }
 0x46c   : > { %9394 = vmatmul.mubr.msk.bf16.gmra.mrb[28].mxu0 %vm3697_vm8, %v14451_v24  ;;  %v5936_v24 = vld [vmem:[%s12390_s26 + $0xf0] sm:$0xff] }
 0x46d   : > { %9397 = vmatprep.mubr.msk.bf16.mxu0 %vm3697_vm8, %v14452_v35  ;;  %v5937_v35 = vld [vmem:[%s12390_s26 + $0xf8] sm:$0xff] }
 0x46e   : > { %v6016_v22 = vrot.slane %v5937_v35, 7  ;;  %v10576_v35 = vld [vmem:[%s13920_s4 + $0x1c] sm:$0xf] }
 0x470   : > { %9662 = vmatmul.mubr.msk.bf16.gmra.mrb[20].mxu1 %vm465_vm2, %v14453_v19  ;;  %v14460_v19 = vld [vmem:[#allocation59_spill] sm:$0xff] }
 0x471   : > { %9665 = vmatprep.mubr.msk.bf16.mxu1 %vm465_vm2, %v14454_v11  ;;  %v6015_v11 = vrot.slane %v5936_v24, 7  ;;  %v6097_v24 = vsel %vm435_vm1, %v6016_v22, 0.0 }
 0x474   : > { %9398 = vmatmul.mubr.msk.bf16.gmra.mrb[32].mxu0 %vm3697_vm8, %v14455_v5  ;;  %v14461_v5 = vld [vmem:[#allocation68_spill] sm:$0xff] }
 0x475   : > { %9401 = vmatprep.mubr.msk.bf16.mxu0 %vm3697_vm8, %v14456_v30  ;;  %v14462_v30 = vld [vmem:[#allocation69_spill] sm:$0xff] }
 0x478   : > { %9666 = vmatmul.mubr.msk.bf16.gmra.mrb[24].mxu1 %vm465_vm2, %v14457_v55  ;;  %v6017_v55 = vsel %vm435_vm1, %v6015_v11, %v6016_v22  ;;  %v14467_v22 = vld [vmem:[#allocation23_spill] sm:$0xff] }
 0x479   : > { %9669 = vmatprep.mubr.msk.bf16.mxu1 %vm465_vm2, %v14458_v43  ;;  %v6081_v43 = vsel %vm435_vm1, 0.0, %v6015_v11  ;;  %v7531_v23 = vrot.slane %v6017_v55, 2 }
 0x47a   : > { %v7530_v11 = vrot.slane %v6081_v43, 2 }
 0x47c   : > { %9402 = vmatmul.mubr.msk.bf16.gmra.mrb[36].mxu0 %vm3697_vm8, %v14459_v31  ;;  %v14464_v31 = vld [vmem:[#allocation22_spill] sm:$0xff] }
 0x47d   : > { %9407 = vmatprep.mubr.msk.bf16.mxu0 %vm3697_vm8, %v14460_v19  ;;  %v13461_v19 = vpack.c.bf16 %v6017_v55, %v6081_v43 }
 0x47f   : > { %14465 = vst [vmem:[#allocation30_spill] sm:$0xff] %v13461_v19 }
 0x480   : > { %9670 = vmatmul.mubr.msk.bf16.gmra.mrb[28].mxu1 %vm465_vm2, %v14461_v5 }
 0x481   : > { %9673 = vmatprep.mubr.msk.bf16.mxu1 %vm465_vm2, %v14462_v30  ;;  %v6104_v30 = vld [vmem:[%s13921_s5 + $0xc] sm:$0x3] }
 0x484   : > { %9408 = vmatmul.mubr.msk.bf16.vlgmr.msra.gmra.mrb[8].mxu0 %vm3697_vm8, %v14463_v21  ;;  %v14466_v21 = vld [vmem:[#allocation24_spill] sm:$0xff] }
 0x485   : > { %9411 = vmatprep.mubr.msk.bf16.mxu0 %vm3697_vm8, %v14464_v31  ;;  %9440 = vmatpush3.bf16.msra.mxu0 %v5319_v2  ;;  %v7532_v2 = vsel %vm694_vm4, %v7530_v11, %v7531_v23  ;;  %v7533_v31 = vrot.slane %v6097_v24, 2  ;;  %v14488_v11 = vld [vmem:[#allocation35_spill] sm:$0xff] }
 0x486   : > { %10513 = vmatprep.subr.msk.bf16.mxu0 %vm3327_vm5, %v10576_v35  ;;  %v7542_v35 = vsel %vm478_vm0, %v6103_v46, 0  ;;  %v14485_v46 = vld [vmem:[#allocation33_spill] sm:$0xff] }
 0x488   : > { %9674 = vmatmul.mubr.msk.bf16.gmra.mrb[0].mxu1 %vm465_vm2, %v13461_v19  ;;  %v7534_v19 = vsel %vm694_vm4, %v7531_v23, %v7533_v31  ;;  %v14489_v23 = vld [vmem:[#allocation38_spill] sm:$0xff]  ;;  %v14493_v31 = vld [vmem:[#allocation45_spill] sm:$0xff] }
 0x489   : > { %9679 = vmatprep.mubr.msk.bf16.mxu1 %vm465_vm2, %v12884_v48  ;;  %v13482_v48 = vpack.c.bf16 %v7534_v19, %v7532_v2  ;;  %v14487_v19 = vld [vmem:[#allocation57_spill] sm:$0xff]  ;;  %v14492_v2 = vld [vmem:[#allocation44_spill] sm:$0xff] }
 0x48c   : > { %9412 = vmatmul.mubr.msk.bf16.gmra.mrb[12].mxu0 %vm3697_vm8, %v14466_v21  ;;  %v14490_v21 = vld [vmem:[#allocation58_spill] sm:$0xff] }
 0x48d   : > { %9415 = vmatprep.mubr.msk.bf16.mxu0 %vm3697_vm8, %v14394_v27  ;;  %v7323_v27 = vrot.slane %v6081_v43, 1  ;;  %v14484_v43 = vld [vmem:[#allocation32_spill] sm:$0xff] }
 0x490   : > { %9680 = vmatmul.mubr.msk.bf16.vlgmr.msra.gmra.mrb[4].mxu1 %vm465_vm2, %v12886_v18 }
 0x491   : > { %9712 = vmatpush3.bf16.msra.mxu1 %v7542_v35  ;;  %9683 = vmatprep.mubr.msk.bf16.mxu1 %vm465_vm2, %v13173_v29  ;;  %v14494_v35 = vld [vmem:[#allocation61_spill] sm:$0xff] }
 0x492   : > { %10522 = vmatprep.subr.msk.bf16.mxu1 %vm478_vm0, %v6104_v30 }
 0x494   : > { %9416 = vmatmul.mubr.msk.bf16.gmra.mrb[16].mxu0 %vm3697_vm8, %v14395_v0  ;;  %v7324_v0 = vrot.slane %v6017_v55, 1  ;;  %v14474_v55 = vld [vmem:[#allocation8_spill] sm:$0xff] }
 0x495   : > { %9419 = vmatprep.mubr.msk.bf16.mxu0 %vm3697_vm8, %v14396_v33  ;;  %v7326_v33 = vrot.slane %v6097_v24, 1  ;;  %v14491_v24 = vld [vmem:[#allocation60_spill] sm:$0xff] }
 0x498   : > { %9684 = vmatmul.mubr.msk.bf16.gmra.mrb[8].mxu1 %vm465_vm2, %v13177_v53 }
 0x499   : > { %9687 = vmatprep.mubr.msk.bf16.mxu1 %vm465_vm2, %v13195_v25 }
 0x49c   : > { %9420 = vmatmul.mubr.msk.bf16.gmra.mrb[20].mxu0 %vm3697_vm8, %v14397_v50  ;;  %v7325_v50 = vsel %vm570_vm3, %v7323_v27, %v7324_v0  ;;  %v14496_v27 = vld [vmem:[#allocation54_spill] sm:$0xff] }
 0x49d   : > { %9423 = vmatprep.mubr.msk.bf16.mxu0 %vm3697_vm8, %v14398_v41  ;;  %v7327_v41 = vsel %vm570_vm3, %v7324_v0, %v7326_v33  ;;  %v14497_v0 = vld [vmem:[#allocation55_spill] sm:$0xff]  ;;  %v14498_v33 = vld [vmem:[#allocation65_spill] sm:$0xff] }
 0x4a0   : > { %9688 = vmatmul.mubr.msk.bf16.gmra.mrb[12].mxu1 %vm465_vm2, %v13199_v62 }
 0x4a1   : > { %9691 = vmatprep.mubr.msk.bf16.mxu1 %vm465_vm2, %v13217_v42 }
 0x4a4   : > { %9424 = vmatmul.mubr.msk.bf16.gmra.mrb[24].mxu0 %vm3697_vm8, %v14399_v10  ;;  %v13543_v10 = vpack.c.bf16 %v7327_v41, %v7325_v50  ;;  %v14499_v50 = vld [vmem:[#allocation66_spill] sm:$0xff]  ;;  %v14500_v41 = vld [vmem:[#allocation64_spill] sm:$0xff] }
 0x4a5   : > { %9427 = vmatprep.mubr.msk.bf16.mxu0 %vm3697_vm8, %v14400_v39  ;;  %v14468_v39 = vld [vmem:[#allocation3_spill] sm:$0xff] }
 0x4a8   : > { %9692 = vmatmul.mubr.msk.bf16.gmra.mrb[16].mxu1 %vm465_vm2, %v13221_v32 }
 0x4a9   : > { %9695 = vmatprep.mubr.msk.bf16.mxu1 %vm465_vm2, %v13239_v61 }
 0x4ac   : > { %9428 = vmatmul.mubr.msk.bf16.gmra.mrb[28].mxu0 %vm3697_vm8, %v14401_v40  ;;  %v7738_v40 = vsel %vm478_vm0, %v6104_v30, 0  ;;  %v14486_v30 = vld [vmem:[#allocation56_spill] sm:$0xff] }
 0x4ad   : > { %9431 = vmatprep.mubr.msk.bf16.mxu0 %vm3697_vm8, %v14402_v15  ;;  %v6105_v15 = vld [vmem:[%s13921_s5 + $0xe] sm:$0x3] }
 0x4b0   : > { %9696 = vmatmul.mubr.msk.bf16.gmra.mrb[20].mxu1 %vm465_vm2, %v13243_v8 }
 0x4b1   : > { %9699 = vmatprep.mubr.msk.bf16.mxu1 %vm465_vm2, %v13261_v28 }
 0x4b4   : > { %9432 = vmatmul.mubr.msk.bf16.gmra.mrb[32].mxu0 %vm3697_vm8, %v14403_v54  ;;  %v14470_v54 = vld [vmem:[#allocation29_spill] sm:$0xff] }
 0x4b5   : > { %9435 = vmatprep.mubr.msk.bf16.mxu0 %vm3697_vm8, %v14404_v37  ;;  %v14471_v37 = vld [vmem:[#allocation63_spill] sm:$0xff] }
 0x4b8   : > { %9700 = vmatmul.mubr.msk.bf16.gmra.mrb[24].mxu1 %vm465_vm2, %v13265_v26 }
 0x4b9   : > { %9703 = vmatprep.mubr.msk.bf16.mxu1 %vm465_vm2, %v13283_v34 }
 0x4bc   : > { %9436 = vmatmul.mubr.msk.bf16.gmra.mrb[36].mxu0 %vm3697_vm8, %v14467_v22  ;;  %v14495_v22 = vld [vmem:[#allocation62_spill] sm:$0xff] }
 0x4bd   : > { %9441 = vmatprep.mubr.msk.bf16.mxu0 %vm3697_vm8, %v14406_v59  ;;  %v14472_v59 = vld [vmem:[#allocation77_spill] sm:$0xff] }
 0x4c0   : > { %9704 = vmatmul.mubr.msk.bf16.gmra.mrb[28].mxu1 %vm465_vm2, %v13287_v36 }
 0x4c1   : > { %9707 = vmatprep.mubr.msk.bf16.mxu1 %vm465_vm2, %v13305_v6 }
 0x4c4   : > { %9442 = vmatmul.mubr.msk.bf16.vlgmr.msra.gmra.mrb[8].mxu0 %vm3697_vm8, %v14407_v58  ;;  %v14473_v58 = vmov 0.0|0.0  }
 0x4c5   : > { %9445 = vmatprep.mubr.msk.bf16.mxu0 %vm3697_vm8, %v14409_v57  ;;  %9474 = vmatpush3.bf16.msra.mxu0 %v14468_v39  ;;  %v14475_v57 = vld [vmem:[#allocation78_spill] sm:$0xff]  ;;  %v14501_v39 = vld [vmem:[#allocation67_spill] sm:$0xff] }
 0x4c8   : > { %9708 = vmatmul.mubr.msk.bf16.gmra.mrb[0].mxu1 %vm465_vm2, %v13543_v10 }
 0x4c9   : > { %9713 = vmatprep.mubr.msk.bf16.mxu1 %vm465_vm2, %v12961_v4  ;;  %v14469_v4 = vld [vmem:[#allocation14_spill] sm:$0xff] }
 0x4cc   : > { %9446 = vmatmul.mubr.msk.bf16.gmra.mrb[12].mxu0 %vm3697_vm8, %v14410_v60  ;;  %v14476_v60 = vld [vmem:[#allocation79_spill] sm:$0xff] }
 0x4cd   : > { %9449 = vmatprep.mubr.msk.bf16.mxu0 %vm3697_vm8, %v14411_v38  ;;  %v14477_v38 = vld [vmem:[#allocation12_spill] sm:$0xff] }
 0x4d0   : > { %9714 = vmatmul.mubr.msk.bf16.vlgmr.msra.gmra.mrb[4].mxu1 %vm465_vm2, %v12981_v20 }
 0x4d1   : > { %9746 = vmatpush3.bf16.msra.mxu1 %v7738_v40  ;;  %9717 = vmatprep.mubr.msk.bf16.mxu1 %vm465_vm2, %v14413_v7  ;;  %v14502_v40 = vld [vmem:[#allocation69_spill] sm:$0xff] }
 0x4d2   : > { %10523 = vmatprep.subr.msk.bf16.mxu1 %vm478_vm0, %v6105_v15 }
 0x4d4   : > { %9450 = vmatmul.mubr.msk.bf16.gmra.mrb[16].mxu0 %vm3697_vm8, %v14412_v16  ;;  %v14478_v16 = vld [vmem:[#allocation10_spill] sm:$0xff] }
 0x4d5   : > { %9453 = vmatprep.mubr.msk.bf16.mxu0 %vm3697_vm8, %v14415_v51  ;;  %v14479_v51 = vld [vmem:[#allocation2_spill] sm:$0xff] }
 0x4d8   : > { %9718 = vmatmul.mubr.msk.bf16.gmra.mrb[8].mxu1 %vm465_vm2, %v14414_v1 }
 0x4d9   : > { %9721 = vmatprep.mubr.msk.bf16.mxu1 %vm465_vm2, %v14417_v13 }
 0x4dc   : > { %9454 = vmatmul.mubr.msk.bf16.gmra.mrb[20].mxu0 %vm3697_vm8, %v14416_v44  ;;  %v14480_v44 = vld [vmem:[#allocation20_spill] sm:$0xff] }
 0x4dd   : > { %9457 = vmatprep.mubr.msk.bf16.mxu0 %vm3697_vm8, %v14419_v47  ;;  %v14481_v47 = vld [vmem:[#allocation27_spill] sm:$0xff] }
 0x4e0   : > { %9722 = vmatmul.mubr.msk.bf16.gmra.mrb[12].mxu1 %vm465_vm2, %v14418_v45 }
 0x4e1   : > { %9725 = vmatprep.mubr.msk.bf16.mxu1 %vm465_vm2, %v14421_v56 }
 0x4e4   : > { %9458 = vmatmul.mubr.msk.bf16.gmra.mrb[24].mxu0 %vm3697_vm8, %v14420_v49  ;;  %v7934_v49 = vsel %vm478_vm0, %v6105_v15, 0  ;;  %v14503_v15 = vld [vmem:[#allocation30_spill] sm:$0xff] }
 0x4e5   : > { %9461 = vmatprep.mubr.msk.bf16.mxu0 %vm3697_vm8, %v14423_v12  ;;  %v6106_v12 = vld [vmem:[%s13921_s5 + $0x10] sm:$0x3] }
 0x4e8   : > { %9726 = vmatmul.mubr.msk.bf16.gmra.mrb[16].mxu1 %vm465_vm2, %v14422_v63 }
 0x4e9   : > { %9729 = vmatprep.mubr.msk.bf16.mxu1 %vm465_vm2, %v14425_v9 }
 0x4ec   : > { %9462 = vmatmul.mubr.msk.bf16.gmra.mrb[28].mxu0 %vm3697_vm8, %v14424_v52  ;;  %v14482_v52 = vld [vmem:[#allocation42_spill] sm:$0xff] }
 0x4ed   : > { %9465 = vmatprep.mubr.msk.bf16.mxu0 %vm3697_vm8, %v14426_v3  ;;  %v14483_v3 = vld [vmem:[#allocation41_spill] sm:$0xff] }
 0x4f0   : > { %9730 = vmatmul.mubr.msk.bf16.gmra.mrb[20].mxu1 %vm465_vm2, %v13099_v14 }
 0x4f1   : > { %9733 = vmatprep.mubr.msk.bf16.mxu1 %vm465_vm2, %v13112_v17 }
 0x4f4   : > { %9466 = vmatmul.mubr.msk.bf16.gmra.mrb[32].mxu0 %vm3697_vm8, %v14469_v4  ;;  %v8130_v4 = vsel %vm478_vm0, %v6106_v12, 0 }
 0x4f5   : > { %9469 = vmatprep.mubr.msk.bf16.mxu0 %vm3697_vm8, %v14470_v54 }
 0x4f8   : > { %9734 = vmatmul.mubr.msk.bf16.gmra.mrb[24].mxu1 %vm465_vm2, %v14471_v37 }
 0x4f9   : > { %9737 = vmatprep.mubr.msk.bf16.mxu1 %vm465_vm2, %v14472_v59 }
 0x4fc   : > { %9470 = vmatmul.mubr.bf16.gmra.mrb[36].mxu0 %v14473_v58 }
 0x4fd   : > { %9475 = vmatprep.mubr.msk.bf16.mxu0 %vm3697_vm8, %v14474_v55 }
 0x500   : > { %9738 = vmatmul.mubr.msk.bf16.gmra.mrb[28].mxu1 %vm465_vm2, %v14475_v57 }
 0x501   : > { %9741 = vmatprep.mubr.msk.bf16.mxu1 %vm465_vm2, %v14476_v60 }
 0x504   : > { %9476 = vmatmul.mubr.msk.bf16.vlgmr.msra.gmra.mrb[8].mxu0 %vm3697_vm8, %v14477_v38  ;;  %v13786_v38 = vld [vmem:[%s13922_s6] ss:$0 sm:$0xff] }
 0x505   : > { %9479 = vmatprep.mubr.msk.bf16.mxu0 %vm3697_vm8, %v14478_v16 }
 0x508   : > { %9742 = vmatmul.mubr.msk.bf16.gmra.mrb[0].mxu1 %vm465_vm2, %v13482_v48 }
 0x509   : > { %9747 = vmatprep.mubr.msk.bf16.mxu1 %vm465_vm2, %v14479_v51 }
 0x50c   : > { %9480 = vmatmul.mubr.msk.bf16.gmra.mrb[12].mxu0 %vm3697_vm8, %v14480_v44 }
 0x50d   : > { %9483 = vmatprep.mubr.msk.bf16.mxu0 %vm3697_vm8, %v14481_v47 }
 0x510   : > { %9748 = vmatmul.mubr.msk.bf16.vlgmr.msra.gmra.mrb[4].mxu1 %vm465_vm2, %v14482_v52 }
 0x511   : > { %9780 = vmatpush3.bf16.msra.mxu1 %v7934_v49  ;;  %9751 = vmatprep.mubr.msk.bf16.mxu1 %vm465_vm2, %v14483_v3 }
 0x512   : > { %10524 = vmatprep.subr.msk.bf16.mxu1 %vm478_vm0, %v6106_v12 }
 0x514   : > { %9484 = vmatmul.mubr.msk.bf16.gmra.mrb[16].mxu0 %vm3697_vm8, %v14484_v43 }
 0x515   : > { %9487 = vmatprep.mubr.msk.bf16.mxu0 %vm3697_vm8, %v14485_v46 }
 0x518   : > { %9752 = vmatmul.mubr.msk.bf16.gmra.mrb[8].mxu1 %vm465_vm2, %v14486_v30 }
 0x519   : > { %9755 = vmatprep.mubr.msk.bf16.mxu1 %vm465_vm2, %v14487_v19 }
 0x51c   : > { %9488 = vmatmul.mubr.msk.bf16.gmra.mrb[20].mxu0 %vm3697_vm8, %v14488_v11 }
 0x51d   : > { %9491 = vmatprep.mubr.msk.bf16.mxu0 %vm3697_vm8, %v14489_v23 }
 0x520   : > { %9756 = vmatmul.mubr.msk.bf16.gmra.mrb[12].mxu1 %vm465_vm2, %v14490_v21 }
 0x521   : > { %9759 = vmatprep.mubr.msk.bf16.mxu1 %vm465_vm2, %v14491_v24 }
 0x524   : > { %9492 = vmatmul.mubr.msk.bf16.gmra.mrb[24].mxu0 %vm3697_vm8, %v14492_v2 }
 0x525   : > { %9495 = vmatprep.mubr.msk.bf16.mxu0 %vm3697_vm8, %v14493_v31 }
 0x528   : > { %9760 = vmatmul.mubr.msk.bf16.gmra.mrb[16].mxu1 %vm465_vm2, %v14494_v35 }
 0x529   : > { %9763 = vmatprep.mubr.msk.bf16.mxu1 %vm465_vm2, %v14495_v22 }
 0x52c   : > { %9496 = vmatmul.mubr.msk.bf16.gmra.mrb[28].mxu0 %vm3697_vm8, %v14496_v27 }
 0x52d   : > { %9499 = vmatprep.mubr.msk.bf16.mxu0 %vm3697_vm8, %v14497_v0 }
 0x530   : > { %9764 = vmatmul.mubr.msk.bf16.gmra.mrb[20].mxu1 %vm465_vm2, %v14498_v33 }
 0x531   : > { %9767 = vmatprep.mubr.msk.bf16.mxu1 %vm465_vm2, %v14499_v50 }
 0x534   : > { %9500 = vmatmul.mubr.msk.bf16.gmra.mrb[32].mxu0 %vm3697_vm8, %v14500_v41 }
 0x538   : > { %9768 = vmatmul.mubr.msk.bf16.gmra.mrb[24].mxu1 %vm465_vm2, %v14501_v39 }
 0x539   : > { %9771 = vmatprep.mubr.msk.bf16.mxu1 %vm465_vm2, %v14461_v5 }
 0x540   : > { %9772 = vmatmul.mubr.msk.bf16.gmra.mrb[28].mxu1 %vm465_vm2, %v14502_v40 }
 0x541   : > { %9775 = vmatprep.mubr.msk.bf16.mxu1 %vm465_vm2, %v14503_v15 }
 0x548   : > { %9776 = vmatmul.mubr.bf16.gmra.mrb[0].mxu1 %v14473_v58 }
 0x549   : > { %9781 = vmatprep.mubr.msk.bf16.mxu1 %vm465_vm2, %v12886_v18  ;;  %v14504_v18 = vld [vmem:[#allocation16_spill] sm:$0xff] }
 0x550   : > { %9782 = vmatmul.mubr.msk.bf16.vlgmr.msra.gmra.mrb[4].mxu1 %vm465_vm2, %v13173_v29 }
 0x551   : > { %9814 = vmatpush3.bf16.msra.mxu1 %v8130_v4  ;;  %9785 = vmatprep.mubr.msk.bf16.mxu1 %vm465_vm2, %v13177_v53 }
 0x558   : > { %9786 = vmatmul.mubr.msk.bf16.gmra.mrb[8].mxu1 %vm465_vm2, %v13195_v25 }
 0x559   : > { %9789 = vmatprep.mubr.msk.bf16.mxu1 %vm465_vm2, %v13199_v62 }
 0x560   : > { %9790 = vmatmul.mubr.msk.bf16.gmra.mrb[12].mxu1 %vm465_vm2, %v13217_v42 }
 0x561   : > { %9793 = vmatprep.mubr.msk.bf16.mxu1 %vm465_vm2, %v13221_v32 }
 0x568   : > { %9794 = vmatmul.mubr.msk.bf16.gmra.mrb[16].mxu1 %vm465_vm2, %v13239_v61 }
 0x569   : > { %9797 = vmatprep.mubr.msk.bf16.mxu1 %vm465_vm2, %v13243_v8 }
 0x570   : > { %9798 = vmatmul.mubr.msk.bf16.gmra.mrb[20].mxu1 %vm465_vm2, %v13261_v28 }
 0x571   : > { %9801 = vmatprep.mubr.msk.bf16.mxu1 %vm465_vm2, %v13265_v26 }
 0x578   : > { %9802 = vmatmul.mubr.msk.bf16.gmra.mrb[24].mxu1 %vm465_vm2, %v13283_v34 }
 0x579   : > { %9805 = vmatprep.mubr.msk.bf16.mxu1 %vm465_vm2, %v13287_v36 }
 0x580   : > { %9806 = vmatmul.mubr.msk.bf16.gmra.mrb[28].mxu1 %vm465_vm2, %v13305_v6 }
 0x581   : > { %9809 = vmatprep.mubr.msk.bf16.mxu1 %vm465_vm2, %v13543_v10 }
 0x588   : > { %9810 = vmatmul.mubr.msk.bf16.gmra.mrb[0].mxu1 %vm465_vm2, %v14504_v18 }
 0x589   : > { %9815 = vmatprep.mubr.msk.bf16.mxu1 %vm465_vm2, %v12981_v20  ;;  %v14505_v20 = vld [vmem:[#allocation28_spill] sm:$0xff] }
 0x590   : > { %9816 = vmatmul.mubr.msk.bf16.vlgmr.msra.gmra.mrb[4].mxu1 %vm465_vm2, %v14413_v7 }
 0x591   : > { %9819 = vmatprep.mubr.msk.bf16.mxu1 %vm465_vm2, %v14414_v1 }
 0x598   : > { %9820 = vmatmul.mubr.msk.bf16.gmra.mrb[8].mxu1 %vm465_vm2, %v14417_v13 }
 0x599   : > { %9823 = vmatprep.mubr.msk.bf16.mxu1 %vm465_vm2, %v14418_v45 }
 0x5a0   : > { %9824 = vmatmul.mubr.msk.bf16.gmra.mrb[12].mxu1 %vm465_vm2, %v14421_v56 }
 0x5a1   : > { %9827 = vmatprep.mubr.msk.bf16.mxu1 %vm465_vm2, %v14422_v63 }
 0x5a8   : > { %9828 = vmatmul.mubr.msk.bf16.gmra.mrb[16].mxu1 %vm465_vm2, %v14425_v9 }
 0x5a9   : > { %9831 = vmatprep.mubr.msk.bf16.mxu1 %vm465_vm2, %v13099_v14 }
 0x5b0   : > { %9832 = vmatmul.mubr.msk.bf16.gmra.mrb[20].mxu1 %vm465_vm2, %v13112_v17 }
 0x5b1   : > { %9835 = vmatprep.mubr.msk.bf16.mxu1 %vm465_vm2, %v14471_v37 }
 0x5b8   : > { %9836 = vmatmul.mubr.msk.bf16.gmra.mrb[24].mxu1 %vm465_vm2, %v14472_v59 }
 0x5b9   : > { %9839 = vmatprep.mubr.msk.bf16.mxu1 %vm465_vm2, %v14475_v57 }
 0x5c0   : > { %9840 = vmatmul.mubr.msk.bf16.gmra.mrb[28].mxu1 %vm465_vm2, %v14476_v60 }
 0x5c1   : > { %9843 = vmatprep.mubr.msk.bf16.mxu1 %vm465_vm2, %v13482_v48 }
 0x5c8   : > { %9844 = vmatmul.mubr.msk.bf16.gmra.mrb[0].mxu1 %vm465_vm2, %v14505_v20 }
 0x5cf   : > { %v13739_v14 = vpop.f32.mrb[36].mxu0 }
 0x5d0   : > { %v13741_v17 = vpop.f32.mrb[37].mxu0 }
 0x5d1   : > { %v13743_v29 = vpop.f32.mrb[38].mxu0 }
 0x5d2   : > { %v13745_v53 = vpop.f32.mrb[39].mxu0 }
 0x5d7   : > { %v9477_v25 = vpop.f32.mrb[8].mxu0 }
 0x5d8   : > { %v5551_v62 = vpop.f32.mrb[9].mxu0  ;;  %v9857_v16 = vadd.f32 %v9477_v25, %v13786_v38 }
 0x5d9   : > { %v9478_v42 = vpop.f32.mrb[10].mxu0  ;;  %v9859_v51 = vadd.f32 %v13786_v38, %v5551_v62 }
 0x5da   : > { %v5554_v32 = vpop.f32.mrb[11].mxu0  ;;  %v9861_v47 = vadd.f32 %v9478_v42, %v13786_v38 }
 0x5db   : > { %v9863_v52 = vadd.f32 %v13786_v38, %v5554_v32 }
 0x5df   : > { %v9481_v61 = vpop.f32.mrb[12].mxu0 }
 0x5e0   : > { %v5567_v8 = vpop.f32.mrb[13].mxu0  ;;  %v9865_v2 = vadd.f32 %v9481_v61, %v13786_v38 }
 0x5e1   : > { %v9482_v28 = vpop.f32.mrb[14].mxu0  ;;  %v9867_v31 = vadd.f32 %v13786_v38, %v5567_v8 }
 0x5e2   : > { %v5570_v26 = vpop.f32.mrb[15].mxu0  ;;  %v9869_v22 = vadd.f32 %v9482_v28, %v13786_v38 }
 0x5e3   : > { %v9871_v33 = vadd.f32 %v13786_v38, %v5570_v26 }
 0x5e7   : > { %v9485_v34 = vpop.f32.mrb[16].mxu0 }
 0x5e8   : > { %v5583_v36 = vpop.f32.mrb[17].mxu0  ;;  %v9873_v62 = vadd.f32 %v9485_v34, %v13786_v38 }
 0x5e9   : > { %v13747_v6 = vpop.f32.mrb[18].mxu0  ;;  %v9875_v42 = vadd.f32 %v13786_v38, %v5583_v36 }
 0x5ea   : > { %v13749_v7 = vpop.f32.mrb[19].mxu0  ;;  %v9877_v61 = vadd.f32 %v13747_v6, %v13786_v38 }
 0x5eb   : > { %v9879_v26 = vadd.f32 %v13786_v38, %v13749_v7 }
 0x5ef   : > { %v13751_v1 = vpop.f32.mrb[20].mxu0 }
 0x5f0   : > { %v13753_v13 = vpop.f32.mrb[21].mxu0 }
 0x5f1   : > { %v13755_v45 = vpop.f32.mrb[22].mxu0  ;;  %v9883_v7 = vadd.f32 %v13786_v38, %v13753_v13 }
 0x5f2   : > { %v13757_v56 = vpop.f32.mrb[23].mxu0 }
 0x5f7   : > { %v13759_v63 = vpop.f32.mrb[24].mxu0 }
 0x5f8   : > { %v13761_v9 = vpop.f32.mrb[25].mxu0 }
 0x5f9   : > { %v13763_v5 = vpop.f32.mrb[26].mxu0 }
 0x5fa   : > { %v13765_v48 = vpop.f32.mrb[27].mxu0 }
 0x5ff   : > { %v13767_v10 = vpop.f32.mrb[28].mxu0 }
 0x600   : > { %v13769_v54 = vpop.f32.mrb[29].mxu0 }
 0x601   : > { %v13771_v37 = vpop.f32.mrb[30].mxu0 }
 0x602   : > { %v13773_v59 = vpop.f32.mrb[31].mxu0 }
 0x607   : > { %v13775_v58 = vpop.f32.mrb[32].mxu0 }
 0x608   : > { %v13777_v55 = vpop.f32.mrb[33].mxu0 }
 0x609   : > { %v13779_v57 = vpop.f32.mrb[34].mxu0 }
 0x60a   : > { %v13781_v60 = vpop.f32.mrb[35].mxu0 }
 0x663   : > { %v9817_v44 = vpop.f32.mrb[4].mxu1 }
 0x664   : > { %v9858_v49 = vadd.f32 %v9857_v16, %v9817_v44  ;;  %v8166_v12 = vpop.f32.mrb[5].mxu1 }
 0x665   : > { %v9860_v3 = vadd.f32 %v9859_v51, %v8166_v12  ;;  %v9818_v43 = vpop.f32.mrb[6].mxu1 }
 0x666   : > { %v8327_v46 = vmax.f32 %v9858_v49, 0.0  ;;  %v9862_v30 = vadd.f32 %v9861_v47, %v9818_v43  ;;  %v8169_v19 = vpop.f32.mrb[7].mxu1  ;;  %v9885_v43 = vadd.f32 %v13755_v45, %v13786_v38 }
 0x667   : > { %v8325_v11 = vmax.f32 %v9860_v3, 0.0  ;;  %v9864_v23 = vadd.f32 %v9863_v52, %v8169_v19  ;;  %v9881_v52 = vadd.f32 %v13751_v1, %v13786_v38  ;;  %v9887_v1 = vadd.f32 %v13786_v38, %v13757_v56 }
 0x668   : > { %8359 = vst.msk [vmem:[%s13796_s12 + $0x10] sm:$0xff] %vm465_vm2, %v8327_v46  ;;  %v8328_v21 = vmax.f32 %v9862_v30, 0.0  ;;  %v9891_v56 = vadd.f32 %v13786_v38, %v13761_v9 }
 0x669   : > { %8357 = vst.msk [vmem:[%s13796_s12] sm:$0xff] %vm465_vm2, %v8325_v11  ;;  %v8326_v24 = vmax.f32 %v9864_v23, 0.0 }
 0x66a   : > { %8360 = vst.msk [vmem:[%s13796_s12 + $0x18] sm:$0xff] %vm465_vm2, %v8328_v21 }
 0x66b   : > { %8358 = vst.msk [vmem:[%s13796_s12 + $0x8] sm:$0xff] %vm465_vm2, %v8326_v24  ;;  %v9821_v35 = vpop.f32.mrb[8].mxu1 }
 0x66c   : > { %v9866_v27 = vadd.f32 %v9865_v2, %v9821_v35  ;;  %v8182_v0 = vpop.f32.mrb[9].mxu1  ;;  %v9889_v35 = vadd.f32 %v13759_v63, %v13786_v38  ;;  %v9895_v63 = vadd.f32 %v13786_v38, %v13765_v48  ;;  %v9899_v48 = vadd.f32 %v13786_v38, %v13769_v54 }
 0x66d   : > { %v9868_v50 = vadd.f32 %v9867_v31, %v8182_v0  ;;  %v9822_v41 = vpop.f32.mrb[10].mxu1 }
 0x66e   : > { %v8331_v39 = vmax.f32 %v9866_v27, 0.0  ;;  %v9870_v40 = vadd.f32 %v9869_v22, %v9822_v41  ;;  %v8185_v15 = vpop.f32.mrb[11].mxu1  ;;  %v9893_v27 = vadd.f32 %v13763_v5, %v13786_v38 }
 0x66f   : > { %v8329_v4 = vmax.f32 %v9868_v50, 0.0  ;;  %v9872_v18 = vadd.f32 %v9871_v33, %v8185_v15 }
 0x670   : > { %8363 = vst.msk [vmem:[%s13796_s12 + $0x30] sm:$0xff] %vm465_vm2, %v8331_v39  ;;  %v8332_v20 = vmax.f32 %v9870_v40, 0.0 }
 0x671   : > { %8361 = vst.msk [vmem:[%s13796_s12 + $0x20] sm:$0xff] %vm465_vm2, %v8329_v4  ;;  %v8330_v25 = vmax.f32 %v9872_v18, 0.0 }
 0x672   : > { %8364 = vst.msk [vmem:[%s13796_s12 + $0x38] sm:$0xff] %vm465_vm2, %v8332_v20  ;;  %v9897_v20 = vadd.f32 %v13767_v10, %v13786_v38  ;;  %v9903_v10 = vadd.f32 %v13786_v38, %v13773_v59  ;;  %v9907_v59 = vadd.f32 %v13786_v38, %v13777_v55 }
 0x673   : > { %8362 = vst.msk [vmem:[%s13796_s12 + $0x28] sm:$0xff] %vm465_vm2, %v8330_v25  ;;  %v9825_v32 = vpop.f32.mrb[12].mxu1 }
 0x674   : > { %v9874_v8 = vadd.f32 %v9873_v62, %v9825_v32  ;;  %v8198_v28 = vpop.f32.mrb[13].mxu1  ;;  %v9901_v62 = vadd.f32 %v13771_v37, %v13786_v38 }
 0x675   : > { %v9876_v34 = vadd.f32 %v9875_v42, %v8198_v28  ;;  %v9826_v16 = vpop.f32.mrb[14].mxu1 }
 0x676   : > { %v8335_v51 = vmax.f32 %v9874_v8, 0.0  ;;  %v9878_v44 = vadd.f32 %v9877_v61, %v9826_v16  ;;  %v8201_v47 = vpop.f32.mrb[15].mxu1 }
 0x677   : > { %v8333_v36 = vmax.f32 %v9876_v34, 0.0  ;;  %v9880_v49 = vadd.f32 %v9879_v26, %v8201_v47 }
 0x678   : > { %8367 = vst.msk [vmem:[%s13796_s12 + $0x50] sm:$0xff] %vm465_vm2, %v8335_v51  ;;  %v8336_v12 = vmax.f32 %v9878_v44, 0.0  ;;  %v9905_v44 = vadd.f32 %v13775_v58, %v13786_v38  ;;  %v9911_v58 = vadd.f32 %v13786_v38, %v13781_v60  ;;  %v9915_v60 = vadd.f32 %v13786_v38, %v13741_v17 }
 0x679   : > { %8365 = vst.msk [vmem:[%s13796_s12 + $0x40] sm:$0xff] %vm465_vm2, %v8333_v36  ;;  %v8334_v6 = vmax.f32 %v9880_v49, 0.0  ;;  %v9909_v36 = vadd.f32 %v13779_v57, %v13786_v38 }
 0x67a   : > { %8368 = vst.msk [vmem:[%s13796_s12 + $0x58] sm:$0xff] %vm465_vm2, %v8336_v12 }
 0x67b   : > { %8366 = vst.msk [vmem:[%s13796_s12 + $0x48] sm:$0xff] %vm465_vm2, %v8334_v6  ;;  %v9829_v3 = vpop.f32.mrb[16].mxu1 }
 0x67c   : > { %v9882_v46 = vadd.f32 %v9881_v52, %v9829_v3  ;;  %v8214_v30 = vpop.f32.mrb[17].mxu1 }
 0x67d   : > { %v9884_v19 = vadd.f32 %v9883_v7, %v8214_v30  ;;  %v9830_v11 = vpop.f32.mrb[18].mxu1 }
 0x67e   : > { %v8339_v23 = vmax.f32 %v9882_v46, 0.0  ;;  %v9886_v21 = vadd.f32 %v9885_v43, %v9830_v11  ;;  %v8217_v24 = vpop.f32.mrb[19].mxu1  ;;  %v9917_v11 = vadd.f32 %v13743_v29, %v13786_v38 }
 0x67f   : > { %v8337_v13 = vmax.f32 %v9884_v19, 0.0  ;;  %v9888_v2 = vadd.f32 %v9887_v1, %v8217_v24  ;;  %v9913_v1 = vadd.f32 %v13739_v14, %v13786_v38  ;;  %v9919_v14 = vadd.f32 %v13786_v38, %v13745_v53 }
 0x680   : > { %8371 = vst.msk [vmem:[%s13796_s12 + $0x70] sm:$0xff] %vm465_vm2, %v8339_v23  ;;  %v8340_v31 = vmax.f32 %v9886_v21, 0.0 }
 0x681   : > { %8369 = vst.msk [vmem:[%s13796_s12 + $0x60] sm:$0xff] %vm465_vm2, %v8337_v13  ;;  %v8338_v45 = vmax.f32 %v9888_v2, 0.0 }
 0x682   : > { %8372 = vst.msk [vmem:[%s13796_s12 + $0x78] sm:$0xff] %vm465_vm2, %v8340_v31 }
 0x683   : > { %8370 = vst.msk [vmem:[%s13796_s12 + $0x68] sm:$0xff] %vm465_vm2, %v8338_v45  ;;  %v9833_v22 = vpop.f32.mrb[20].mxu1 }
 0x684   : > { %v9890_v0 = vadd.f32 %v9889_v35, %v9833_v22  ;;  %v8230_v33 = vpop.f32.mrb[21].mxu1 }
 0x685   : > { %v9892_v50 = vadd.f32 %v9891_v56, %v8230_v33  ;;  %v9834_v41 = vpop.f32.mrb[22].mxu1 }
 0x686   : > { %v8343_v39 = vmax.f32 %v9890_v0, 0.0  ;;  %v9894_v40 = vadd.f32 %v9893_v27, %v9834_v41  ;;  %v8233_v15 = vpop.f32.mrb[23].mxu1 }
 0x687   : > { %v8341_v9 = vmax.f32 %v9892_v50, 0.0  ;;  %v9896_v4 = vadd.f32 %v9895_v63, %v8233_v15 }
 0x688   : > { %8375 = vst.msk [vmem:[%s13796_s12 + $0x90] sm:$0xff] %vm465_vm2, %v8343_v39  ;;  %v8344_v18 = vmax.f32 %v9894_v40, 0.0 }
 0x689   : > { %8373 = vst.msk [vmem:[%s13796_s12 + $0x80] sm:$0xff] %vm465_vm2, %v8341_v9  ;;  %v8342_v5 = vmax.f32 %v9896_v4, 0.0 }
 0x68a   : > { %8376 = vst.msk [vmem:[%s13796_s12 + $0x98] sm:$0xff] %vm465_vm2, %v8344_v18 }
 0x68b   : > { %8374 = vst.msk [vmem:[%s13796_s12 + $0x88] sm:$0xff] %vm465_vm2, %v8342_v5  ;;  %v9837_v25 = vpop.f32.mrb[24].mxu1 }
 0x68c   : > { %v9898_v42 = vadd.f32 %v9897_v20, %v9837_v25  ;;  %v8246_v32 = vpop.f32.mrb[25].mxu1 }
 0x68d   : > { %v9900_v61 = vadd.f32 %v9899_v48, %v8246_v32  ;;  %v9838_v8 = vpop.f32.mrb[26].mxu1 }
 0x68e   : > { %v8347_v28 = vmax.f32 %v9898_v42, 0.0  ;;  %v9902_v26 = vadd.f32 %v9901_v62, %v9838_v8  ;;  %v8249_v34 = vpop.f32.mrb[27].mxu1 }
 0x68f   : > { %v8345_v54 = vmax.f32 %v9900_v61, 0.0  ;;  %v9904_v16 = vadd.f32 %v9903_v10, %v8249_v34 }
 0x690   : > { %8379 = vst.msk [vmem:[%s13796_s12 + $0xb0] sm:$0xff] %vm465_vm2, %v8347_v28  ;;  %v8348_v51 = vmax.f32 %v9902_v26, 0.0 }
 0x691   : > { %8377 = vst.msk [vmem:[%s13796_s12 + $0xa0] sm:$0xff] %vm465_vm2, %v8345_v54  ;;  %v8346_v37 = vmax.f32 %v9904_v16, 0.0 }
 0x692   : > { %8380 = vst.msk [vmem:[%s13796_s12 + $0xb8] sm:$0xff] %vm465_vm2, %v8348_v51 }
 0x693   : > { %8378 = vst.msk [vmem:[%s13796_s12 + $0xa8] sm:$0xff] %vm465_vm2, %v8346_v37  ;;  %v9841_v47 = vpop.f32.mrb[28].mxu1 }
 0x694   : > { %v9906_v49 = vadd.f32 %v9905_v44, %v9841_v47  ;;  %v8262_v12 = vpop.f32.mrb[29].mxu1 }
 0x695   : > { %v9908_v6 = vadd.f32 %v9907_v59, %v8262_v12  ;;  %v9842_v52 = vpop.f32.mrb[30].mxu1 }
 0x696   : > { %v8351_v7 = vmax.f32 %v9906_v49, 0.0  ;;  %v9910_v3 = vadd.f32 %v9909_v36, %v9842_v52  ;;  %v8265_v43 = vpop.f32.mrb[31].mxu1 }
 0x697   : > { %v8349_v55 = vmax.f32 %v9908_v6, 0.0  ;;  %v9912_v46 = vadd.f32 %v9911_v58, %v8265_v43 }
 0x698   : > { %8383 = vst.msk [vmem:[%s13796_s12 + $0xd0] sm:$0xff] %vm465_vm2, %v8351_v7  ;;  %v8352_v30 = vmax.f32 %v9910_v3, 0.0 }
 0x699   : > { %8381 = vst.msk [vmem:[%s13796_s12 + $0xc0] sm:$0xff] %vm465_vm2, %v8349_v55  ;;  %v8350_v57 = vmax.f32 %v9912_v46, 0.0 }
 0x69a   : > { %8384 = vst.msk [vmem:[%s13796_s12 + $0xd8] sm:$0xff] %vm465_vm2, %v8352_v30 }
 0x69b   : > { %8382 = vst.msk [vmem:[%s13796_s12 + $0xc8] sm:$0xff] %vm465_vm2, %v8350_v57  ;;  %v9845_v19 = vpop.f32.mrb[0].mxu1 }
 0x69c   : > { %v9914_v23 = vadd.f32 %v9913_v1, %v9845_v19  ;;  %v8278_v21 = vpop.f32.mrb[1].mxu1 }
 0x69d   : > { %v9916_v24 = vadd.f32 %v9915_v60, %v8278_v21  ;;  %v9846_v13 = vpop.f32.mrb[2].mxu1 }
 0x69e   : > { %v8355_v2 = vmax.f32 %v9914_v23, 0.0  ;;  %v9918_v31 = vadd.f32 %v9917_v11, %v9846_v13  ;;  %v8281_v45 = vpop.f32.mrb[3].mxu1 }
 0x69f   : > { %v8353_v17 = vmax.f32 %v9916_v24, 0.0  ;;  %v9920_v35 = vadd.f32 %v9919_v14, %v8281_v45 }
 0x6a0   : > { %8387 = vst.msk [vmem:[%s13796_s12 + $0xf0] sm:$0xff] %vm465_vm2, %v8355_v2  ;;  %v8356_v56 = vmax.f32 %v9918_v31, 0.0 }
 0x6a1   : > { %8385 = vst.msk [vmem:[%s13796_s12 + $0xe0] sm:$0xff] %vm465_vm2, %v8353_v17  ;;  %v8354_v22 = vmax.f32 %v9920_v35, 0.0 }
 0x6a2   : > { %8388 = vst.msk [vmem:[%s13796_s12 + $0xf8] sm:$0xff] %vm465_vm2, %v8356_v56 }
 0x6a3   : > { %8386 = vst.msk [vmem:[%s13796_s12 + $0xe8] sm:$0xff] %vm465_vm2, %v8354_v22 }
 0x6a4 PF: > { %s17_s24 = sadd.s32 1, %s10583_s24  }
 0x6a5   : > { %p14_p4 = scmp.ge.s32.totalorder %s17_s24, 4  }
 0x6a7   :  { %16 = sbr.rel (!%p14_p4) target bundleno = 1 (0x1), region = 81 }

</bundles_post_ra>
